<compile_context>
chip_gen: v5e
topology: v5e:2x2
jax: 0.10.0
libtpu: 0.0.40
codegen_flags: <defaults>
</compile_context>

<pallas_src>
from functools import partial
from typing import NamedTuple

import jax
import jax.numpy as jnp
import numpy as np
from jax.experimental import pallas as pl
from jax.experimental.pallas import tpu as pltpu


# --------------------------------------------------------------------------- #
# Helpers
# --------------------------------------------------------------------------- #
def _round_up(n, m):
    return ((n + m - 1) // m) * m


def _physical_vmem_bytes():
    """Best-effort per-core VMEM capacity (v5e/v6e: 128 MiB, v7x: 64 MiB)."""
    try:
        info = pltpu.get_tpu_info()
        for attr in ("vmem_capacity_bytes", "vmem_size_bytes", "vmem_bytes"):
            val = getattr(info, attr, None)
            if val:
                return int(val)
    except Exception:
        pass
    return 64 * 1024 * 1024  # conservative default (v7x per-TensorCore)


def _vmem_bytes_estimate(F, V, D, Dp, P, TB, table_itemsize, out_itemsize,
                         embed_lanes, table_buffers):
    """(8,128)-padded VMEM footprint of one grid step (double-buffered I/O,
    `table_buffers` copies of the resident table, scratch + live temps)."""
    lane = lambda n: _round_up(n, 128)
    sub = lambda n: _round_up(n, 8)
    if embed_lanes:                       # D % 128 == 0 path: embed dim on lanes
        x_blk = sub(TB) * lane(F) * 4
        tab_blk = sub(V) * lane(F * D) * table_itemsize
        out_blk = TB * lane(P * D) * out_itemsize
        g_scr = F * TB * lane(F * D) * 4
        onehot = sub(TB) * lane(V) * 4
        temps = 4 * sub(TB) * lane(D) * 4
    else:                                 # batch on lanes
        x_blk = sub(F) * lane(TB) * 4
        tab_blk = sub(F * Dp) * lane(V) * table_itemsize
        out_blk = P * sub(D) * lane(TB) * out_itemsize
        g_scr = F * sub(F * Dp) * lane(TB) * 4
        onehot = sub(V) * lane(TB) * 4
        temps = 4 * sub(D) * lane(TB) * 4
    need = (2 * x_blk + table_buffers * tab_blk + 2 * out_blk
            + g_scr + onehot + temps)
    return int(need * 1.25) + (2 << 20)   # 25% headroom + compiler scratch


# --------------------------------------------------------------------------- #
# Kernels
# --------------------------------------------------------------------------- #
def _fm_kernel_batch_lanes(x_ref, wt_ref, out_ref, g_ref, *,
                           num_fields, embed_dim, padded_dim, vocab, precision):
    """Fused gather + pairwise product; batch on the lane (minor) axis.

    x_ref   : (F, TB)        int32  field indices (already-offset, shared vocab)
    wt_ref  : (F*Dp, V)      float  concatenated transposed tables
    out_ref : (P, D, TB)     float  pairwise products (lane-dense stores)
    g_ref   : (F, F*Dp, TB)  f32    g_ref[i] = concat_f(tables[f][x[:, i]].T)
    """
    F, D, Dp, V = num_fields, embed_dim, padded_dim, vocab
    TB = x_ref.shape[1]

    # Phase 1: ONE MXU matmul per field position gathers all F tables at once.
    # Each one-hot is built at point of use so only one (V, TB) temp is live.
    for i in range(F):
        idx = x_ref[pl.ds(i, 1), :]                                   # (1, TB)
        iota_v = jax.lax.broadcasted_iota(jnp.int32, (V, TB), 0)
        onehot = (iota_v == idx).astype(wt_ref.dtype)                 # (V, TB)
        g_ref[i] = jnp.dot(wt_ref[...], onehot,                       # (F*Dp, TB)
                           preferred_element_type=jnp.float32,
                           precision=precision)

    # Phase 2: pairwise products — pure VPU, direct per-pair full-width stores.
    # NOTE: fully unrolled pair loop is fine up to F ~ 8-10; tile the pair axis
    # in the grid for larger F.
    p = 0
    for i in range(F - 1):
        for j in range(i + 1, F):
            a = g_ref[i, j * Dp:j * Dp + D, :]      # tables[j][x[:, i]]  (D, TB)
            b = g_ref[j, i * Dp:i * Dp + D, :]      # tables[i][x[:, j]]  (D, TB)
            out_ref[p] = (a * b).astype(out_ref.dtype)
            p += 1


def _fm_kernel_embed_lanes(x_ref, wt_ref, out_ref, g_ref, *,
                           num_fields, embed_dim, vocab, precision):
    """Used when D % 128 == 0: embed dim on the lane axis, so the output is
    written directly in PyTorch row order (no wrapper transpose).

    x_ref   : (TB, F)       int32
    wt_ref  : (V, F*D)      float  concatenated tables
    out_ref : (TB, P*D)     float  pair p occupies lanes [p*D, (p+1)*D)
    g_ref   : (F, TB, F*D)  f32    g_ref[i][b, f*D+d] = tables[f][x[b, i], d]
    """
    F, D, V = num_fields, embed_dim, vocab
    TB = x_ref.shape[0]

    for i in range(F):
        idx = x_ref[:, i:i + 1]                                       # (TB, 1)
        iota_v = jax.lax.broadcasted_iota(jnp.int32, (TB, V), 1)
        onehot = (iota_v == idx).astype(wt_ref.dtype)                 # (TB, V)
        g_ref[i] = jnp.dot(onehot, wt_ref[...],                       # (TB, F*D)
                           preferred_element_type=jnp.float32,
                           precision=precision)

    p = 0
    for i in range(F - 1):
        for j in range(i + 1, F):
            a = g_ref[i, :, j * D:(j + 1) * D]      # tables[j][x[:, i]]  (TB, D)
            b = g_ref[j, :, i * D:(i + 1) * D]      # tables[i][x[:, j]]  (TB, D)
            out_ref[:, p * D:(p + 1) * D] = (a * b).astype(out_ref.dtype)
            p += 1


# --------------------------------------------------------------------------- #
# Parameter preparation (one-time, hoisted out of the forward path)
# --------------------------------------------------------------------------- #
class FMParams(NamedTuple):
    table: jax.Array       # transformed table (layout-dependent) or raw (F, V, D)
    layout: str            # "batch_lanes" | "embed_lanes" | "xla_gather"
    num_fields: int
    vocab: int
    embed_dim: int
    padded_dim: int


def prepare_context_fm_params(tables):
    """tables: (F, V, D) stacked nn.Embedding weights (shared vocab V)."""
    F, V, D = tables.shape
    P = F * (F - 1) // 2
    embed_lanes = (D % 128 == 0)
    Dp = D if embed_lanes else _round_up(D, 8)

    cap = int(0.75 * _physical_vmem_bytes())
    est = _vmem_bytes_estimate(F, V, D, Dp, P, 128, tables.dtype.itemsize,
                               tables.dtype.itemsize, embed_lanes,
                               table_buffers=2)
    if est > cap:
        # TODO(synk): manual-DMA row-gather kernel for huge vocabularies
        # (tables in HBM via memory_space=pl.ANY + pltpu.make_async_copy);
        # until then, fall back to an XLA gather outside Pallas.
        return FMParams(tables, "xla_gather", F, V, D, Dp)

    if embed_lanes:
        wt = jnp.transpose(tables, (1, 0, 2)).reshape(V, F * D)       # (V, F*D)
        return FMParams(wt, "embed_lanes", F, V, D, Dp)

    tab_pad = tables if Dp == D else jnp.pad(tables,
                                             ((0, 0), (0, 0), (0, Dp - D)))
    wt = jnp.transpose(tab_pad, (0, 2, 1)).reshape(F * Dp, V)         # (F*Dp, V)
    return FMParams(wt, "batch_lanes", F, V, D, Dp)


def _xla_forward(tables, x):
    """Large-vocab fallback: XLA gather + VPU products (no Pallas)."""
    F = tables.shape[0]
    pairs = []
    for i in range(F - 1):
        for j in range(i + 1, F):
            a = jnp.take(tables[j], x[:, i], axis=0)
            b = jnp.take(tables[i], x[:, j], axis=0)
            pairs.append(a * b)
    return jnp.stack(pairs, axis=1)


# --------------------------------------------------------------------------- #
# Forward
# --------------------------------------------------------------------------- #
def _pick_batch_tile(B, est_fn, cap):
    # Keep grid >= 2 whenever B >= 256 so the "parallel" batch axis can shard
    # across v7x's two TensorCores (a few extra 0.35us grid steps on single-TC
    # v5e/v6e are negligible); otherwise take the largest tile that fits VMEM.
    max_tb = min(512, max(128, _round_up(B, 128)))
    if B >= 256:
        max_tb = min(max_tb, max(128, (B // 2) // 128 * 128))
    for cand in (512, 384, 256, 128):
        if cand <= max_tb and est_fn(cand) <= cap:
            return cand
    return 128


def context_fm_forward(params, x, *, batch_tile=None, out_dtype=None,
                       precision=jax.lax.Precision.HIGHEST, interpret=False):
    """x: (B, F) int (already-offset shared-vocab indices) -> (B, P, D).

    precision=HIGHEST keeps the one-hot MXU gather bit-exact vs the f32
    reference (bf16x3 exactly reconstructs f32); pass DEFAULT + bf16 tables for
    the cheaper recsys-style configuration.
    NOTE: out-of-range indices silently gather zeros (nn.Embedding would raise).
    """
    F, V, D, Dp = params.num_fields, params.vocab, params.embed_dim, params.padded_dim
    P = F * (F - 1) // 2
    B = x.shape[0]
    assert x.shape[1] == F, (x.shape, F)
    out_dtype = params.table.dtype if out_dtype is None else np.dtype(out_dtype)

    if params.layout == "xla_gather":
        return _xla_forward(params.table, x).astype(out_dtype)

    embed_lanes = params.layout == "embed_lanes"
    cap = int(0.75 * _physical_vmem_bytes())

    def est(tb, table_buffers=1):
        return _vmem_bytes_estimate(F, V, D, Dp, P, tb,
                                    params.table.dtype.itemsize,
                                    np.dtype(out_dtype).itemsize,
                                    embed_lanes, table_buffers)

    if batch_tile is None:
        batch_tile = _pick_batch_tile(B, est, cap)
    assert batch_tile % 128 == 0, "batch_tile must be a multiple of 128"

    Bp = _round_up(B, batch_tile)
    x = x.astype(jnp.int32)
    if Bp != B:
        x = jnp.pad(x, ((0, Bp - B), (0, 0)))   # padded rows gather index 0, dropped
    grid = (Bp // batch_tile,)

    def run(single_buffer_tables):
        table_buffers = 1 if single_buffer_tables else 2
        vmem_limit = int(min(cap, max(est(batch_tile, table_buffers),
                                      16 * 1024 * 1024)))
        # Constant index_map -> the tables never change between grid steps;
        # single-buffer them so their VMEM footprint is counted once.
        tab_kwargs = ({"pipeline_mode": pl.Buffered(buffer_count=1)}
                      if single_buffer_tables else {})
        compiler_params = pltpu.CompilerParams(
            dimension_semantics=("parallel",), vmem_limit_bytes=vmem_limit)

        if embed_lanes:
            kernel = partial(_fm_kernel_embed_lanes, num_fields=F, embed_dim=D,
                             vocab=V, precision=precision)
            return pl.pallas_call(
                kernel,
                out_shape=jax.ShapeDtypeStruct((Bp, P * D), out_dtype),
                grid=grid,
                in_specs=[
                    pl.BlockSpec((batch_tile, F), lambda b: (b, 0)),
                    pl.BlockSpec((V, F * D), lambda b: (0, 0), **tab_kwargs),
                ],
                out_specs=pl.BlockSpec((batch_tile, P * D), lambda b: (b, 0)),
                scratch_shapes=[pltpu.VMEM((F, batch_tile, F * D), jnp.float32)],
                compiler_params=compiler_params,
                interpret=interpret,
            )(x, params.table)

        kernel = partial(_fm_kernel_batch_lanes, num_fields=F, embed_dim=D,
                         padded_dim=Dp, vocab=V, precision=precision)
        return pl.pallas_call(
            kernel,
            out_shape=jax.ShapeDtypeStruct((P, D, Bp), out_dtype),
            grid=grid,
            in_specs=[
                pl.BlockSpec((F, batch_tile), lambda b: (0, b)),
                pl.BlockSpec((F * Dp, V), lambda b: (0, 0), **tab_kwargs),
            ],
            out_specs=pl.BlockSpec((P, D, batch_tile), lambda b: (0, 0, b)),
            scratch_shapes=[pltpu.VMEM((F, F * Dp, batch_tile), jnp.float32)],
            compiler_params=compiler_params,
            interpret=interpret,
        )(x.T, params.table)

    try:
        out = run(single_buffer_tables=True)
    except Exception:
        # pl.Buffered(1) not accepted by this jax/Mosaic version: fall back to
        # the default (double-buffered) resident-table spec.
        out = run(single_buffer_tables=False)

    if embed_lanes:
        out = out.reshape(Bp, P, D)          # free: row-major layout preserved
        return out[:B] if Bp != B else out
    # D not a multiple of 128: keep kernel stores lane-dense (full-width vst)
    # and pay one wrapper transpose back to the PyTorch (B, P, D) layout.
    out = jnp.transpose(out, (2, 0, 1))
    return out[:B] if Bp != B else out


# --------------------------------------------------------------------------- #
# Init + reference + test
# --------------------------------------------------------------------------- #
def init_embeddings(key, field_dims, embed_dim):
    """xavier_uniform init for F tables of shape (V, D), V = sum(field_dims)."""
    num_fields = len(field_dims)
    vocab = int(sum(field_dims))
    bound = float(np.sqrt(6.0 / (vocab + embed_dim)))
    keys = jax.random.split(key, num_fields)
    tables = [jax.random.uniform(k, (vocab, embed_dim), jnp.float32, -bound, bound)
              for k in keys]
    return jnp.stack(tables, axis=0)          # (F, V, D)


def _reference(tables, x):
    F = tables.shape[0]
    xs = [jnp.take(tables[f], x, axis=0) for f in range(F)]   # (B, F, D) each
    pairs = []
    for i in range(F - 1):
        for j in range(i + 1, F):
            pairs.append(xs[j][:, i] * xs[i][:, j])
    return jnp.stack(pairs, axis=1)


if __name__ == "__main__":
    def run_case(field_dims, embed_dim, batch, key):
        F = len(field_dims)
        V = int(sum(field_dims))
        P = F * (F - 1) // 2
        k_emb, k_x = jax.random.split(key)
        tables = init_embeddings(k_emb, field_dims, embed_dim)
        params = prepare_context_fm_params(tables)     # one-time param transform
        x = jax.random.randint(k_x, (batch, F), 0, V, dtype=jnp.int32)

        out = jax.block_until_ready(context_fm_forward(params, x))
        ref = jax.block_until_ready(_reference(tables, x))

        assert out.shape == (batch, P, embed_dim), out.shape
        np.testing.assert_allclose(np.asarray(out), np.asarray(ref),
                                   rtol=1e-6, atol=1e-6)

    key = jax.random.PRNGKey(0)
    k1, k2 = jax.random.split(key)
    # Case 1: D=32 -> lane-dense (P, D, B) kernel layout + wrapper transpose.
    run_case([3, 4, 5, 4], 32, 256, k1)
    # Case 2: D=128 -> direct (B, P*D) stores, no wrapper transpose.
    run_case([3, 4, 5, 4], 128, 256, k2)

    print("KERNEL_OK")
</pallas_src>

<mosaic_0001>
module attributes {stable_mosaic.version = 11 : i64} {
  func.func @_fm_kernel_batch_lanes(%arg0: i32, %arg1: memref<4x128xi32, #tpu.memory_space<vmem>>, %arg2: memref<128x16xf32, #tpu.memory_space<vmem>>, %arg3: memref<6x32x128xf32, #tpu.memory_space<vmem>>, %arg4: memref<4x128x128xf32, #tpu.memory_space<vmem>>) attributes {dimension_semantics = [#tpu.dimension_semantics<parallel>], iteration_bounds = array<i64: 2>, scalar_prefetch = 0 : i64, scratch_operands = 1 : i64, tpu.core_type = #tpu.core_type<tc>, window_params = [{transform_indices = @transform_0, window_bounds = array<i64: 4, 128>}, {pipeline_mode = #tpu.pipeline_mode<synchronous>, transform_indices = @transform_1, window_bounds = array<i64: 128, 16>}, {transform_indices = @transform_2, window_bounds = array<i64: 6, 32, 128>}]} {
    %c0 = arith.constant 0 : index
    %c0_0 = arith.constant 0 : index
    %0 = vector.load %arg1[%c0, %c0_0] : memref<4x128xi32, #tpu.memory_space<vmem>>, vector<1x128xi32>
    %1 = tpu.iota {dimensions = array<i32: 0>} : vector<16x128xi32>
    %2 = vector.broadcast %0 : vector<1x128xi32> to vector<16x128xi32>
    %3 = arith.cmpi eq, %1, %2 : vector<16x128xi32>
    %4 = arith.extui %3 : vector<16x128xi1> to vector<16x128xi32>
    %5 = arith.sitofp %4 : vector<16x128xi32> to vector<16x128xf32>
    %c0_1 = arith.constant 0 : index
    %c0_2 = arith.constant 0 : index
    %6 = vector.load %arg2[%c0_1, %c0_2] : memref<128x16xf32, #tpu.memory_space<vmem>>, vector<128x16xf32>
    %cst = arith.constant dense<0.000000e+00> : vector<128x128xf32>
    %7 = tpu.matmul %6, %5, %cst {dimension_numbers = #tpu.dot_dimension_numbers<[1], [0], [0], [1], [0, 0, 1, 1], [], []>, precision = #tpu.contract_precision<fp32>} : vector<128x16xf32>, vector<16x128xf32>, vector<128x128xf32> -> vector<128x128xf32>
    %c0_3 = arith.constant 0 : index
    %c0_4 = arith.constant 0 : index
    %c0_5 = arith.constant 0 : index
    %8 = vector.load %arg4[%c0_3, %c0_4, %c0_5] : memref<4x128x128xf32, #tpu.memory_space<vmem>>, vector<1x128x128xf32>
    %9 = vector.shape_cast %8 : vector<1x128x128xf32> to vector<128x128xf32>
    %10 = vector.shape_cast %7 : vector<128x128xf32> to vector<1x128x128xf32>
    tpu.vector_store %arg4[%c0_3, %c0_4, %c0_5], %10 {strides = array<i32>} : memref<4x128x128xf32, #tpu.memory_space<vmem>>, vector<1x128x128xf32>,
    %c1 = arith.constant 1 : index
    %c0_6 = arith.constant 0 : index
    %11 = vector.load %arg1[%c1, %c0_6] : memref<4x128xi32, #tpu.memory_space<vmem>>, vector<1x128xi32>
    %12 = tpu.iota {dimensions = array<i32: 0>} : vector<16x128xi32>
    %13 = vector.broadcast %11 : vector<1x128xi32> to vector<16x128xi32>
    %14 = arith.cmpi eq, %12, %13 : vector<16x128xi32>
    %15 = arith.extui %14 : vector<16x128xi1> to vector<16x128xi32>
    %16 = arith.sitofp %15 : vector<16x128xi32> to vector<16x128xf32>
    %c0_7 = arith.constant 0 : index
    %c0_8 = arith.constant 0 : index
    %17 = vector.load %arg2[%c0_7, %c0_8] : memref<128x16xf32, #tpu.memory_space<vmem>>, vector<128x16xf32>
    %cst_9 = arith.constant dense<0.000000e+00> : vector<128x128xf32>
    %18 = tpu.matmul %17, %16, %cst_9 {dimension_numbers = #tpu.dot_dimension_numbers<[1], [0], [0], [1], [0, 0, 1, 1], [], []>, precision = #tpu.contract_precision<fp32>} : vector<128x16xf32>, vector<16x128xf32>, vector<128x128xf32> -> vector<128x128xf32>
    %c1_10 = arith.constant 1 : index
    %c0_11 = arith.constant 0 : index
    %c0_12 = arith.constant 0 : index
    %19 = vector.load %arg4[%c1_10, %c0_11, %c0_12] : memref<4x128x128xf32, #tpu.memory_space<vmem>>, vector<1x128x128xf32>
    %20 = vector.shape_cast %19 : vector<1x128x128xf32> to vector<128x128xf32>
    %21 = vector.shape_cast %18 : vector<128x128xf32> to vector<1x128x128xf32>
    tpu.vector_store %arg4[%c1_10, %c0_11, %c0_12], %21 {strides = array<i32>} : memref<4x128x128xf32, #tpu.memory_space<vmem>>, vector<1x128x128xf32>,
    %c2 = arith.constant 2 : index
    %c0_13 = arith.constant 0 : index
    %22 = vector.load %arg1[%c2, %c0_13] : memref<4x128xi32, #tpu.memory_space<vmem>>, vector<1x128xi32>
    %23 = tpu.iota {dimensions = array<i32: 0>} : vector<16x128xi32>
    %24 = vector.broadcast %22 : vector<1x128xi32> to vector<16x128xi32>
    %25 = arith.cmpi eq, %23, %24 : vector<16x128xi32>
    %26 = arith.extui %25 : vector<16x128xi1> to vector<16x128xi32>
    %27 = arith.sitofp %26 : vector<16x128xi32> to vector<16x128xf32>
    %c0_14 = arith.constant 0 : index
    %c0_15 = arith.constant 0 : index
    %28 = vector.load %arg2[%c0_14, %c0_15] : memref<128x16xf32, #tpu.memory_space<vmem>>, vector<128x16xf32>
    %cst_16 = arith.constant dense<0.000000e+00> : vector<128x128xf32>
    %29 = tpu.matmul %28, %27, %cst_16 {dimension_numbers = #tpu.dot_dimension_numbers<[1], [0], [0], [1], [0, 0, 1, 1], [], []>, precision = #tpu.contract_precision<fp32>} : vector<128x16xf32>, vector<16x128xf32>, vector<128x128xf32> -> vector<128x128xf32>
    %c2_17 = arith.constant 2 : index
    %c0_18 = arith.constant 0 : index
    %c0_19 = arith.constant 0 : index
    %30 = vector.load %arg4[%c2_17, %c0_18, %c0_19] : memref<4x128x128xf32, #tpu.memory_space<vmem>>, vector<1x128x128xf32>
    %31 = vector.shape_cast %30 : vector<1x128x128xf32> to vector<128x128xf32>
    %32 = vector.shape_cast %29 : vector<128x128xf32> to vector<1x128x128xf32>
    tpu.vector_store %arg4[%c2_17, %c0_18, %c0_19], %32 {strides = array<i32>} : memref<4x128x128xf32, #tpu.memory_space<vmem>>, vector<1x128x128xf32>,
    %c3 = arith.constant 3 : index
    %c0_20 = arith.constant 0 : index
    %33 = vector.load %arg1[%c3, %c0_20] : memref<4x128xi32, #tpu.memory_space<vmem>>, vector<1x128xi32>
    %34 = tpu.iota {dimensions = array<i32: 0>} : vector<16x128xi32>
    %35 = vector.broadcast %33 : vector<1x128xi32> to vector<16x128xi32>
    %36 = arith.cmpi eq, %34, %35 : vector<16x128xi32>
    %37 = arith.extui %36 : vector<16x128xi1> to vector<16x128xi32>
    %38 = arith.sitofp %37 : vector<16x128xi32> to vector<16x128xf32>
    %c0_21 = arith.constant 0 : index
    %c0_22 = arith.constant 0 : index
    %39 = vector.load %arg2[%c0_21, %c0_22] : memref<128x16xf32, #tpu.memory_space<vmem>>, vector<128x16xf32>
    %cst_23 = arith.constant dense<0.000000e+00> : vector<128x128xf32>
    %40 = tpu.matmul %39, %38, %cst_23 {dimension_numbers = #tpu.dot_dimension_numbers<[1], [0], [0], [1], [0, 0, 1, 1], [], []>, precision = #tpu.contract_precision<fp32>} : vector<128x16xf32>, vector<16x128xf32>, vector<128x128xf32> -> vector<128x128xf32>
    %c3_24 = arith.constant 3 : index
    %c0_25 = arith.constant 0 : index
    %c0_26 = arith.constant 0 : index
    %41 = vector.load %arg4[%c3_24, %c0_25, %c0_26] : memref<4x128x128xf32, #tpu.memory_space<vmem>>, vector<1x128x128xf32>
    %42 = vector.shape_cast %41 : vector<1x128x128xf32> to vector<128x128xf32>
    %43 = vector.shape_cast %40 : vector<128x128xf32> to vector<1x128x128xf32>
    tpu.vector_store %arg4[%c3_24, %c0_25, %c0_26], %43 {strides = array<i32>} : memref<4x128x128xf32, #tpu.memory_space<vmem>>, vector<1x128x128xf32>,
    %c0_27 = arith.constant 0 : index
    %c32 = arith.constant 32 : index
    %c0_28 = arith.constant 0 : index
    %44 = vector.load %arg4[%c0_27, %c32, %c0_28] : memref<4x128x128xf32, #tpu.memory_space<vmem>>, vector<1x32x128xf32>
    %45 = vector.shape_cast %44 : vector<1x32x128xf32> to vector<32x128xf32>
    %c1_29 = arith.constant 1 : index
    %c0_30 = arith.constant 0 : index
    %c0_31 = arith.constant 0 : index
    %46 = vector.load %arg4[%c1_29, %c0_30, %c0_31] : memref<4x128x128xf32, #tpu.memory_space<vmem>>, vector<1x32x128xf32>
    %47 = vector.shape_cast %46 : vector<1x32x128xf32> to vector<32x128xf32>
    %48 = arith.mulf %45, %47 : vector<32x128xf32>
    %c0_32 = arith.constant 0 : index
    %c0_33 = arith.constant 0 : index
    %c0_34 = arith.constant 0 : index
    %49 = vector.load %arg3[%c0_32, %c0_33, %c0_34] : memref<6x32x128xf32, #tpu.memory_space<vmem>>, vector<1x32x128xf32>
    %50 = vector.shape_cast %49 : vector<1x32x128xf32> to vector<32x128xf32>
    %51 = vector.shape_cast %48 : vector<32x128xf32> to vector<1x32x128xf32>
    tpu.vector_store %arg3[%c0_32, %c0_33, %c0_34], %51 {strides = array<i32>} : memref<6x32x128xf32, #tpu.memory_space<vmem>>, vector<1x32x128xf32>,
    %c0_35 = arith.constant 0 : index
    %c64 = arith.constant 64 : index
    %c0_36 = arith.constant 0 : index
    %52 = vector.load %arg4[%c0_35, %c64, %c0_36] : memref<4x128x128xf32, #tpu.memory_space<vmem>>, vector<1x32x128xf32>
    %53 = vector.shape_cast %52 : vector<1x32x128xf32> to vector<32x128xf32>
    %c2_37 = arith.constant 2 : index
    %c0_38 = arith.constant 0 : index
    %c0_39 = arith.constant 0 : index
    %54 = vector.load %arg4[%c2_37, %c0_38, %c0_39] : memref<4x128x128xf32, #tpu.memory_space<vmem>>, vector<1x32x128xf32>
    %55 = vector.shape_cast %54 : vector<1x32x128xf32> to vector<32x128xf32>
    %56 = arith.mulf %53, %55 : vector<32x128xf32>
    %c1_40 = arith.constant 1 : index
    %c0_41 = arith.constant 0 : index
    %c0_42 = arith.constant 0 : index
    %57 = vector.load %arg3[%c1_40, %c0_41, %c0_42] : memref<6x32x128xf32, #tpu.memory_space<vmem>>, vector<1x32x128xf32>
    %58 = vector.shape_cast %57 : vector<1x32x128xf32> to vector<32x128xf32>
    %59 = vector.shape_cast %56 : vector<32x128xf32> to vector<1x32x128xf32>
    tpu.vector_store %arg3[%c1_40, %c0_41, %c0_42], %59 {strides = array<i32>} : memref<6x32x128xf32, #tpu.memory_space<vmem>>, vector<1x32x128xf32>,
    %c0_43 = arith.constant 0 : index
    %c96 = arith.constant 96 : index
    %c0_44 = arith.constant 0 : index
    %60 = vector.load %arg4[%c0_43, %c96, %c0_44] : memref<4x128x128xf32, #tpu.memory_space<vmem>>, vector<1x32x128xf32>
    %61 = vector.shape_cast %60 : vector<1x32x128xf32> to vector<32x128xf32>
    %c3_45 = arith.constant 3 : index
    %c0_46 = arith.constant 0 : index
    %c0_47 = arith.constant 0 : index
    %62 = vector.load %arg4[%c3_45, %c0_46, %c0_47] : memref<4x128x128xf32, #tpu.memory_space<vmem>>, vector<1x32x128xf32>
    %63 = vector.shape_cast %62 : vector<1x32x128xf32> to vector<32x128xf32>
    %64 = arith.mulf %61, %63 : vector<32x128xf32>
    %c2_48 = arith.constant 2 : index
    %c0_49 = arith.constant 0 : index
    %c0_50 = arith.constant 0 : index
    %65 = vector.load %arg3[%c2_48, %c0_49, %c0_50] : memref<6x32x128xf32, #tpu.memory_space<vmem>>, vector<1x32x128xf32>
    %66 = vector.shape_cast %65 : vector<1x32x128xf32> to vector<32x128xf32>
    %67 = vector.shape_cast %64 : vector<32x128xf32> to vector<1x32x128xf32>
    tpu.vector_store %arg3[%c2_48, %c0_49, %c0_50], %67 {strides = array<i32>} : memref<6x32x128xf32, #tpu.memory_space<vmem>>, vector<1x32x128xf32>,
    %c1_51 = arith.constant 1 : index
    %c64_52 = arith.constant 64 : index
    %c0_53 = arith.constant 0 : index
    %68 = vector.load %arg4[%c1_51, %c64_52, %c0_53] : memref<4x128x128xf32, #tpu.memory_space<vmem>>, vector<1x32x128xf32>
    %69 = vector.shape_cast %68 : vector<1x32x128xf32> to vector<32x128xf32>
    %c2_54 = arith.constant 2 : index
    %c32_55 = arith.constant 32 : index
    %c0_56 = arith.constant 0 : index
    %70 = vector.load %arg4[%c2_54, %c32_55, %c0_56] : memref<4x128x128xf32, #tpu.memory_space<vmem>>, vector<1x32x128xf32>
    %71 = vector.shape_cast %70 : vector<1x32x128xf32> to vector<32x128xf32>
    %72 = arith.mulf %69, %71 : vector<32x128xf32>
    %c3_57 = arith.constant 3 : index
    %c0_58 = arith.constant 0 : index
    %c0_59 = arith.constant 0 : index
    %73 = vector.load %arg3[%c3_57, %c0_58, %c0_59] : memref<6x32x128xf32, #tpu.memory_space<vmem>>, vector<1x32x128xf32>
    %74 = vector.shape_cast %73 : vector<1x32x128xf32> to vector<32x128xf32>
    %75 = vector.shape_cast %72 : vector<32x128xf32> to vector<1x32x128xf32>
    tpu.vector_store %arg3[%c3_57, %c0_58, %c0_59], %75 {strides = array<i32>} : memref<6x32x128xf32, #tpu.memory_space<vmem>>, vector<1x32x128xf32>,
    %c1_60 = arith.constant 1 : index
    %c96_61 = arith.constant 96 : index
    %c0_62 = arith.constant 0 : index
    %76 = vector.load %arg4[%c1_60, %c96_61, %c0_62] : memref<4x128x128xf32, #tpu.memory_space<vmem>>, vector<1x32x128xf32>
    %77 = vector.shape_cast %76 : vector<1x32x128xf32> to vector<32x128xf32>
    %c3_63 = arith.constant 3 : index
    %c32_64 = arith.constant 32 : index
    %c0_65 = arith.constant 0 : index
    %78 = vector.load %arg4[%c3_63, %c32_64, %c0_65] : memref<4x128x128xf32, #tpu.memory_space<vmem>>, vector<1x32x128xf32>
    %79 = vector.shape_cast %78 : vector<1x32x128xf32> to vector<32x128xf32>
    %80 = arith.mulf %77, %79 : vector<32x128xf32>
    %c4 = arith.constant 4 : index
    %c0_66 = arith.constant 0 : index
    %c0_67 = arith.constant 0 : index
    %81 = vector.load %arg3[%c4, %c0_66, %c0_67] : memref<6x32x128xf32, #tpu.memory_space<vmem>>, vector<1x32x128xf32>
    %82 = vector.shape_cast %81 : vector<1x32x128xf32> to vector<32x128xf32>
    %83 = vector.shape_cast %80 : vector<32x128xf32> to vector<1x32x128xf32>
    tpu.vector_store %arg3[%c4, %c0_66, %c0_67], %83 {strides = array<i32>} : memref<6x32x128xf32, #tpu.memory_space<vmem>>, vector<1x32x128xf32>,
    %c2_68 = arith.constant 2 : index
    %c96_69 = arith.constant 96 : index
    %c0_70 = arith.constant 0 : index
    %84 = vector.load %arg4[%c2_68, %c96_69, %c0_70] : memref<4x128x128xf32, #tpu.memory_space<vmem>>, vector<1x32x128xf32>
    %85 = vector.shape_cast %84 : vector<1x32x128xf32> to vector<32x128xf32>
    %c3_71 = arith.constant 3 : index
    %c64_72 = arith.constant 64 : index
    %c0_73 = arith.constant 0 : index
    %86 = vector.load %arg4[%c3_71, %c64_72, %c0_73] : memref<4x128x128xf32, #tpu.memory_space<vmem>>, vector<1x32x128xf32>
    %87 = vector.shape_cast %86 : vector<1x32x128xf32> to vector<32x128xf32>
    %88 = arith.mulf %85, %87 : vector<32x128xf32>
    %c5 = arith.constant 5 : index
    %c0_74 = arith.constant 0 : index
    %c0_75 = arith.constant 0 : index
    %89 = vector.load %arg3[%c5, %c0_74, %c0_75] : memref<6x32x128xf32, #tpu.memory_space<vmem>>, vector<1x32x128xf32>
    %90 = vector.shape_cast %89 : vector<1x32x128xf32> to vector<32x128xf32>
    %91 = vector.shape_cast %88 : vector<32x128xf32> to vector<1x32x128xf32>
    tpu.vector_store %arg3[%c5, %c0_74, %c0_75], %91 {strides = array<i32>} : memref<6x32x128xf32, #tpu.memory_space<vmem>>, vector<1x32x128xf32>,
    return
  }
  func.func @transform_0(%arg0: i32) -> (i32, i32) {
    %c0_i32 = arith.constant 0 : i32
    %c0_i32_0 = arith.constant 0 : i32
    return %c0_i32, %arg0 : i32, i32
  }
  func.func @transform_1(%arg0: i32) -> (i32, i32) {
    %c0_i32 = arith.constant 0 : i32
    %c0_i32_0 = arith.constant 0 : i32
    %c0_i32_1 = arith.constant 0 : i32
    return %c0_i32, %c0_i32_0 : i32, i32
  }
  func.func @transform_2(%arg0: i32) -> (i32, i32, i32) {
    %c0_i32 = arith.constant 0 : i32
    %c0_i32_0 = arith.constant 0 : i32
    %c0_i32_1 = arith.constant 0 : i32
    return %c0_i32, %c0_i32_0, %arg0 : i32, i32, i32
  }
}

module attributes {stable_mosaic.version = 11 : i64} {
  func.func @_fm_kernel_batch_lanes(%arg0: i32, %arg1: memref<4x128xi32, #tpu.memory_space<vmem>>, %arg2: memref<128x16xf32, #tpu.memory_space<vmem>>, %arg3: memref<6x32x128xf32, #tpu.memory_space<vmem>>, %arg4: memref<4x128x128xf32, #tpu.memory_space<vmem>>) attributes {dimension_semantics = [#tpu.dimension_semantics<parallel>], iteration_bounds = array<i64: 2>, scalar_prefetch = 0 : i64, scratch_operands = 1 : i64, tpu.core_type = #tpu.core_type<tc>, window_params = [{transform_indices = @transform_0, window_bounds = array<i64: 4, 128>}, {pipeline_mode = #tpu.pipeline_mode<synchronous>, transform_indices = @transform_1, window_bounds = array<i64: 128, 16>}, {transform_indices = @transform_2, window_bounds = array<i64: 6, 32, 128>}]} {
    %c0 = arith.constant 0 : index
    %c0_0 = arith.constant 0 : index
    %0 = vector.load %arg1[%c0, %c0_0] : memref<4x128xi32, #tpu.memory_space<vmem>>, vector<1x128xi32>
    %1 = tpu.iota {dimensions = array<i32: 0>} : vector<16x128xi32>
    %2 = vector.broadcast %0 : vector<1x128xi32> to vector<16x128xi32>
    %3 = arith.cmpi eq, %1, %2 : vector<16x128xi32>
    %4 = arith.extui %3 : vector<16x128xi1> to vector<16x128xi32>
    %5 = arith.sitofp %4 : vector<16x128xi32> to vector<16x128xf32>
    %c0_1 = arith.constant 0 : index
    %c0_2 = arith.constant 0 : index
    %6 = vector.load %arg2[%c0_1, %c0_2] : memref<128x16xf32, #tpu.memory_space<vmem>>, vector<128x16xf32>
    %cst = arith.constant dense<0.000000e+00> : vector<128x128xf32>
    %7 = tpu.matmul %6, %5, %cst {dimension_numbers = #tpu.dot_dimension_numbers<[1], [0], [0], [1], [0, 0, 1, 1], [], []>, precision = #tpu.contract_precision<fp32>} : vector<128x16xf32>, vector<16x128xf32>, vector<128x128xf32> -> vector<128x128xf32>
    %c0_3 = arith.constant 0 : index
    %c0_4 = arith.constant 0 : index
    %c0_5 = arith.constant 0 : index
    %8 = vector.load %arg4[%c0_3, %c0_4, %c0_5] : memref<4x128x128xf32, #tpu.memory_space<vmem>>, vector<1x128x128xf32>
    %9 = vector.shape_cast %8 : vector<1x128x128xf32> to vector<128x128xf32>
    %10 = vector.shape_cast %7 : vector<128x128xf32> to vector<1x128x128xf32>
    tpu.vector_store %arg4[%c0_3, %c0_4, %c0_5], %10 {strides = array<i32>} : memref<4x128x128xf32, #tpu.memory_space<vmem>>, vector<1x128x128xf32>,
    %c1 = arith.constant 1 : index
    %c0_6 = arith.constant 0 : index
    %11 = vector.load %arg1[%c1, %c0_6] : memref<4x128xi32, #tpu.memory_space<vmem>>, vector<1x128xi32>
    %12 = tpu.iota {dimensions = array<i32: 0>} : vector<16x128xi32>
    %13 = vector.broadcast %11 : vector<1x128xi32> to vector<16x128xi32>
    %14 = arith.cmpi eq, %12, %13 : vector<16x128xi32>
    %15 = arith.extui %14 : vector<16x128xi1> to vector<16x128xi32>
    %16 = arith.sitofp %15 : vector<16x128xi32> to vector<16x128xf32>
    %c0_7 = arith.constant 0 : index
    %c0_8 = arith.constant 0 : index
    %17 = vector.load %arg2[%c0_7, %c0_8] : memref<128x16xf32, #tpu.memory_space<vmem>>, vector<128x16xf32>
    %cst_9 = arith.constant dense<0.000000e+00> : vector<128x128xf32>
    %18 = tpu.matmul %17, %16, %cst_9 {dimension_numbers = #tpu.dot_dimension_numbers<[1], [0], [0], [1], [0, 0, 1, 1], [], []>, precision = #tpu.contract_precision<fp32>} : vector<128x16xf32>, vector<16x128xf32>, vector<128x128xf32> -> vector<128x128xf32>
    %c1_10 = arith.constant 1 : index
    %c0_11 = arith.constant 0 : index
    %c0_12 = arith.constant 0 : index
    %19 = vector.load %arg4[%c1_10, %c0_11, %c0_12] : memref<4x128x128xf32, #tpu.memory_space<vmem>>, vector<1x128x128xf32>
    %20 = vector.shape_cast %19 : vector<1x128x128xf32> to vector<128x128xf32>
    %21 = vector.shape_cast %18 : vector<128x128xf32> to vector<1x128x128xf32>
    tpu.vector_store %arg4[%c1_10, %c0_11, %c0_12], %21 {strides = array<i32>} : memref<4x128x128xf32, #tpu.memory_space<vmem>>, vector<1x128x128xf32>,
    %c2 = arith.constant 2 : index
    %c0_13 = arith.constant 0 : index
    %22 = vector.load %arg1[%c2, %c0_13] : memref<4x128xi32, #tpu.memory_space<vmem>>, vector<1x128xi32>
    %23 = tpu.iota {dimensions = array<i32: 0>} : vector<16x128xi32>
    %24 = vector.broadcast %22 : vector<1x128xi32> to vector<16x128xi32>
    %25 = arith.cmpi eq, %23, %24 : vector<16x128xi32>
    %26 = arith.extui %25 : vector<16x128xi1> to vector<16x128xi32>
    %27 = arith.sitofp %26 : vector<16x128xi32> to vector<16x128xf32>
    %c0_14 = arith.constant 0 : index
    %c0_15 = arith.constant 0 : index
    %28 = vector.load %arg2[%c0_14, %c0_15] : memref<128x16xf32, #tpu.memory_space<vmem>>, vector<128x16xf32>
    %cst_16 = arith.constant dense<0.000000e+00> : vector<128x128xf32>
    %29 = tpu.matmul %28, %27, %cst_16 {dimension_numbers = #tpu.dot_dimension_numbers<[1], [0], [0], [1], [0, 0, 1, 1], [], []>, precision = #tpu.contract_precision<fp32>} : vector<128x16xf32>, vector<16x128xf32>, vector<128x128xf32> -> vector<128x128xf32>
    %c2_17 = arith.constant 2 : index
    %c0_18 = arith.constant 0 : index
    %c0_19 = arith.constant 0 : index
    %30 = vector.load %arg4[%c2_17, %c0_18, %c0_19] : memref<4x128x128xf32, #tpu.memory_space<vmem>>, vector<1x128x128xf32>
    %31 = vector.shape_cast %30 : vector<1x128x128xf32> to vector<128x128xf32>
    %32 = vector.shape_cast %29 : vector<128x128xf32> to vector<1x128x128xf32>
    tpu.vector_store %arg4[%c2_17, %c0_18, %c0_19], %32 {strides = array<i32>} : memref<4x128x128xf32, #tpu.memory_space<vmem>>, vector<1x128x128xf32>,
    %c3 = arith.constant 3 : index
    %c0_20 = arith.constant 0 : index
    %33 = vector.load %arg1[%c3, %c0_20] : memref<4x128xi32, #tpu.memory_space<vmem>>, vector<1x128xi32>
    %34 = tpu.iota {dimensions = array<i32: 0>} : vector<16x128xi32>
    %35 = vector.broadcast %33 : vector<1x128xi32> to vector<16x128xi32>
    %36 = arith.cmpi eq, %34, %35 : vector<16x128xi32>
    %37 = arith.extui %36 : vector<16x128xi1> to vector<16x128xi32>
    %38 = arith.sitofp %37 : vector<16x128xi32> to vector<16x128xf32>
    %c0_21 = arith.constant 0 : index
    %c0_22 = arith.constant 0 : index
    %39 = vector.load %arg2[%c0_21, %c0_22] : memref<128x16xf32, #tpu.memory_space<vmem>>, vector<128x16xf32>
    %cst_23 = arith.constant dense<0.000000e+00> : vector<128x128xf32>
    %40 = tpu.matmul %39, %38, %cst_23 {dimension_numbers = #tpu.dot_dimension_numbers<[1], [0], [0], [1], [0, 0, 1, 1], [], []>, precision = #tpu.contract_precision<fp32>} : vector<128x16xf32>, vector<16x128xf32>, vector<128x128xf32> -> vector<128x128xf32>
    %c3_24 = arith.constant 3 : index
    %c0_25 = arith.constant 0 : index
    %c0_26 = arith.constant 0 : index
    %41 = vector.load %arg4[%c3_24, %c0_25, %c0_26] : memref<4x128x128xf32, #tpu.memory_space<vmem>>, vector<1x128x128xf32>
    %42 = vector.shape_cast %41 : vector<1x128x128xf32> to vector<128x128xf32>
    %43 = vector.shape_cast %40 : vector<128x128xf32> to vector<1x128x128xf32>
    tpu.vector_store %arg4[%c3_24, %c0_25, %c0_26], %43 {strides = array<i32>} : memref<4x128x128xf32, #tpu.memory_space<vmem>>, vector<1x128x128xf32>,
    %c0_27 = arith.constant 0 : index
    %c32 = arith.constant 32 : index
    %c0_28 = arith.constant 0 : index
    %44 = vector.load %arg4[%c0_27, %c32, %c0_28] : memref<4x128x128xf32, #tpu.memory_space<vmem>>, vector<1x32x128xf32>
    %45 = vector.shape_cast %44 : vector<1x32x128xf32> to vector<32x128xf32>
    %c1_29 = arith.constant 1 : index
    %c0_30 = arith.constant 0 : index
    %c0_31 = arith.constant 0 : index
    %46 = vector.load %arg4[%c1_29, %c0_30, %c0_31] : memref<4x128x128xf32, #tpu.memory_space<vmem>>, vector<1x32x128xf32>
    %47 = vector.shape_cast %46 : vector<1x32x128xf32> to vector<32x128xf32>
    %48 = arith.mulf %45, %47 : vector<32x128xf32>
    %c0_32 = arith.constant 0 : index
    %c0_33 = arith.constant 0 : index
    %c0_34 = arith.constant 0 : index
    %49 = vector.load %arg3[%c0_32, %c0_33, %c0_34] : memref<6x32x128xf32, #tpu.memory_space<vmem>>, vector<1x32x128xf32>
    %50 = vector.shape_cast %49 : vector<1x32x128xf32> to vector<32x128xf32>
    %51 = vector.shape_cast %48 : vector<32x128xf32> to vector<1x32x128xf32>
    tpu.vector_store %arg3[%c0_32, %c0_33, %c0_34], %51 {strides = array<i32>} : memref<6x32x128xf32, #tpu.memory_space<vmem>>, vector<1x32x128xf32>,
    %c0_35 = arith.constant 0 : index
    %c64 = arith.constant 64 : index
    %c0_36 = arith.constant 0 : index
    %52 = vector.load %arg4[%c0_35, %c64, %c0_36] : memref<4x128x128xf32, #tpu.memory_space<vmem>>, vector<1x32x128xf32>
    %53 = vector.shape_cast %52 : vector<1x32x128xf32> to vector<32x128xf32>
    %c2_37 = arith.constant 2 : index
    %c0_38 = arith.constant 0 : index
    %c0_39 = arith.constant 0 : index
    %54 = vector.load %arg4[%c2_37, %c0_38, %c0_39] : memref<4x128x128xf32, #tpu.memory_space<vmem>>, vector<1x32x128xf32>
    %55 = vector.shape_cast %54 : vector<1x32x128xf32> to vector<32x128xf32>
    %56 = arith.mulf %53, %55 : vector<32x128xf32>
    %c1_40 = arith.constant 1 : index
    %c0_41 = arith.constant 0 : index
    %c0_42 = arith.constant 0 : index
    %57 = vector.load %arg3[%c1_40, %c0_41, %c0_42] : memref<6x32x128xf32, #tpu.memory_space<vmem>>, vector<1x32x128xf32>
    %58 = vector.shape_cast %57 : vector<1x32x128xf32> to vector<32x128xf32>
    %59 = vector.shape_cast %56 : vector<32x128xf32> to vector<1x32x128xf32>
    tpu.vector_store %arg3[%c1_40, %c0_41, %c0_42], %59 {strides = array<i32>} : memref<6x32x128xf32, #tpu.memory_space<vmem>>, vector<1x32x128xf32>,
    %c0_43 = arith.constant 0 : index
    %c96 = arith.constant 96 : index
    %c0_44 = arith.constant 0 : index
    %60 = vector.load %arg4[%c0_43, %c96, %c0_44] : memref<4x128x128xf32, #tpu.memory_space<vmem>>, vector<1x32x128xf32>
    %61 = vector.shape_cast %60 : vector<1x32x128xf32> to vector<32x128xf32>
    %c3_45 = arith.constant 3 : index
    %c0_46 = arith.constant 0 : index
    %c0_47 = arith.constant 0 : index
    %62 = vector.load %arg4[%c3_45, %c0_46, %c0_47] : memref<4x128x128xf32, #tpu.memory_space<vmem>>, vector<1x32x128xf32>
    %63 = vector.shape_cast %62 : vector<1x32x128xf32> to vector<32x128xf32>
    %64 = arith.mulf %61, %63 : vector<32x128xf32>
    %c2_48 = arith.constant 2 : index
    %c0_49 = arith.constant 0 : index
    %c0_50 = arith.constant 0 : index
    %65 = vector.load %arg3[%c2_48, %c0_49, %c0_50] : memref<6x32x128xf32, #tpu.memory_space<vmem>>, vector<1x32x128xf32>
    %66 = vector.shape_cast %65 : vector<1x32x128xf32> to vector<32x128xf32>
    %67 = vector.shape_cast %64 : vector<32x128xf32> to vector<1x32x128xf32>
    tpu.vector_store %arg3[%c2_48, %c0_49, %c0_50], %67 {strides = array<i32>} : memref<6x32x128xf32, #tpu.memory_space<vmem>>, vector<1x32x128xf32>,
    %c1_51 = arith.constant 1 : index
    %c64_52 = arith.constant 64 : index
    %c0_53 = arith.constant 0 : index
    %68 = vector.load %arg4[%c1_51, %c64_52, %c0_53] : memref<4x128x128xf32, #tpu.memory_space<vmem>>, vector<1x32x128xf32>
    %69 = vector.shape_cast %68 : vector<1x32x128xf32> to vector<32x128xf32>
    %c2_54 = arith.constant 2 : index
    %c32_55 = arith.constant 32 : index
    %c0_56 = arith.constant 0 : index
    %70 = vector.load %arg4[%c2_54, %c32_55, %c0_56] : memref<4x128x128xf32, #tpu.memory_space<vmem>>, vector<1x32x128xf32>
    %71 = vector.shape_cast %70 : vector<1x32x128xf32> to vector<32x128xf32>
    %72 = arith.mulf %69, %71 : vector<32x128xf32>
    %c3_57 = arith.constant 3 : index
    %c0_58 = arith.constant 0 : index
    %c0_59 = arith.constant 0 : index
    %73 = vector.load %arg3[%c3_57, %c0_58, %c0_59] : memref<6x32x128xf32, #tpu.memory_space<vmem>>, vector<1x32x128xf32>
    %74 = vector.shape_cast %73 : vector<1x32x128xf32> to vector<32x128xf32>
    %75 = vector.shape_cast %72 : vector<32x128xf32> to vector<1x32x128xf32>
    tpu.vector_store %arg3[%c3_57, %c0_58, %c0_59], %75 {strides = array<i32>} : memref<6x32x128xf32, #tpu.memory_space<vmem>>, vector<1x32x128xf32>,
    %c1_60 = arith.constant 1 : index
    %c96_61 = arith.constant 96 : index
    %c0_62 = arith.constant 0 : index
    %76 = vector.load %arg4[%c1_60, %c96_61, %c0_62] : memref<4x128x128xf32, #tpu.memory_space<vmem>>, vector<1x32x128xf32>
    %77 = vector.shape_cast %76 : vector<1x32x128xf32> to vector<32x128xf32>
    %c3_63 = arith.constant 3 : index
    %c32_64 = arith.constant 32 : index
    %c0_65 = arith.constant 0 : index
    %78 = vector.load %arg4[%c3_63, %c32_64, %c0_65] : memref<4x128x128xf32, #tpu.memory_space<vmem>>, vector<1x32x128xf32>
    %79 = vector.shape_cast %78 : vector<1x32x128xf32> to vector<32x128xf32>
    %80 = arith.mulf %77, %79 : vector<32x128xf32>
    %c4 = arith.constant 4 : index
    %c0_66 = arith.constant 0 : index
    %c0_67 = arith.constant 0 : index
    %81 = vector.load %arg3[%c4, %c0_66, %c0_67] : memref<6x32x128xf32, #tpu.memory_space<vmem>>, vector<1x32x128xf32>
    %82 = vector.shape_cast %81 : vector<1x32x128xf32> to vector<32x128xf32>
    %83 = vector.shape_cast %80 : vector<32x128xf32> to vector<1x32x128xf32>
    tpu.vector_store %arg3[%c4, %c0_66, %c0_67], %83 {strides = array<i32>} : memref<6x32x128xf32, #tpu.memory_space<vmem>>, vector<1x32x128xf32>,
    %c2_68 = arith.constant 2 : index
    %c96_69 = arith.constant 96 : index
    %c0_70 = arith.constant 0 : index
    %84 = vector.load %arg4[%c2_68, %c96_69, %c0_70] : memref<4x128x128xf32, #tpu.memory_space<vmem>>, vector<1x32x128xf32>
    %85 = vector.shape_cast %84 : vector<1x32x128xf32> to vector<32x128xf32>
    %c3_71 = arith.constant 3 : index
    %c64_72 = arith.constant 64 : index
    %c0_73 = arith.constant 0 : index
    %86 = vector.load %arg4[%c3_71, %c64_72, %c0_73] : memref<4x128x128xf32, #tpu.memory_space<vmem>>, vector<1x32x128xf32>
    %87 = vector.shape_cast %86 : vector<1x32x128xf32> to vector<32x128xf32>
    %88 = arith.mulf %85, %87 : vector<32x128xf32>
    %c5 = arith.constant 5 : index
    %c0_74 = arith.constant 0 : index
    %c0_75 = arith.constant 0 : index
    %89 = vector.load %arg3[%c5, %c0_74, %c0_75] : memref<6x32x128xf32, #tpu.memory_space<vmem>>, vector<1x32x128xf32>
    %90 = vector.shape_cast %89 : vector<1x32x128xf32> to vector<32x128xf32>
    %91 = vector.shape_cast %88 : vector<32x128xf32> to vector<1x32x128xf32>
    tpu.vector_store %arg3[%c5, %c0_74, %c0_75], %91 {strides = array<i32>} : memref<6x32x128xf32, #tpu.memory_space<vmem>>, vector<1x32x128xf32>,
    return
  }
  func.func @transform_0(%arg0: i32) -> (i32, i32) {
    %c0_i32 = arith.constant 0 : i32
    %c0_i32_0 = arith.constant 0 : i32
    return %c0_i32, %arg0 : i32, i32
  }
  func.func @transform_1(%arg0: i32) -> (i32, i32) {
    %c0_i32 = arith.constant 0 : i32
    %c0_i32_0 = arith.constant 0 : i32
    %c0_i32_1 = arith.constant 0 : i32
    return %c0_i32, %c0_i32_0 : i32, i32
  }
  func.func @transform_2(%arg0: i32) -> (i32, i32, i32) {
    %c0_i32 = arith.constant 0 : i32
    %c0_i32_0 = arith.constant 0 : i32
    %c0_i32_1 = arith.constant 0 : i32
    return %c0_i32, %c0_i32_0, %arg0 : i32, i32, i32
  }
}

</mosaic_0001>

<bundles_post_ra>
// kernel: tpu_custom_call.1
= control target key start
LH: loop header
LB: loop body
LE: loop exit
PB: predicated region body
PF: predicated region fallthrough
CT: control target
= control target key end

     0   :  { %7 = vsyncpa [#allocation4], 0  ;;  %s4807_s0 = inlined_call_operand.vmem [shape: s32[4,256], index: 0, kind: input, shape index: {}]   ;;  %s4808_s1 = inlined_call_operand.vmem [shape: f32[128,16], index: 1, kind: input, shape index: {}]   ;;  %s4809_s2 = inlined_call_operand.hbm [shape: f32[6,32,256], index: 2, kind: output, shape index: {}]  }
   0x1   :  { %9 = vsyncpa [#allocation4 + $0x1], 0  ;;  %s3365_s9 = smov 0   ;;  %s3367_s10 = smov 0  }
   0x2   :  { %s3369_s11 = smov 0   ;;  %s3371_s12 = smov 0  }
   0x3 LB: > { %s3386_s13 = sadd.s32 4294967295, %s3343_s12   ;;  %s3172_s14 = sadd.s32 4294967294, %s3343_s12   ;;  %s3343_s12 = sphi %s3371_s12, %s4969_s12   ;;  %s3339_s11 = sphi %s3369_s11, %s4968_s11   ;;  %s3335_s10 = sphi %s3367_s10, %s4967_s10   ;;  %s3331_s9 = sphi %s3365_s9, %s4966_s9  }
   0x4   : > { %s3390_s15 = sadd.s32 1, %s3343_s12   ;;  %s69_s16 = sadd.s32 1, %s3339_s11 }
   0x5   : > { %s66_s17 = ssub.s32 %s3343_s12, %s3390_s15  ;;  %p79_p0 = scmp.ne.s32.totalorder %s3339_s11, %s3335_s10 }
   0x6   : > { %p67_p1 = scmp.eq.s32.totalorder %s66_s17, 0  ;;  %p80_p2 = scmp.eq.s32.totalorder %s3386_s13, 1 }
   0x7   : > { %p85_p3 = scmp.ne.s32.totalorder %s3335_s10, %s3331_s9  ;;  %p86_p4 = scmp.eq.s32.totalorder %s3172_s14, 1 }
   0x8   : > { %s3401_s18 = scalar_select %p67_p1, %s3339_s11, %s69_s16  }
   0x9   : > { %p3403_p5 = por %p80_p2, %p79_p0  ;;  %p3407_p6 = por %p86_p4, %p85_p3 }
   0xa   : > { %p3175_p7 = scmp.ge.s32.totalorder %s3343_s12, 1  ;;  %p114_p8 = scmp.lt.s32.totalorder %s3343_s12, 3 }
   0xc   : > { %p115_p9 = pnand %p3175_p7, %p114_p8 }
   0xe   : > { %118 = sbr.rel (%p115_p9) target bundleno = 926 (0x39e), region = 28 }
  0x13   : > { %p135_p10 = scmp.lt.s32.totalorder %s3386_s13, 1  ;;  %v140_v0 = vlaneseq  ;;  %v150_v1 = vld [vmem:[%s4808_s1] sm:$0xff]  ;;  %vm166_vm0 = vcmask 130048   ;;  %v151_v2 = vld [vmem:[%s4808_s1 + $0x8] sm:$0xff]  ;;  %v152_v8 = vld [vmem:[%s4808_s1 + $0x10] sm:$0xff]  ;;  %v4810_v18 = vmov 1.0  }
  0x14   : > { %v168_v3 = vsel %vm166_vm0, %v150_v1, 0  ;;  %v171_v4 = vsel %vm166_vm0, %v151_v2, 0  ;;  %v174_v12 = vsel %vm166_vm0, %v152_v8, 0  ;;  %v4812_v20 = vmov 0.0   ;;  %v153_v28 = vld [vmem:[%s4808_s1 + $0x18] sm:$0xff]  ;;  %v154_v44 = vld [vmem:[%s4808_s1 + $0x20] sm:$0xff] }
  0x15   : > { %s136_s25 = scalar_select %p135_p10, %s3386_s13, 1  ;;  %v3423_v5 = vshrl.u32 %v140_v0, 7  ;;  %v3425_v6 = vand.u32 4294901760, %v168_v3  ;;  %v3427_v7 = vand.u32 4294901760, %v171_v4  ;;  %v3459_v17 = vand.u32 4294901760, %v174_v12  ;;  %v155_v51 = vld [vmem:[%s4808_s1 + $0x28] sm:$0xff] }
  0x16   : > { %v177_v36 = vsel %vm166_vm0, %v153_v28, 0  ;;  %v180_v47 = vsel %vm166_vm0, %v154_v44, 0  ;;  %v183_v54 = vsel %vm166_vm0, %v155_v51, 0  ;;  %v156_v58 = vld [vmem:[%s4808_s1 + $0x30] sm:$0xff]  ;;  %v157_v1 = vld [vmem:[%s4808_s1 + $0x38] sm:$0xff]  ;;  %s3229_s17 = sshll.u32 %s3386_s13, 3 }
  0x17   : > { %s3176_s28 = sshll.u32 %s136_s25, 2  ;;  %v3433_v9 = vadd.s32 8, %v3423_v5  ;;  %v3436_v10 = vsub.f32 %v168_v3, %v3425_v6  ;;  %v3439_v11 = vsub.f32 %v171_v4, %v3427_v7  ;;  %v3500_v33 = vsub.f32 %v174_v12, %v3459_v17  ;;  %v160_v44 = vld [vmem:[%s4808_s1 + $0x50] sm:$0xff]  ;;  %s3301_s30 = scalar_lea.hbm %s4809_s2, 384 }
  0x18   : > { %s3444_s3 = scalar_lea.vmem %s4807_s0, %s3176_s28  ;;  %v3516_v43 = vand.u32 4294901760, %v177_v36  ;;  %v3543_v50 = vand.u32 4294901760, %v180_v47  ;;  %v3567_v57 = vand.u32 4294901760, %v183_v54  ;;  %v186_v61 = vsel %vm166_vm0, %v156_v58, 0  ;;  %v161_v58 = vld [vmem:[%s4808_s1 + $0x58] sm:$0xff]  ;;  %s132_s28 = sand.u32 1, %s3335_s10  }
  0x19   : > { %v3277_v13 = vld [vmem:[%s3444_s3] ss:$0 sm:$0xff]  ;;  %v3449_v14 = vand.u32 4294901760, %v3436_v10  ;;  %v3452_v15 = vld [vmem:[%s3444_s3 + $0x1] ss:$0 sm:$0xff]  ;;  %v3457_v16 = vand.u32 4294901760, %v3439_v11 }
  0x1a   : > { %vm145_vm1 = vcmp.eq.s32.totalorder %v3433_v9, %v3277_v13  ;;  %vm144_vm2 = vcmp.eq.s32.totalorder %v3423_v5, %v3277_v13  ;;  %vm858_vm3 = vcmp.eq.s32.totalorder %v3433_v9, %v3452_v15  ;;  %v3514_v42 = vand.u32 4294901760, %v3500_v33  ;;  %s3232_s4 = smul.u32 192, %s132_s28  ;;  %s3096_s13 = scalar_lea.sflag [#allocation4], %s132_s28 }
  0x1b   : > { %3179 = vmatpush.msk.msra.mxu0 %vm145_vm1, %v4810_v18  ;;  %v236_v19 = vsub.f32 %v3436_v10, %v3449_v14  ;;  %v3178_v21 = vsel %vm145_vm1, 1.0, %v4812_v20  ;;  %3181 = vmatpush.msk.msra.mxu3 %vm145_vm1, %v4810_v18  ;;  %v3177_v22 = vsel %vm144_vm2, 1.0, %v4812_v20  ;;  %v3186_v25 = vsel %vm858_vm3, 1.0, %v4812_v20 }
  0x1c   : > { %v377_v23 = vsub.f32 %v3178_v21, %v3178_v21  ;;  %v383_v24 = vsub.f32 %v3177_v22, %v3177_v22  ;;  %v3489_v27 = vsub.f32 %v3186_v25, %v3186_v25  ;;  %v244_v32 = vsub.f32 %v3439_v11, %v3457_v16  ;;  %v158_v22 = vld [vmem:[%s4808_s1 + $0x40] sm:$0xff]  ;;  %s4197_s5 = scalar_lea.vmem [#allocation3], %s3232_s4 }
  0x1d   : > { %3180 = vmatpush.msk.msra.mxu0 %vm144_vm2, %v4810_v18  ;;  %v3484_v26 = vand.u32 4294901760, %v236_v19  ;;  %3182 = vmatpush.msk.msra.mxu3 %vm144_vm2, %v4810_v18  ;;  %v252_v45 = vsub.f32 %v3500_v33, %v3514_v42  ;;  %v3528_v46 = vsub.f32 %v177_v36, %v3516_v43  ;;  %v3558_v53 = vsub.f32 %v180_v47, %v3543_v50  ;;  %s3107_s23 = sshll.u32 %s4197_s5, 4  ;;  %s3108_s23 = int_to_ptr.vmem [resolvable:$true] %s3107_s23 }
  0x1e   : > { %469 = vmatpush.msra.mxu2 %v377_v23  ;;  %v378_v29 = vand.u32 4294901760, %v377_v23  ;;  %575 = vmatmul.f32.vlgmr.msra.gmra.mxu3 %v3449_v14  ;;  %v384_v30 = vand.u32 4294901760, %v383_v24  ;;  %v1090_v31 = vand.u32 4294901760, %v3489_v27  ;;  %v3511_v41 = vand.u32 4294901760, %v244_v32 }
  0x1f   : > { %238 = vmatmul.f32.vlgmr.msra.gmra.mxu0 %v3484_v26  ;;  %v3538_v48 = vand.u32 4294901760, %v252_v45  ;;  %v3541_v49 = vand.u32 4294901760, %v3528_v46  ;;  %v3565_v56 = vand.u32 4294901760, %v3558_v53  ;;  %v3578_v60 = vsub.f32 %v183_v54, %v3567_v57 }
  0x20   : > { %472 = vmatpush.msra.mxu2 %v383_v24  ;;  %v379_v34 = vsub.f32 %v377_v23, %v378_v29  ;;  %v385_v35 = vsub.f32 %v383_v24, %v384_v30  ;;  %686 = vmatpush.msrb.mxu0 %v378_v29  ;;  %v1091_v37 = vsub.f32 %v3489_v27, %v1090_v31  ;;  %v3587_v0 = vand.u32 4294901760, %v186_v61 }
  0x21   : > { %475 = vmatmul.f32.vlgmr.msra.gmra.mxu2 %v3436_v10  ;;  %v260_v52 = vsub.f32 %v3528_v46, %v3541_v49  ;;  %v268_v59 = vsub.f32 %v3558_v53, %v3565_v56  ;;  %v3585_v63 = vand.u32 4294901760, %v3578_v60  ;;  %v189_v4 = vsel %vm166_vm0, %v157_v1, 0 }
  0x22   : > { %v380_v38 = vand.u32 4294901760, %v379_v34  ;;  %3187 = vmatpush.msk.msrb.mxu2 %vm858_vm3, %v4810_v18  ;;  %v386_v39 = vand.u32 4294901760, %v385_v35  ;;  %690 = vmatpush.msrb.mxu0 %v384_v30  ;;  %v1092_v40 = vand.u32 4294901760, %v1091_v37  ;;  %v3598_v3 = vsub.f32 %v186_v61, %v3587_v0  ;;  %v159_v34 = vld [vmem:[%s4808_s1 + $0x48] sm:$0xff] }
  0x23   : > { %v3562_v55 = vand.u32 4294901760, %v260_v52  ;;  %v3582_v62 = vand.u32 4294901760, %v268_v59  ;;  %v276_v2 = vsub.f32 %v3578_v60, %v3585_v63  ;;  %vm857_vm4 = vcmp.eq.s32.totalorder %v3423_v5, %v3452_v15 }
  0x24   : > { %1181 = vmatpush.msra.mxu0 %v3489_v27  ;;  %381 = vmatpush.msra.mxu1 %v380_v38  ;;  %v3185_v8 = vsel %vm857_vm4, 1.0, %v4812_v20  ;;  %v3619_v13 = vand.u32 4294901760, %v3598_v3  ;;  %v3621_v19 = vand.u32 4294901760, %v189_v4  ;;  %v192_v28 = vsel %vm166_vm0, %v158_v22, 0 }
  0x25   : > { %1093 = vmatpush.msrb.mxu3 %v1092_v40  ;;  %3188 = vmatpush.msk.msrb.mxu2 %vm857_vm4, %v4810_v18  ;;  %v3616_v12 = vand.u32 4294901760, %v276_v2  ;;  %v1095_v21 = vsub.f32 %v3185_v8, %v3185_v8  ;;  %v3643_v32 = vand.u32 4294901760, %v192_v28  ;;  %v195_v37 = vsel %vm166_vm0, %v159_v34, 0  ;;  %v163_v34 = vld [vmem:[%s4808_s1 + $0x68] sm:$0xff] }
  0x26   : > { %387 = vmatpush.msra.mxu1 %v386_v39  ;;  %581 = vmatmul.f32.gmra.mxu3 %v3457_v16  ;;  %v284_v24 = vsub.f32 %v3598_v3, %v3619_v13  ;;  %v3634_v25 = vsub.f32 %v189_v4, %v3621_v19  ;;  %v3671_v40 = vand.u32 4294901760, %v195_v37  ;;  %v198_v47 = vsel %vm166_vm0, %v160_v44, 0 }
  0x27   : > { %246 = vmatmul.f32.gmra.mxu0 %v3511_v41  ;;  %389 = vmatmul.f32.vlgmr.msra.gmra.mxu1 %v3425_v6  ;;  %v1096_v23 = vand.u32 4294901760, %v1095_v21  ;;  %v3658_v36 = vsub.f32 %v192_v28, %v3643_v32  ;;  %v3691_v54 = vand.u32 4294901760, %v198_v47  ;;  %v201_v1 = vsel %vm166_vm0, %v161_v58, 0 }
  0x28   : > { %3183 = vmatpush.msk.msrb.mxu1 %vm145_vm1, %v4810_v18  ;;  %1398 = vmatpush.msra.mxu2 %v1090_v31  ;;  %v3638_v30 = vand.u32 4294901760, %v284_v24  ;;  %v3641_v31 = vand.u32 4294901760, %v3634_v25  ;;  %v3682_v45 = vsub.f32 %v195_v37, %v3671_v40  ;;  %v3711_v8 = vand.u32 4294901760, %v201_v1 }
  0x29   : > { %480 = vmatmul.f32.gmra.mxu2 %v3439_v11  ;;  %1184 = vmatpush.msra.mxu0 %v1095_v21  ;;  %v1097_v27 = vsub.f32 %v1095_v21, %v1096_v23  ;;  %v3669_v39 = vand.u32 4294901760, %v3658_v36  ;;  %v3702_v61 = vsub.f32 %v198_v47, %v3691_v54  ;;  %v162_v21 = vld [vmem:[%s4808_s1 + $0x60] sm:$0xff]  ;;  %v207_v44 = vsel %vm166_vm0, %v163_v34, 0 }
  0x2a   : > { %3184 = vmatpush.msk.msrb.mxu1 %vm144_vm2, %v4810_v18  ;;  %1402 = vmatpush.msra.mxu2 %v1096_v23  ;;  %v292_v35 = vsub.f32 %v3634_v25, %v3641_v31  ;;  %v3689_v52 = vand.u32 4294901760, %v3682_v45  ;;  %v3722_v23 = vsub.f32 %v201_v1, %v3711_v8  ;;  %v204_v24 = vsel %vm166_vm0, %v162_v21, 0 }
  0x2b   : > { %v1098_v29 = vand.u32 4294901760, %v1097_v27  ;;  %v300_v15 = vsub.f32 %v3658_v36, %v3669_v39  ;;  %v3709_v4 = vand.u32 4294901760, %v3702_v61  ;;  %v3751_v58 = vand.u32 4294901760, %v207_v44 }
  0x2c   : > { %3189 = vmatpush.msk.msra.mxu1 %vm858_vm3, %v4810_v18  ;;  %v3666_v38 = vand.u32 4294901760, %v292_v35  ;;  %v308_v59 = vsub.f32 %v3682_v45, %v3689_v52  ;;  %v3729_v28 = vand.u32 4294901760, %v3722_v23 }
  0x2d   : > { %1099 = vmatpush.msrb.mxu3 %v1098_v29  ;;  %v3686_v51 = vand.u32 4294901760, %v300_v15  ;;  %4850 = vst [vmem:[#allocation6_spill] sm:$0xff] %v3709_v4  ;;  %v316_v22 = vsub.f32 %v3702_v61, %v3709_v4  ;;  %v3731_v29 = vand.u32 4294901760, %v204_v24  ;;  %v3762_v21 = vsub.f32 %v207_v44, %v3751_v58 }
  0x2e   : > { %587 = vmatmul.f32.gmra.mxu3 %v3514_v42  ;;  %3190 = vmatpush.msk.msra.mxu1 %vm857_vm4, %v4810_v18  ;;  %v3706_v2 = vand.u32 4294901760, %v308_v59  ;;  %4851 = vst [vmem:[#allocation7_spill] sm:$0xff] %v3729_v28  ;;  %v324_v35 = vsub.f32 %v3722_v23, %v3729_v28  ;;  %v164_v59 = vld [vmem:[%s4808_s1 + $0x70] sm:$0xff] }
  0x2f   : > { %254 = vmatmul.f32.gmra.mxu0 %v3538_v48  ;;  %393 = vmatmul.f32.gmra.mxu1 %v3427_v7  ;;  %v3726_v27 = vand.u32 4294901760, %v316_v22  ;;  %v3742_v37 = vsub.f32 %v204_v24, %v3731_v29  ;;  %4854 = vst [vmem:[#allocation10_spill] sm:$0xff] %v3762_v21  ;;  %v210_v22 = vsel %vm166_vm0, %v164_v59, 0  ;;  %v3769_v34 = vand.u32 4294901760, %v3762_v21 }
  0x30   : > { %3191 = vmatpush.msk.msra.mxu3 %vm858_vm3, %v4810_v18  ;;  %v3746_v15 = vand.u32 4294901760, %v324_v35  ;;  %v3771_v35 = vand.u32 4294901760, %v210_v22 }
  0x31   : > { %485 = vmatmul.f32.gmra.mxu2 %v3500_v33  ;;  %4852 = vst [vmem:[#allocation8_spill] sm:$0xff] %v3742_v37  ;;  %v3749_v47 = vand.u32 4294901760, %v3742_v37  ;;  %v340_v44 = vsub.f32 %v3762_v21, %v3769_v34 }
  0x32   : > { %3192 = vmatpush.msk.msra.mxu3 %vm857_vm4, %v4810_v18  ;;  %4855 = vst [vmem:[#allocation11_spill] sm:$0xff] %v3769_v34  ;;  %v165_v18 = vld [vmem:[%s4808_s1 + $0x78] sm:$0xff]  ;;  %v3782_v59 = vsub.f32 %v210_v22, %v3771_v35 }
  0x33   : > { %4853 = vst [vmem:[#allocation9_spill] sm:$0xff] %v3749_v47  ;;  %v332_v1 = vsub.f32 %v3742_v37, %v3749_v47  ;;  %v3786_v20 = vand.u32 4294901760, %v340_v44 }
  0x34   : > { %4856 = vst [vmem:[#allocation12_spill] sm:$0xff] %v3782_v59 }
  0x35   : > { %v3766_v24 = vand.u32 4294901760, %v332_v1  ;;  %v213_v1 = vsel %vm166_vm0, %v165_v18, 0 }
  0x36   : > { %593 = vmatmul.f32.gmra.mxu3 %v3541_v49 }
  0x37   : > { %262 = vmatmul.f32.gmra.mxu0 %v3562_v55  ;;  %397 = vmatmul.f32.gmra.mxu1 %v3459_v17 }
  0x39   : > { %490 = vmatmul.f32.gmra.mxu2 %v3528_v46 }
  0x3e   : > { %599 = vmatmul.f32.gmra.mxu3 %v3565_v56 }
  0x3f   : > { %270 = vmatmul.f32.gmra.mxu0 %v3582_v62  ;;  %401 = vmatmul.f32.gmra.mxu1 %v3516_v43 }
  0x41   : > { %495 = vmatmul.f32.gmra.mxu2 %v3558_v53 }
  0x46   : > { %605 = vmatmul.f32.gmra.mxu3 %v3585_v63 }
  0x47   : > { %278 = vmatmul.f32.gmra.mxu0 %v3616_v12  ;;  %405 = vmatmul.f32.gmra.mxu1 %v3543_v50 }
  0x49   : > { %500 = vmatmul.f32.gmra.mxu2 %v3578_v60 }
  0x4e   : > { %611 = vmatmul.f32.gmra.mxu3 %v3619_v13 }
  0x4f   : > { %286 = vmatmul.f32.gmra.mxu0 %v3638_v30  ;;  %409 = vmatmul.f32.gmra.mxu1 %v3567_v57 }
  0x51   : > { %505 = vmatmul.f32.gmra.mxu2 %v3598_v3 }
  0x56   : > { %617 = vmatmul.f32.gmra.mxu3 %v3641_v31 }
  0x57   : > { %294 = vmatmul.f32.gmra.mxu0 %v3666_v38  ;;  %413 = vmatmul.f32.gmra.mxu1 %v3587_v0 }
  0x59   : > { %510 = vmatmul.f32.gmra.mxu2 %v3634_v25 }
  0x5e   : > { %623 = vmatmul.f32.gmra.mxu3 %v3669_v39 }
  0x5f   : > { %302 = vmatmul.f32.gmra.mxu0 %v3686_v51  ;;  %417 = vmatmul.f32.gmra.mxu1 %v3621_v19 }
  0x61   : > { %515 = vmatmul.f32.gmra.mxu2 %v3658_v36 }
  0x66   : > { %629 = vmatmul.f32.gmra.mxu3 %v3689_v52 }
  0x67   : > { %310 = vmatmul.f32.gmra.mxu0 %v3706_v2  ;;  %421 = vmatmul.f32.gmra.mxu1 %v3643_v32 }
  0x69   : > { %520 = vmatmul.f32.gmra.mxu2 %v3682_v45 }
  0x6e   : > { %635 = vmatmul.f32.gmra.mxu3 %v3709_v4 }
  0x6f   : > { %318 = vmatmul.f32.gmra.mxu0 %v3726_v27  ;;  %425 = vmatmul.f32.gmra.mxu1 %v3671_v40 }
  0x71   : > { %525 = vmatmul.f32.gmra.mxu2 %v3702_v61 }
  0x76   : > { %641 = vmatmul.f32.gmra.mxu3 %v3729_v28  ;;  %v3789_v28 = vand.u32 4294901760, %v3782_v59 }
  0x77   : > { %326 = vmatmul.f32.gmra.mxu0 %v3746_v15  ;;  %429 = vmatmul.f32.gmra.mxu1 %v3691_v54 }
  0x78   : > { %4857 = vst [vmem:[#allocation13_spill] sm:$0xff] %v3789_v28  ;;  %v348_v22 = vsub.f32 %v3782_v59, %v3789_v28 }
  0x79   : > { %530 = vmatmul.f32.gmra.mxu2 %v3722_v23 }
  0x7a   : > { %v3802_v44 = vand.u32 4294901760, %v348_v22 }
  0x7e   : > { %647 = vmatmul.f32.gmra.mxu3 %v3749_v47  ;;  %v3791_v47 = vand.u32 4294901760, %v213_v1 }
  0x7f   : > { %334 = vmatmul.f32.gmra.mxu0 %v3766_v24  ;;  %433 = vmatmul.f32.gmra.mxu1 %v3711_v8 }
  0x80   : > { %v3799_v18 = vsub.f32 %v213_v1, %v3791_v47 }
  0x81   : > { %535 = vmatmul.f32.gmra.mxu2 %v3742_v37 }
  0x82   : > { %4858 = vst [vmem:[#allocation14_spill] sm:$0xff] %v3799_v18  ;;  %v3805_v37 = vand.u32 4294901760, %v3799_v18 }
  0x84   : > { %4859 = vst [vmem:[#allocation15_spill] sm:$0xff] %v3805_v37 }
  0x86   : > { %653 = vmatmul.f32.gmra.mxu3 %v3769_v34  ;;  %v356_v34 = vsub.f32 %v3799_v18, %v3805_v37 }
  0x87   : > { %342 = vmatmul.f32.gmra.mxu0 %v3786_v20  ;;  %437 = vmatmul.f32.gmra.mxu1 %v3731_v29 }
  0x88   : > { %v3813_v1 = vand.u32 4294901760, %v356_v34 }
  0x89   : > { %540 = vmatmul.f32.gmra.mxu2 %v3762_v21 }
  0x8e   : > { %659 = vmatmul.f32.gmra.mxu3 %v3789_v28 }
  0x8f   : > { %350 = vmatmul.f32.gmra.mxu0 %v3802_v44  ;;  %441 = vmatmul.f32.gmra.mxu1 %v3751_v58 }
  0x91   : > { %545 = vmatmul.f32.gmra.mxu2 %v3782_v59 }
  0x96   : > { %665 = vmatmul.f32.gmra.mxu3 %v3805_v37 }
  0x97   : > { %358 = vmatmul.f32.gmra.mxu0 %v3813_v1  ;;  %445 = vmatmul.f32.gmra.mxu1 %v3771_v35 }
  0x99   : > { %550 = vmatmul.f32.gmra.mxu2 %v3799_v18 }
  0x9c   : > { %v239_v22 = vpop.f32.mrf.mxu0 }
  0x9e   : > { %1101 = vmatmul.f32.vlgmr.msrb.gmra.mxu3 %v3425_v6 }
  0x9f   : > { %692 = vmatmul.f32.vlgmr.msrb.gmra.mxu0 %v3425_v6  ;;  %449 = vmatmul.f32.gmra.mxu1 %v3791_v47 }
  0xa1   : > { %950 = vmatmul.f32.vlgmr.msrb.gmra.mxu2 %v3484_v26  ;;  %v576_v28 = vpop.f32.mrf.mxu3 }
  0xa4   : > { %v247_v34 = vpop.f32.mrf.mxu0  ;;  %v390_v59 = vpop.f32.mrf.mxu1 }
  0xa5   : > { %v476_v21 = vpop.f32.mrf.mxu2 }
  0xa6   : > { %1105 = vmatmul.f32.gmra.mxu3 %v3427_v7 }
  0xa7   : > { %696 = vmatmul.f32.gmra.mxu0 %v3427_v7  ;;  %775 = vmatmul.f32.vlgmr.msrb.gmra.mxu1 %v3425_v6 }
  0xa9   : > { %958 = vmatmul.f32.gmra.mxu2 %v3511_v41  ;;  %v582_v22 = vpop.f32.mrf.mxu3 }
  0xac   : > { %v255_v37 = vpop.f32.mrf.mxu0  ;;  %v394_v18 = vpop.f32.mrf.mxu1 }
  0xad   : > { %v481_v4 = vpop.f32.mrf.mxu2 }
  0xae   : > { %1109 = vmatmul.f32.gmra.mxu3 %v3459_v17 }
  0xaf   : > { %700 = vmatmul.f32.gmra.mxu0 %v3459_v17  ;;  %779 = vmatmul.f32.gmra.mxu1 %v3427_v7 }
  0xb1   : > { %966 = vmatmul.f32.gmra.mxu2 %v3538_v48  ;;  %v588_v26 = vpop.f32.mrf.mxu3 }
  0xb4   : > { %v263_v28 = vpop.f32.mrf.mxu0  ;;  %v398_v21 = vpop.f32.mrf.mxu1 }
  0xb5   : > { %v486_v59 = vpop.f32.mrf.mxu2 }
  0xb6   : > { %1113 = vmatmul.f32.gmra.mxu3 %v3516_v43 }
  0xb7   : > { %704 = vmatmul.f32.gmra.mxu0 %v3516_v43  ;;  %783 = vmatmul.f32.gmra.mxu1 %v3459_v17 }
  0xb9   : > { %974 = vmatmul.f32.gmra.mxu2 %v3562_v55  ;;  %v594_v41 = vpop.f32.mrf.mxu3 }
  0xbc   : > { %v271_v4 = vpop.f32.mrf.mxu0  ;;  %v402_v37 = vpop.f32.mrf.mxu1 }
  0xbd   : > { %v491_v18 = vpop.f32.mrf.mxu2 }
  0xbe   : > { %1117 = vmatmul.f32.gmra.mxu3 %v3543_v50 }
  0xbf   : > { %708 = vmatmul.f32.gmra.mxu0 %v3543_v50  ;;  %787 = vmatmul.f32.gmra.mxu1 %v3516_v43 }
  0xc1   : > { %982 = vmatmul.f32.gmra.mxu2 %v3582_v62  ;;  %v600_v48 = vpop.f32.mrf.mxu3 }
  0xc4   : > { %v279_v34 = vpop.f32.mrf.mxu0  ;;  %v406_v22 = vpop.f32.mrf.mxu1 }
  0xc5   : > { %v407_v26 = vadd.f32 %v406_v22, %v271_v4  ;;  %v496_v28 = vpop.f32.mrf.mxu2 }
  0xc6   : > { %1121 = vmatmul.f32.gmra.mxu3 %v3567_v57 }
  0xc7   : > { %v497_v55 = vadd.f32 %v496_v28, %v407_v26  ;;  %712 = vmatmul.f32.gmra.mxu0 %v3567_v57  ;;  %791 = vmatmul.f32.gmra.mxu1 %v3543_v50 }
  0xc9   : > { %v3842_v21 = vadd.f32 %v600_v48, %v497_v55  ;;  %990 = vmatmul.f32.gmra.mxu2 %v3616_v12  ;;  %v606_v59 = vpop.f32.mrf.mxu3 }
  0xcc   : > { %v287_v41 = vpop.f32.mrf.mxu0  ;;  %v410_v37 = vpop.f32.mrf.mxu1 }
  0xcd   : > { %v411_v62 = vadd.f32 %v410_v37, %v279_v34  ;;  %v501_v18 = vpop.f32.mrf.mxu2 }
  0xce   : > { %1125 = vmatmul.f32.gmra.mxu3 %v3587_v0 }
  0xcf   : > { %v502_v4 = vadd.f32 %v501_v18, %v411_v62  ;;  %716 = vmatmul.f32.gmra.mxu0 %v3587_v0  ;;  %795 = vmatmul.f32.gmra.mxu1 %v3567_v57 }
  0xd1   : > { %v3848_v22 = vadd.f32 %v606_v59, %v502_v4  ;;  %998 = vmatmul.f32.gmra.mxu2 %v3638_v30  ;;  %v612_v48 = vpop.f32.mrf.mxu3 }
  0xd4   : > { %v295_v26 = vpop.f32.mrf.mxu0  ;;  %v414_v28 = vpop.f32.mrf.mxu1 }
  0xd5   : > { %v415_v12 = vadd.f32 %v414_v28, %v287_v41  ;;  %v506_v55 = vpop.f32.mrf.mxu2 }
  0xd6   : > { %1129 = vmatmul.f32.gmra.mxu3 %v3621_v19 }
  0xd7   : > { %v507_v34 = vadd.f32 %v506_v55, %v415_v12  ;;  %720 = vmatmul.f32.gmra.mxu0 %v3621_v19  ;;  %799 = vmatmul.f32.gmra.mxu1 %v3587_v0 }
  0xd9   : > { %v3854_v37 = vadd.f32 %v612_v48, %v507_v34  ;;  %1006 = vmatmul.f32.gmra.mxu2 %v3666_v38  ;;  %v618_v59 = vpop.f32.mrf.mxu3 }
  0xdc   : > { %v303_v62 = vpop.f32.mrf.mxu0  ;;  %v418_v18 = vpop.f32.mrf.mxu1 }
  0xdd   : > { %v419_v30 = vadd.f32 %v418_v18, %v295_v26  ;;  %v511_v4 = vpop.f32.mrf.mxu2 }
  0xde   : > { %1133 = vmatmul.f32.gmra.mxu3 %v3643_v32 }
  0xdf   : > { %v512_v41 = vadd.f32 %v511_v4, %v419_v30  ;;  %724 = vmatmul.f32.gmra.mxu0 %v3643_v32  ;;  %803 = vmatmul.f32.gmra.mxu1 %v3621_v19 }
  0xe1   : > { %v3860_v28 = vadd.f32 %v618_v59, %v512_v41  ;;  %1014 = vmatmul.f32.gmra.mxu2 %v3686_v51  ;;  %v624_v48 = vpop.f32.mrf.mxu3 }
  0xe3   : > { %4860 = vst [vmem:[#allocation16_spill] sm:$0xff] %v3860_v28 }
  0xe4   : > { %v311_v12 = vpop.f32.mrf.mxu0  ;;  %v422_v55 = vpop.f32.mrf.mxu1 }
  0xe5   : > { %v423_v38 = vadd.f32 %v422_v55, %v303_v62  ;;  %v516_v34 = vpop.f32.mrf.mxu2 }
  0xe6   : > { %1137 = vmatmul.f32.gmra.mxu3 %v3671_v40 }
  0xe7   : > { %v517_v26 = vadd.f32 %v516_v34, %v423_v38  ;;  %728 = vmatmul.f32.gmra.mxu0 %v3671_v40  ;;  %807 = vmatmul.f32.gmra.mxu1 %v3643_v32 }
  0xe9   : > { %v3866_v18 = vadd.f32 %v624_v48, %v517_v26  ;;  %1022 = vmatmul.f32.gmra.mxu2 %v3706_v2  ;;  %v630_v59 = vpop.f32.mrf.mxu3 }
  0xeb   : > { %4861 = vst [vmem:[#allocation17_spill] sm:$0xff] %v3866_v18 }
  0xec   : > { %v319_v30 = vpop.f32.mrf.mxu0  ;;  %v426_v4 = vpop.f32.mrf.mxu1 }
  0xed   : > { %v427_v51 = vadd.f32 %v426_v4, %v311_v12  ;;  %v521_v41 = vpop.f32.mrf.mxu2 }
  0xee   : > { %1141 = vmatmul.f32.gmra.mxu3 %v3691_v54 }
  0xef   : > { %v522_v62 = vadd.f32 %v521_v41, %v427_v51  ;;  %732 = vmatmul.f32.gmra.mxu0 %v3691_v54  ;;  %811 = vmatmul.f32.gmra.mxu1 %v3671_v40 }
  0xf1   : > { %v3872_v55 = vadd.f32 %v630_v59, %v522_v62  ;;  %1030 = vmatmul.f32.gmra.mxu2 %v3726_v27  ;;  %v636_v48 = vpop.f32.mrf.mxu3 }
  0xf3   : > { %4862 = vst [vmem:[#allocation18_spill] sm:$0xff] %v3872_v55 }
  0xf4   : > { %v327_v38 = vpop.f32.mrf.mxu0  ;;  %v430_v34 = vpop.f32.mrf.mxu1 }
  0xf5   : > { %v431_v2 = vadd.f32 %v430_v34, %v319_v30  ;;  %v526_v26 = vpop.f32.mrf.mxu2 }
  0xf6   : > { %1145 = vmatmul.f32.gmra.mxu3 %v3711_v8 }
  0xf7   : > { %v527_v12 = vadd.f32 %v526_v26, %v431_v2  ;;  %736 = vmatmul.f32.gmra.mxu0 %v3711_v8  ;;  %815 = vmatmul.f32.gmra.mxu1 %v3691_v54 }
  0xf9   : > { %v3878_v4 = vadd.f32 %v636_v48, %v527_v12  ;;  %1038 = vmatmul.f32.gmra.mxu2 %v3746_v15  ;;  %v642_v59 = vpop.f32.mrf.mxu3  ;;  %v3888_v15 = vld [vmem:[%s3444_s3 + $0x2] ss:$0 sm:$0xff] }
  0xfa   : > { %vm1571_vm5 = vcmp.eq.s32.totalorder %v3433_v9, %v3888_v15  ;;  %vm1570_vm6 = vcmp.eq.s32.totalorder %v3423_v5, %v3888_v15 }
  0xfb   : > { %4863 = vst [vmem:[#allocation19_spill] sm:$0xff] %v3878_v4 }
  0xfc   : > { %v335_v51 = vpop.f32.mrf.mxu0  ;;  %v434_v27 = vpop.f32.mrf.mxu1 }
  0xfd   : > { %v435_v41 = vadd.f32 %v434_v27, %v327_v38  ;;  %v531_v62 = vpop.f32.mrf.mxu2 }
  0xfe   : > { %1149 = vmatmul.f32.gmra.mxu3 %v3731_v29 }
  0xff   : > { %v532_v30 = vadd.f32 %v531_v62, %v435_v41  ;;  %740 = vmatmul.f32.gmra.mxu0 %v3731_v29  ;;  %819 = vmatmul.f32.gmra.mxu1 %v3711_v8  ;;  %v4866_v41 = vmov 1.0  }
 0x100   : > { %3197 = vmatpush.msk.msrb.mxu3 %vm1571_vm5, %v4866_v41  ;;  %3195 = vmatpush.msk.msrb.mxu0 %vm1571_vm5, %v4866_v41 }
 0x101   : > { %v3884_v34 = vadd.f32 %v642_v59, %v532_v30  ;;  %1046 = vmatmul.f32.gmra.mxu2 %v3766_v24  ;;  %v648_v48 = vpop.f32.mrf.mxu3  ;;  %v4865_v59 = vmov 0.0  }
 0x102   : > { %v3194_v24 = vsel %vm1571_vm5, 1.0, %v4865_v59  ;;  %3196 = vmatpush.msk.msrb.mxu0 %vm1570_vm6, %v4866_v41  ;;  %3198 = vmatpush.msk.msrb.mxu3 %vm1570_vm6, %v4866_v41 }
 0x103   : > { %4864 = vst [vmem:[#allocation20_spill] sm:$0xff] %v3884_v34  ;;  %v3899_v27 = vsub.f32 %v3194_v24, %v3194_v24 }
 0x104   : > { %v343_v2 = vpop.f32.mrf.mxu0  ;;  %v438_v26 = vpop.f32.mrf.mxu1 }
 0x105   : > { %v439_v12 = vadd.f32 %v438_v26, %v335_v51  ;;  %v536_v4 = vpop.f32.mrf.mxu2  ;;  %1894 = vmatpush.msrb.mxu2 %v3899_v27  ;;  %v4824_v62 = vand.u32 4294901760, %v3899_v27 }
 0x106   : > { %1153 = vmatmul.f32.gmra.mxu3 %v3751_v58 }
 0x107   : > { %v537_v38 = vadd.f32 %v536_v4, %v439_v12  ;;  %744 = vmatmul.f32.gmra.mxu0 %v3751_v58  ;;  %823 = vmatmul.f32.gmra.mxu1 %v3731_v29  ;;  %v1804_v12 = vsub.f32 %v3899_v27, %v4824_v62 }
 0x109   : > { %v3909_v4 = vadd.f32 %v648_v48, %v537_v38  ;;  %1054 = vmatmul.f32.gmra.mxu2 %v3786_v20  ;;  %v654_v51 = vpop.f32.mrf.mxu3  ;;  %v1805_v55 = vand.u32 4294901760, %v1804_v12 }
 0x10b   : > { %4867 = vst [vmem:[#allocation21_spill] sm:$0xff] %v3909_v4  ;;  %1806 = vmatpush.msrb.mxu1 %v1805_v55 }
 0x10c   : > { %v351_v30 = vpop.f32.mrf.mxu0  ;;  %v442_v26 = vpop.f32.mrf.mxu1 }
 0x10d   : > { %v443_v24 = vadd.f32 %v442_v26, %v343_v2  ;;  %v541_v34 = vpop.f32.mrf.mxu2 }
 0x10e   : > { %1157 = vmatmul.f32.gmra.mxu3 %v3771_v35 }
 0x10f   : > { %v542_v48 = vadd.f32 %v541_v34, %v443_v24  ;;  %748 = vmatmul.f32.gmra.mxu0 %v3771_v35  ;;  %827 = vmatmul.f32.gmra.mxu1 %v3751_v58 }
 0x111   : > { %v3920_v20 = vadd.f32 %v654_v51, %v542_v48  ;;  %1062 = vmatmul.f32.gmra.mxu2 %v3802_v44  ;;  %v660_v38 = vpop.f32.mrf.mxu3 }
 0x113   : > { %4868 = vst [vmem:[#allocation22_spill] sm:$0xff] %v3920_v20 }
 0x114   : > { %v359_v4 = vpop.f32.mrf.mxu0  ;;  %v446_v18 = vpop.f32.mrf.mxu1 }
 0x115   : > { %v447_v28 = vadd.f32 %v446_v18, %v351_v30  ;;  %v546_v62 = vpop.f32.mrf.mxu2 }
 0x116   : > { %1161 = vmatmul.f32.gmra.mxu3 %v3791_v47 }
 0x117   : > { %v547_v2 = vadd.f32 %v546_v62, %v447_v28  ;;  %752 = vmatmul.f32.gmra.mxu0 %v3791_v47  ;;  %831 = vmatmul.f32.gmra.mxu1 %v3771_v35 }
 0x119   : > { %v3926_v34 = vadd.f32 %v660_v38, %v547_v2  ;;  %1070 = vmatmul.f32.gmra.mxu2 %v3813_v1  ;;  %v666_v55 = vpop.f32.mrf.mxu3 }
 0x11b   : > { %4869 = vst [vmem:[#allocation23_spill] sm:$0xff] %v3926_v34 }
 0x11c   : > { %v693_v51 = vpop.f32.mrf.mxu0  ;;  %v450_v26 = vpop.f32.mrf.mxu1 }
 0x11d   : > { %v451_v44 = vadd.f32 %v450_v26, %v359_v4  ;;  %v551_v12 = vpop.f32.mrf.mxu2 }
 0x11e   : > { %1487 = vmatmul.f32.vlgmr.msra.gmra.mxu3 %v3425_v6 }
 0x11f   : > { %v552_v18 = vadd.f32 %v551_v12, %v451_v44  ;;  %1187 = vmatmul.f32.vlgmr.msra.gmra.mxu0 %v3436_v10  ;;  %835 = vmatmul.f32.gmra.mxu1 %v3791_v47 }
 0x121   : > { %v3932_v28 = vadd.f32 %v666_v55, %v552_v18  ;;  %1404 = vmatmul.f32.vlgmr.msra.gmra.mxu2 %v3425_v6  ;;  %v1102_v62 = vpop.f32.mrf.mxu3 }
 0x123   : > { %4870 = vst [vmem:[#allocation24_spill] sm:$0xff] %v3932_v28 }
 0x124   : > { %v697_v30 = vpop.f32.mrf.mxu0  ;;  %v776_v24 = vpop.f32.mrf.mxu1 }
 0x125   : > { %v951_v1 = vpop.f32.mrf.mxu2 }
 0x126   : > { %v3935_v48 = vadd.f32 %v1102_v62, %v951_v1  ;;  %1491 = vmatmul.f32.gmra.mxu3 %v3427_v7 }
 0x127   : > { %1192 = vmatmul.f32.gmra.mxu0 %v3439_v11  ;;  %1287 = vmatmul.f32.vlgmr.msra.gmra.mxu1 %v3449_v14 }
 0x129   : > { %1408 = vmatmul.f32.gmra.mxu2 %v3427_v7  ;;  %v1106_v10 = vpop.f32.mrf.mxu3 }
 0x12c   : > { %v701_v4 = vpop.f32.mrf.mxu0  ;;  %v780_v38 = vpop.f32.mrf.mxu1 }
 0x12d   : > { %v959_v2 = vpop.f32.mrf.mxu2 }
 0x12e   : > { %v3941_v55 = vadd.f32 %v1106_v10, %v959_v2  ;;  %1495 = vmatmul.f32.gmra.mxu3 %v3459_v17 }
 0x12f   : > { %1197 = vmatmul.f32.gmra.mxu0 %v3500_v33  ;;  %1293 = vmatmul.f32.gmra.mxu1 %v3457_v16 }
 0x131   : > { %1412 = vmatmul.f32.gmra.mxu2 %v3459_v17  ;;  %v1110_v6 = vpop.f32.mrf.mxu3 }
 0x134   : > { %v705_v11 = vpop.f32.mrf.mxu0  ;;  %v784_v51 = vpop.f32.mrf.mxu1 }
 0x135   : > { %v967_v14 = vpop.f32.mrf.mxu2 }
 0x136   : > { %v3947_v26 = vadd.f32 %v1110_v6, %v967_v14  ;;  %1499 = vmatmul.f32.gmra.mxu3 %v3516_v43 }
 0x137   : > { %1202 = vmatmul.f32.gmra.mxu0 %v3528_v46  ;;  %1299 = vmatmul.f32.gmra.mxu1 %v3514_v42 }
 0x139   : > { %1416 = vmatmul.f32.gmra.mxu2 %v3516_v43  ;;  %v1114_v7 = vpop.f32.mrf.mxu3 }
 0x13c   : > { %v3953_v33 = vpop.f32.mrf.mxu0  ;;  %v788_v16 = vpop.f32.mrf.mxu1 }
 0x13d   : > { %v975_v44 = vpop.f32.mrf.mxu2 }
 0x13e   : > { %v3955_v17 = vadd.f32 %v1114_v7, %v975_v44  ;;  %1503 = vmatmul.f32.gmra.mxu3 %v3543_v50  ;;  %v4873_v7 = vld [vmem:[#allocation6_spill] sm:$0xff] }
 0x13f   : > { %1207 = vmatmul.f32.gmra.mxu0 %v3558_v53  ;;  %1305 = vmatmul.f32.gmra.mxu1 %v3541_v49  ;;  %v3193_v53 = vsel %vm1570_vm6, 1.0, %v4865_v59 }
 0x140   : > { %v1808_v49 = vsub.f32 %v3193_v53, %v3193_v53 }
 0x141   : > { %1420 = vmatmul.f32.gmra.mxu2 %v3543_v50  ;;  %v1118_v46 = vpop.f32.mrf.mxu3  ;;  %v4871_v50 = vand.u32 4294901760, %v3899_v27 }
 0x142   : > { %v1809_v62 = vand.u32 4294901760, %v1808_v49  ;;  %1897 = vmatpush.msrb.mxu2 %v1808_v49  ;;  %v4876_v46 = vld [vmem:[#allocation8_spill] sm:$0xff] }
 0x143   : > { %2111 = vmatpush.msra.mxu0 %v4871_v50  ;;  %v1576_v50 = vld [vmem:[%s4808_s1] sm:$0xff] }
 0x144   : > { %v3961_v12 = vpop.f32.mrf.mxu0  ;;  %v3963_v42 = vpop.f32.mrf.mxu1  ;;  %v1810_v30 = vsub.f32 %v1808_v49, %v1809_v62 }
 0x145   : > { %v983_v43 = vpop.f32.mrf.mxu2  ;;  %2115 = vmatpush.msra.mxu0 %v1809_v62 }
 0x146   : > { %1507 = vmatmul.f32.gmra.mxu3 %v3567_v57  ;;  %v1811_v1 = vand.u32 4294901760, %v1810_v30  ;;  %v4877_v43 = vld [vmem:[#allocation7_spill] sm:$0xff]  ;;  %v4880_v30 = vld [vmem:[#allocation10_spill] sm:$0xff] }
 0x147   : > { %1212 = vmatmul.f32.gmra.mxu0 %v3578_v60  ;;  %1311 = vmatmul.f32.gmra.mxu1 %v3565_v56 }
 0x148   : > { %1812 = vmatpush.msrb.mxu1 %v1811_v1 }
 0x149   : > { %1424 = vmatmul.f32.gmra.mxu2 %v3567_v57  ;;  %v1122_v18 = vpop.f32.mrf.mxu3 }
 0x14a   : > { %3199 = vmatpush.msk.msra.mxu1 %vm1571_vm5, %v4866_v41  ;;  %v4065_v18 = vld [vmem:[%s3444_s3 + $0x3] ss:$0 sm:$0xff]  ;;  %s3106_s3 = scalar_lea.hbm %s4809_s2, %s3229_s17 }
 0x14b   : > { %vm2284_vm7 = vcmp.eq.s32.totalorder %v3433_v9, %v4065_v18  ;;  %vm2283_vm8 = vcmp.eq.s32.totalorder %v3423_v5, %v4065_v18  ;;  %v1586_v9 = vld [vmem:[%s4808_s1 + $0x50] sm:$0xff]  ;;  %s3109_s24 = sshll.u32 %s3106_s3, 4  ;;  %s3110_s24 = int_to_ptr.hbm [resolvable:$true] %s3109_s24 }
 0x14c   : > { %v3985_v24 = vpop.f32.mrf.mxu0  ;;  %v3987_v60 = vpop.f32.mrf.mxu1  ;;  %3200 = vmatpush.msk.msra.mxu1 %vm1570_vm6, %v4866_v41  ;;  %v3202_v1 = vsel %vm2284_vm7, 1.0, %v4865_v59  ;;  %3203 = vmatpush.msk.msra.mxu2 %vm2284_vm7, %v4866_v41  ;;  %v1623_v5 = vsel %vm166_vm0, %v1586_v9, 0  ;;  %s3295_s25 = sshra.s32 %s3110_s24, 4  ;;  %s3296_s25 = int_to_ptr.hbm [resolvable:$true] %s3295_s25 }
 0x14d   : > { %v991_v56 = vpop.f32.mrf.mxu2  ;;  %s3297_s26 = scalar_lea.hbm %s3296_s25, 192  ;;  %p3302_p0 = scmp.lt.s32.totalorder %s3296_s25, %s4809_s2 }
 0x14e   : > { %1511 = vmatmul.f32.gmra.mxu3 %v3587_v0  ;;  %v4881_v56 = vld [vmem:[#allocation9_spill] sm:$0xff]  ;;  %3204 = vmatpush.msk.msra.mxu2 %vm2283_vm8, %v4866_v41  ;;  %p3298_p11 = scmp.ne.s32.totalorder %s3296_s25, %s3297_s26  ;;  %p3303_p1 = scmp.lt.s32.totalorder %s3301_s30, %s3297_s26 }
 0x14f   : > { %1217 = vmatmul.f32.gmra.mxu0 %v3598_v3  ;;  %1317 = vmatmul.f32.gmra.mxu1 %v3585_v63 }
 0x150   : > { %p3299_p12 = pnand %p3298_p11, %p3403_p5  ;;  %p3304_p2 = por %p3303_p1, %p3302_p0 }
 0x151   : > { %1428 = vmatmul.f32.gmra.mxu2 %v3587_v0  ;;  %v1126_v57 = vpop.f32.mrf.mxu3 }
 0x152   : > { %p3300_p13 = pneg %p3299_p12 }
 0x154   : > { %v4001_v27 = vpop.f32.mrf.mxu0  ;;  %v4003_v10 = vpop.f32.mrf.mxu1  ;;  %p3305_p3 = pnand %p3304_p2, %p3300_p13 }
 0x155   : > { %v999_v3 = vpop.f32.mrf.mxu2 }
 0x156   : > { %1515 = vmatmul.f32.gmra.mxu3 %v3621_v19  ;;  %v4084_v3 = vsub.f32 %v3202_v1, %v3202_v1 }
 0x157   : > { %1222 = vmatmul.f32.gmra.mxu0 %v3634_v25  ;;  %1323 = vmatmul.f32.gmra.mxu1 %v3619_v13 }
 0x159   : > { %1432 = vmatmul.f32.gmra.mxu2 %v3621_v19  ;;  %v1130_v63 = vpop.f32.mrf.mxu3 }
 0x15c   : > { %v4009_v0 = vpop.f32.mrf.mxu0  ;;  %v4011_v4 = vpop.f32.mrf.mxu1 }
 0x15d   : > { %v1007_v15 = vpop.f32.mrf.mxu2 }
 0x15e   : > { %1519 = vmatmul.f32.gmra.mxu3 %v3643_v32  ;;  %v4825_v15 = vand.u32 4294901760, %v4084_v3 }
 0x15f   : > { %1227 = vmatmul.f32.gmra.mxu0 %v3658_v36  ;;  %1329 = vmatmul.f32.gmra.mxu1 %v3641_v31 }
 0x161   : > { %1436 = vmatmul.f32.gmra.mxu2 %v3643_v32  ;;  %v1134_v38 = vpop.f32.mrf.mxu3 }
 0x164   : > { %v4017_v25 = vpop.f32.mrf.mxu0  ;;  %v4019_v13 = vpop.f32.mrf.mxu1 }
 0x165   : > { %v1015_v19 = vpop.f32.mrf.mxu2 }
 0x166   : > { %v4021_v2 = vadd.f32 %v1134_v38, %v1015_v19  ;;  %1523 = vmatmul.f32.gmra.mxu3 %v3671_v40 }
 0x167   : > { %1232 = vmatmul.f32.gmra.mxu0 %v3682_v45  ;;  %1335 = vmatmul.f32.gmra.mxu1 %v3669_v39 }
 0x169   : > { %1440 = vmatmul.f32.gmra.mxu2 %v3671_v40  ;;  %v1138_v36 = vpop.f32.mrf.mxu3 }
 0x16c   : > { %v4027_v31 = vpop.f32.mrf.mxu0  ;;  %v4029_v32 = vpop.f32.mrf.mxu1 }
 0x16d   : > { %v1023_v6 = vpop.f32.mrf.mxu2 }
 0x16e   : > { %v4031_v11 = vadd.f32 %v1138_v36, %v1023_v6  ;;  %1527 = vmatmul.f32.gmra.mxu3 %v3691_v54  ;;  %v2517_v6 = vsub.f32 %v4084_v3, %v4825_v15 }
 0x16f   : > { %1237 = vmatmul.f32.gmra.mxu0 %v3702_v61  ;;  %1341 = vmatmul.f32.gmra.mxu1 %v3689_v52 }
 0x171   : > { %1444 = vmatmul.f32.gmra.mxu2 %v3691_v54  ;;  %v1142_v45 = vpop.f32.mrf.mxu3 }
 0x174   : > { %v4037_v39 = vpop.f32.mrf.mxu0  ;;  %v4039_v40 = vpop.f32.mrf.mxu1 }
 0x175   : > { %4872 = vst [vmem:[#allocation25_spill] sm:$0xff] %v4037_v39  ;;  %v1031_v51 = vpop.f32.mrf.mxu2 }
 0x176   : > { %v4041_v14 = vadd.f32 %v1142_v45, %v1031_v51  ;;  %1531 = vmatmul.f32.gmra.mxu3 %v3711_v8  ;;  %v4884_v51 = vld [vmem:[#allocation12_spill] sm:$0xff] }
 0x177   : > { %1242 = vmatmul.f32.gmra.mxu0 %v3722_v23  ;;  %1347 = vmatmul.f32.gmra.mxu1 %v4873_v7  ;;  %v4885_v7 = vld [vmem:[#allocation11_spill] sm:$0xff] }
 0x179   : > { %1448 = vmatmul.f32.gmra.mxu2 %v3711_v8  ;;  %v1146_v52 = vpop.f32.mrf.mxu3 }
 0x17c   : > { %v4047_v61 = vpop.f32.mrf.mxu0  ;;  %v4049_v54 = vpop.f32.mrf.mxu1 }
 0x17d   : > { %4874 = vst [vmem:[#allocation6_spill] sm:$0xff] %v4047_v61  ;;  %v1039_v16 = vpop.f32.mrf.mxu2 }
 0x17e   : > { %4875 = vst [vmem:[#allocation26_spill] sm:$0xff] %v4049_v54  ;;  %v4051_v44 = vadd.f32 %v1146_v52, %v1039_v16  ;;  %1535 = vmatmul.f32.gmra.mxu3 %v3731_v29  ;;  %v2518_v16 = vand.u32 4294901760, %v2517_v6 }
 0x17f   : > { %1247 = vmatmul.f32.gmra.mxu0 %v4876_v46  ;;  %1353 = vmatmul.f32.gmra.mxu1 %v4877_v43 }
 0x180   : > { %2519 = vmatpush.msra.mxu3 %v2518_v16 }
 0x181   : > { %1452 = vmatmul.f32.gmra.mxu2 %v3731_v29  ;;  %v1150_v23 = vpop.f32.mrf.mxu3  ;;  %v1593_v29 = vsel %vm166_vm0, %v1576_v50, 0 }
 0x182   : > { %v4086_v63 = vand.u32 4294901760, %v1593_v29 }
 0x184   : > { %v4057_v53 = vpop.f32.mrf.mxu0  ;;  %v4059_v8 = vpop.f32.mrf.mxu1  ;;  %v4105_v52 = vsub.f32 %v1593_v29, %v4086_v63  ;;  %v1578_v29 = vld [vmem:[%s4808_s1 + $0x10] sm:$0xff] }
 0x185   : > { %4878 = vst [vmem:[#allocation8_spill] sm:$0xff] %v4057_v53  ;;  %v1047_v49 = vpop.f32.mrf.mxu2 }
 0x186   : > { %4879 = vst [vmem:[#allocation7_spill] sm:$0xff] %v4059_v8  ;;  %v4067_v62 = vadd.f32 %v1150_v23, %v1047_v49  ;;  %1539 = vmatmul.f32.gmra.mxu3 %v3751_v58  ;;  %v4110_v23 = vand.u32 4294901760, %v4105_v52 }
 0x187   : > { %1252 = vmatmul.f32.gmra.mxu0 %v4880_v30  ;;  %1359 = vmatmul.f32.gmra.mxu1 %v4881_v56 }
 0x189   : > { %1456 = vmatmul.f32.gmra.mxu2 %v3751_v58  ;;  %v1154_v57 = vpop.f32.mrf.mxu3  ;;  %v1577_v58 = vld [vmem:[%s4808_s1 + $0x8] sm:$0xff] }
 0x18a   : > { %v1596_v46 = vsel %vm166_vm0, %v1577_v58, 0  ;;  %v1599_v58 = vsel %vm166_vm0, %v1578_v29, 0 }
 0x18b   : > { %v4112_v49 = vand.u32 4294901760, %v1596_v46 }
 0x18c   : > { %v4089_v38 = vpop.f32.mrf.mxu0  ;;  %v4091_v19 = vpop.f32.mrf.mxu1 }
 0x18d   : > { %4882 = vst [vmem:[#allocation10_spill] sm:$0xff] %v4089_v38  ;;  %v1055_v36 = vpop.f32.mrf.mxu2  ;;  %v4129_v6 = vsub.f32 %v1596_v46, %v4112_v49  ;;  %v1579_v46 = vld [vmem:[%s4808_s1 + $0x18] sm:$0xff] }
 0x18e   : > { %4883 = vst [vmem:[#allocation9_spill] sm:$0xff] %v4091_v19  ;;  %v4099_v45 = vadd.f32 %v1154_v57, %v1055_v36  ;;  %1543 = vmatmul.f32.gmra.mxu3 %v3771_v35  ;;  %v4889_v57 = vld [vmem:[#allocation13_spill] sm:$0xff]  ;;  %v1661_v36 = vsub.f32 %v4105_v52, %v4110_v23  ;;  %v710_v19 = vadd.f32 %v3953_v33, %v3842_v21 }
 0x18f   : > { %1257 = vmatmul.f32.gmra.mxu0 %v4884_v51  ;;  %1365 = vmatmul.f32.gmra.mxu1 %v4885_v7  ;;  %v4136_v16 = vand.u32 4294901760, %v4129_v6 }
 0x190   : > { %v4133_v7 = vand.u32 4294901760, %v1661_v36  ;;  %v793_v21 = vadd.f32 %v3963_v42, %v710_v19 }
 0x191   : > { %1460 = vmatmul.f32.gmra.mxu2 %v3771_v35  ;;  %v1158_v43 = vpop.f32.mrf.mxu3  ;;  %v4888_v35 = vld [vmem:[#allocation14_spill] sm:$0xff]  ;;  %v1669_v36 = vsub.f32 %v4129_v6, %v4136_v16 }
 0x194   : > { %v4114_v50 = vpop.f32.mrf.mxu0  ;;  %v4116_v30 = vpop.f32.mrf.mxu1 }
 0x195   : > { %4886 = vst [vmem:[#allocation12_spill] sm:$0xff] %v4114_v50  ;;  %v1063_v56 = vpop.f32.mrf.mxu2  ;;  %v4159_v50 = vand.u32 4294901760, %v1669_v36 }
 0x196   : > { %4887 = vst [vmem:[#allocation11_spill] sm:$0xff] %v4116_v30  ;;  %v4121_v1 = vadd.f32 %v1158_v43, %v1063_v56  ;;  %1547 = vmatmul.f32.gmra.mxu3 %v3791_v47  ;;  %v4138_v43 = vand.u32 4294901760, %v1599_v58 }
 0x197   : > { %1262 = vmatmul.f32.gmra.mxu0 %v4888_v35  ;;  %1371 = vmatmul.f32.gmra.mxu1 %v4889_v57 }
 0x198   : > { %v4153_v15 = vsub.f32 %v1599_v58, %v4138_v43 }
 0x199   : > { %1464 = vmatmul.f32.gmra.mxu2 %v3791_v47  ;;  %v1162_v51 = vpop.f32.mrf.mxu3  ;;  %v4891_v47 = vld [vmem:[#allocation15_spill] sm:$0xff] }
 0x19c   : > { %v1188_v56 = vpop.f32.mrf.mxu0  ;;  %v4140_v35 = vpop.f32.mrf.mxu1 }
 0x19d   : > { %4890 = vst [vmem:[#allocation14_spill] sm:$0xff] %v4140_v35  ;;  %v1071_v57 = vpop.f32.mrf.mxu2  ;;  %v1602_v35 = vsel %vm166_vm0, %v1579_v46, 0  ;;  %v1580_v46 = vld [vmem:[%s4808_s1 + $0x20] sm:$0xff] }
 0x19e   : > { %v4145_v29 = vadd.f32 %v1162_v51, %v1071_v57  ;;  %2000 = vmatmul.f32.vlgmr.msrb.gmra.mxu3 %v4110_v23  ;;  %v1189_v57 = vadd.f32 %v1188_v56, %v3935_v48  ;;  %v4165_v28 = vand.u32 4294901760, %v1602_v35 }
 0x19f   : > { %1663 = vmatmul.f32.vlgmr.msrb.gmra.mxu0 %v4133_v7  ;;  %1377 = vmatmul.f32.gmra.mxu1 %v4891_v47  ;;  %v4163_v47 = vand.u32 4294901760, %v4153_v15 }
 0x1a0   : > { %2607 = vmatpush.msrb.mxu0 %v4084_v3  ;;  %v4180_v36 = vsub.f32 %v1602_v35, %v4165_v28 }
 0x1a1   : > { %1900 = vmatmul.f32.vlgmr.msrb.gmra.mxu2 %v4105_v52  ;;  %v1488_v51 = vpop.f32.mrf.mxu3  ;;  %4892 = vst [vmem:[#allocation13_spill] sm:$0xff] %v4163_v47  ;;  %v1677_v56 = vsub.f32 %v4153_v15, %v4163_v47 }
 0x1a3   : > { %v4192_v35 = vand.u32 4294901760, %v1677_v56 }
 0x1a4   : > { %v1193_v58 = vpop.f32.mrf.mxu0  ;;  %v1288_v30 = vpop.f32.mrf.mxu1 }
 0x1a5   : > { %v1289_v38 = vadd.f32 %v1288_v30, %v1189_v57  ;;  %v1405_v34 = vpop.f32.mrf.mxu2  ;;  %v1605_v30 = vsel %vm166_vm0, %v1580_v46, 0  ;;  %v1194_v57 = vadd.f32 %v1193_v58, %v3941_v55  ;;  %v4195_v46 = vand.u32 4294901760, %v4180_v36 }
 0x1a6   : > { %2006 = vmatmul.f32.gmra.mxu3 %v4136_v16  ;;  %v714_v58 = vadd.f32 %v3961_v12, %v3848_v22 }
 0x1a7   : > { %v1406_v48 = vadd.f32 %v1405_v34, %v1289_v38  ;;  %1671 = vmatmul.f32.gmra.mxu0 %v4159_v50  ;;  %1814 = vmatmul.f32.vlgmr.msrb.gmra.mxu1 %v4086_v63  ;;  %v4189_v38 = vand.u32 4294901760, %v1605_v30  ;;  %4893 = vst [vmem:[#allocation15_spill] sm:$0xff] %v4195_v46 }
 0x1a8   : > { %3205 = vmatpush.msk.msrb.mxu1 %vm2284_vm7, %v4866_v41  ;;  %v797_v56 = vadd.f32 %v3987_v60, %v714_v58  ;;  %v1582_v60 = vld [vmem:[%s4808_s1 + $0x30] sm:$0xff] }
 0x1a9   : > { %v1489_v34 = vadd.f32 %v1488_v51, %v1406_v48  ;;  %1905 = vmatmul.f32.gmra.mxu2 %v4129_v6  ;;  %v1492_v33 = vpop.f32.mrf.mxu3  ;;  %v1581_v51 = vld [vmem:[%s4808_s1 + $0x28] sm:$0xff]  ;;  %v4205_v55 = vsub.f32 %v1605_v30, %v4189_v38  ;;  %v1611_v58 = vsel %vm166_vm0, %v1582_v60, 0 }
 0x1aa   : > { %3206 = vmatpush.msk.msrb.mxu1 %vm2283_vm8, %v4866_v41 }
 0x1ab   : > { %v3002_v53 = vmul.f32 %v1489_v34, %v793_v21  ;;  %4894 = vst [vmem:[#allocation27_spill] sm:$0xff] %v4205_v55  ;;  %v4217_v34 = vand.u32 4294901760, %v4205_v55 }
 0x1ac   : > { %v1198_v20 = vpop.f32.mrf.mxu0  ;;  %v1294_v8 = vpop.f32.mrf.mxu1 }
 0x1ad   : > { %3006 = vst [vmem:[%s4197_s5] sm:$0xff] %v3002_v53  ;;  %v1295_v42 = vadd.f32 %v1294_v8, %v1194_v57  ;;  %v1409_v19 = vpop.f32.mrf.mxu2  ;;  %v1685_v53 = vsub.f32 %v4180_v36, %v4195_v46  ;;  %v1608_v8 = vsel %vm166_vm0, %v1581_v51, 0  ;;  %v1199_v22 = vadd.f32 %v1198_v20, %v3947_v26 }
 0x1ae   : > { %2012 = vmatmul.f32.gmra.mxu3 %v4163_v47  ;;  %4895 = vst [vmem:[#allocation28_spill] sm:$0xff] %v4217_v34  ;;  %v718_v20 = vadd.f32 %v3985_v24, %v3854_v37 }
 0x1af   : > { %v1410_v48 = vadd.f32 %v1409_v19, %v1295_v42  ;;  %1679 = vmatmul.f32.gmra.mxu0 %v4192_v35  ;;  %1818 = vmatmul.f32.gmra.mxu1 %v4112_v49  ;;  %v4220_v57 = vand.u32 4294901760, %v1685_v53  ;;  %v4222_v42 = vand.u32 4294901760, %v1608_v8 }
 0x1b1   : > { %v1493_v21 = vadd.f32 %v1492_v33, %v1410_v48  ;;  %1910 = vmatmul.f32.gmra.mxu2 %v4153_v15  ;;  %v1496_v30 = vpop.f32.mrf.mxu3  ;;  %v1693_v33 = vsub.f32 %v4205_v55, %v4217_v34  ;;  %v801_v48 = vadd.f32 %v4003_v10, %v718_v20  ;;  %v1583_v10 = vld [vmem:[%s4808_s1 + $0x38] sm:$0xff] }
 0x1b3   : > { %v3003_v12 = vmul.f32 %v1493_v21, %v797_v56  ;;  %v4241_v21 = vand.u32 4294901760, %v1693_v33 }
 0x1b4   : > { %v1203_v19 = vpop.f32.mrf.mxu0  ;;  %v1300_v61 = vpop.f32.mrf.mxu1 }
 0x1b5   : > { %3007 = vst [vmem:[%s4197_s5 + $0x8] sm:$0xff] %v3003_v12  ;;  %v1301_v51 = vadd.f32 %v1300_v61, %v1199_v22  ;;  %v1413_v54 = vpop.f32.mrf.mxu2  ;;  %v4236_v61 = vsub.f32 %v1608_v8, %v4222_v42  ;;  %v1204_v37 = vadd.f32 %v1203_v19, %v3955_v17  ;;  %v4247_v22 = vand.u32 4294901760, %v1611_v58 }
 0x1b6   : > { %2018 = vmatmul.f32.gmra.mxu3 %v4195_v46 }
 0x1b7   : > { %v1414_v26 = vadd.f32 %v1413_v54, %v1301_v51  ;;  %1687 = vmatmul.f32.gmra.mxu0 %v4220_v57  ;;  %1822 = vmatmul.f32.gmra.mxu1 %v4138_v43  ;;  %4896 = vst [vmem:[#allocation29_spill] sm:$0xff] %v4236_v61  ;;  %v4245_v54 = vand.u32 4294901760, %v4236_v61  ;;  %v4261_v20 = vsub.f32 %v1611_v58, %v4247_v22 }
 0x1b9   : > { %v1497_v53 = vadd.f32 %v1496_v30, %v1414_v26  ;;  %1915 = vmatmul.f32.gmra.mxu2 %v4180_v36  ;;  %v1500_v56 = vpop.f32.mrf.mxu3  ;;  %4897 = vst [vmem:[#allocation30_spill] sm:$0xff] %v4245_v54  ;;  %v4898_v30 = vld [vmem:[#allocation16_spill] sm:$0xff]  ;;  %v1701_v19 = vsub.f32 %v4236_v61, %v4245_v54  ;;  %v1614_v26 = vsel %vm166_vm0, %v1583_v10, 0 }
 0x1ba   : > { %v722_v33 = vadd.f32 %v4001_v27, %v4898_v30  ;;  %4899 = vst [vmem:[#allocation16_spill] sm:$0xff] %v4261_v20 }
 0x1bb   : > { %v3004_v24 = vmul.f32 %v1497_v53, %v801_v48 }
 0x1bc   : > { %v1208_v8 = vpop.f32.mrf.mxu0  ;;  %v1306_v12 = vpop.f32.mrf.mxu1  ;;  %v805_v48 = vadd.f32 %v4011_v4, %v722_v33  ;;  %v1584_v4 = vld [vmem:[%s4808_s1 + $0x40] sm:$0xff] }
 0x1bd   : > { %3008 = vst [vmem:[%s4197_s5 + $0x10] sm:$0xff] %v3004_v24  ;;  %v1307_v51 = vadd.f32 %v1306_v12, %v1204_v37  ;;  %v1417_v60 = vpop.f32.mrf.mxu2  ;;  %v4266_v24 = vand.u32 4294901760, %v1701_v19  ;;  %v4269_v8 = vand.u32 4294901760, %v4261_v20  ;;  %v4271_v12 = vand.u32 4294901760, %v1614_v26 }
 0x1be   : > { %2024 = vmatmul.f32.gmra.mxu3 %v4217_v34 }
 0x1bf   : > { %v1418_v17 = vadd.f32 %v1417_v60, %v1307_v51  ;;  %1695 = vmatmul.f32.gmra.mxu0 %v4241_v21  ;;  %1826 = vmatmul.f32.gmra.mxu1 %v4165_v28  ;;  %4900 = vst [vmem:[#allocation31_spill] sm:$0xff] %v4269_v8  ;;  %v1709_v10 = vsub.f32 %v4261_v20, %v4269_v8 }
 0x1c0   : > { %v4293_v30 = vsub.f32 %v1614_v26, %v4271_v12 }
 0x1c1   : > { %v1501_v53 = vadd.f32 %v1500_v56, %v1418_v17  ;;  %1920 = vmatmul.f32.gmra.mxu2 %v4205_v55  ;;  %v1504_v27 = vpop.f32.mrf.mxu3  ;;  %v3201_v56 = vsel %vm2283_vm8, 1.0, %v4865_v59  ;;  %v1617_v17 = vsel %vm166_vm0, %v1584_v4, 0  ;;  %v4902_v59 = vand.u32 4294901760, %v4084_v3  ;;  %v1585_v4 = vld [vmem:[%s4808_s1 + $0x48] sm:$0xff] }
 0x1c2   : > { %4901 = vst [vmem:[#allocation32_spill] sm:$0xff] %v4293_v30  ;;  %v2521_v33 = vsub.f32 %v3201_v56, %v3201_v56  ;;  %v4306_v26 = vand.u32 4294901760, %v4293_v30  ;;  %v4308_v27 = vand.u32 4294901760, %v1617_v17 }
 0x1c3   : > { %v3005_v37 = vmul.f32 %v1501_v53, %v805_v48  ;;  %2824 = vmatpush.msrb.mxu2 %v4902_v59  ;;  %v4303_v53 = vand.u32 4294901760, %v1709_v10 }
 0x1c4   : > { %v1213_v51 = vpop.f32.mrf.mxu0  ;;  %v1312_v60 = vpop.f32.mrf.mxu1  ;;  %v2522_v48 = vand.u32 4294901760, %v2521_v33  ;;  %2610 = vmatpush.msrb.mxu0 %v2521_v33  ;;  %4903 = vst [vmem:[#allocation33_spill] sm:$0xff] %v4306_v26  ;;  %v1717_v56 = vsub.f32 %v4293_v30, %v4306_v26  ;;  %v4319_v10 = vsub.f32 %v1617_v17, %v4308_v27 }
 0x1c5   : > { %3009 = vst [vmem:[%s4197_s5 + $0x18] sm:$0xff] %v3005_v37  ;;  %v1421_v58 = vpop.f32.mrf.mxu2 }
 0x1c6   : > { %2030 = vmatmul.f32.gmra.mxu3 %v4245_v54  ;;  %v2523_v37 = vsub.f32 %v2521_v33, %v2522_v48  ;;  %2828 = vmatpush.msrb.mxu2 %v2522_v48  ;;  %4904 = vst [vmem:[#allocation34_spill] sm:$0xff] %v4319_v10  ;;  %v1620_v33 = vsel %vm166_vm0, %v1585_v4, 0  ;;  %v4330_v48 = vand.u32 4294901760, %v4319_v10 }
 0x1c7   : > { %1703 = vmatmul.f32.gmra.mxu0 %v4266_v24  ;;  %1830 = vmatmul.f32.gmra.mxu1 %v4189_v38 }
 0x1c8   : > { %v2524_v58 = vand.u32 4294901760, %v2523_v37  ;;  %4905 = vst [vmem:[#allocation35_spill] sm:$0xff] %v4330_v48  ;;  %v4332_v37 = vand.u32 4294901760, %v1620_v33 }
 0x1c9   : > { %1925 = vmatmul.f32.gmra.mxu2 %v4236_v61  ;;  %v1508_v19 = vpop.f32.mrf.mxu3 }
 0x1ca   : > { %2525 = vmatpush.msra.mxu3 %v2524_v58  ;;  %v4327_v19 = vand.u32 4294901760, %v1717_v56  ;;  %v4347_v58 = vsub.f32 %v1620_v33, %v4332_v37  ;;  %v4356_v56 = vand.u32 4294901760, %v1623_v5  ;;  %v1587_v33 = vld [vmem:[%s4808_s1 + $0x58] sm:$0xff] }
 0x1cc   : > { %v1218_v3 = vpop.f32.mrf.mxu0  ;;  %v1318_v51 = vpop.f32.mrf.mxu1  ;;  %3207 = vmatpush.msk.msrb.mxu3 %vm2284_vm7, %v4866_v41  ;;  %4906 = vst [vmem:[#allocation36_spill] sm:$0xff] %v4347_v58  ;;  %v4354_v4 = vand.u32 4294901760, %v4347_v58  ;;  %v4367_v9 = vsub.f32 %v1623_v5, %v4356_v56  ;;  %v1588_v5 = vld [vmem:[%s4808_s1 + $0x60] sm:$0xff] }
 0x1cd   : > { %v1425_v60 = vpop.f32.mrf.mxu2 }
 0x1ce   : > { %2036 = vmatmul.f32.gmra.mxu3 %v4269_v8  ;;  %v1725_v60 = vsub.f32 %v4319_v10, %v4330_v48  ;;  %4907 = vst [vmem:[#allocation37_spill] sm:$0xff] %v4354_v4 }
 0x1cf   : > { %1711 = vmatmul.f32.gmra.mxu0 %v4303_v53  ;;  %1834 = vmatmul.f32.gmra.mxu1 %v4222_v42  ;;  %4908 = vst [vmem:[#allocation38_spill] sm:$0xff] %v4367_v9 }
 0x1d0   : > { %3208 = vmatpush.msk.msrb.mxu3 %vm2283_vm8, %v4866_v41  ;;  %v4351_v18 = vand.u32 4294901760, %v1725_v60  ;;  %v1626_v60 = vsel %vm166_vm0, %v1587_v33, 0 }
 0x1d1   : > { %1930 = vmatmul.f32.gmra.mxu2 %v4261_v20  ;;  %v1512_v59 = vpop.f32.mrf.mxu3 }
 0x1d4   : > { %v1223_v17 = vpop.f32.mrf.mxu0  ;;  %v1324_v3 = vpop.f32.mrf.mxu1 }
 0x1d5   : > { %v1429_v51 = vpop.f32.mrf.mxu2 }
 0x1d6   : > { %2042 = vmatmul.f32.gmra.mxu3 %v4306_v26  ;;  %v1733_v51 = vsub.f32 %v4347_v58, %v4354_v4  ;;  %v4377_v26 = vand.u32 4294901760, %v1626_v60 }
 0x1d7   : > { %1719 = vmatmul.f32.gmra.mxu0 %v4327_v19  ;;  %1838 = vmatmul.f32.gmra.mxu1 %v4247_v22 }
 0x1d9   : > { %1935 = vmatmul.f32.gmra.mxu2 %v4293_v30  ;;  %v1516_v41 = vpop.f32.mrf.mxu3 }
 0x1dc   : > { %v1228_v59 = vpop.f32.mrf.mxu0  ;;  %v1330_v17 = vpop.f32.mrf.mxu1 }
 0x1dd   : > { %v1433_v3 = vpop.f32.mrf.mxu2  ;;  %v1229_v17 = vadd.f32 %v1228_v59, %v4021_v2  ;;  %v4388_v59 = vsub.f32 %v1626_v60, %v4377_v26 }
 0x1de   : > { %2048 = vmatmul.f32.gmra.mxu3 %v4330_v48  ;;  %v4372_v3 = vand.u32 4294901760, %v1733_v51  ;;  %v4375_v48 = vand.u32 4294901760, %v4367_v9 }
 0x1df   : > { %1727 = vmatmul.f32.gmra.mxu0 %v4351_v18  ;;  %1842 = vmatmul.f32.gmra.mxu1 %v4271_v12  ;;  %4910 = vst [vmem:[#allocation40_spill] sm:$0xff] %v4388_v59 }
 0x1e0   : > { %4909 = vst [vmem:[#allocation39_spill] sm:$0xff] %v4375_v48  ;;  %v1741_v2 = vsub.f32 %v4367_v9, %v4375_v48 }
 0x1e1   : > { %1940 = vmatmul.f32.gmra.mxu2 %v4319_v10  ;;  %v1520_v41 = vpop.f32.mrf.mxu3 }
 0x1e4   : > { %v1233_v8 = vpop.f32.mrf.mxu0  ;;  %v1336_v30 = vpop.f32.mrf.mxu1 }
 0x1e5   : > { %v1337_v54 = vadd.f32 %v1336_v30, %v1229_v17  ;;  %v1437_v20 = vpop.f32.mrf.mxu2  ;;  %v1629_v30 = vsel %vm166_vm0, %v1588_v5, 0 }
 0x1e6   : > { %2054 = vmatmul.f32.gmra.mxu3 %v4354_v4  ;;  %v1234_v4 = vadd.f32 %v1233_v8, %v4031_v11  ;;  %v4400_v10 = vand.u32 4294901760, %v1629_v30 }
 0x1e7   : > { %v1438_v33 = vadd.f32 %v1437_v20, %v1337_v54  ;;  %1735 = vmatmul.f32.gmra.mxu0 %v4372_v3  ;;  %1846 = vmatmul.f32.gmra.mxu1 %v4308_v27  ;;  %v4395_v54 = vand.u32 4294901760, %v1741_v2  ;;  %v4398_v20 = vand.u32 4294901760, %v4388_v59 }
 0x1e8   : > { %v4411_v8 = vsub.f32 %v1629_v30, %v4400_v10 }
 0x1e9   : > { %v4391_v51 = vadd.f32 %v1520_v41, %v1438_v33  ;;  %1945 = vmatmul.f32.gmra.mxu2 %v4347_v58  ;;  %v1524_v17 = vpop.f32.mrf.mxu3  ;;  %4912 = vst [vmem:[#allocation42_spill] sm:$0xff] %v4398_v20  ;;  %v1589_v41 = vld [vmem:[%s4808_s1 + $0x68] sm:$0xff]  ;;  %v1749_v11 = vsub.f32 %v4388_v59, %v4398_v20 }
 0x1ea   : > { %4913 = vst [vmem:[#allocation43_spill] sm:$0xff] %v4411_v8 }
 0x1eb   : > { %4911 = vst [vmem:[#allocation41_spill] sm:$0xff] %v4391_v51 }
 0x1ec   : > { %v1238_v34 = vpop.f32.mrf.mxu0  ;;  %v1342_v61 = vpop.f32.mrf.mxu1 }
 0x1ed   : > { %v1343_v60 = vadd.f32 %v1342_v61, %v1234_v4  ;;  %v1441_v46 = vpop.f32.mrf.mxu2  ;;  %v1632_v61 = vsel %vm166_vm0, %v1589_v41, 0  ;;  %v1239_v2 = vadd.f32 %v1238_v34, %v4041_v14 }
 0x1ee   : > { %2060 = vmatmul.f32.gmra.mxu3 %v4375_v48  ;;  %v4423_v48 = vand.u32 4294901760, %v1632_v61 }
 0x1ef   : > { %v1442_v5 = vadd.f32 %v1441_v46, %v1343_v60  ;;  %1743 = vmatmul.f32.gmra.mxu0 %v4395_v54  ;;  %1850 = vmatmul.f32.gmra.mxu1 %v4332_v37  ;;  %v4418_v46 = vand.u32 4294901760, %v1749_v11  ;;  %v4421_v60 = vand.u32 4294901760, %v4411_v8 }
 0x1f0   : > { %v4434_v34 = vsub.f32 %v1632_v61, %v4423_v48 }
 0x1f1   : > { %v4414_v4 = vadd.f32 %v1524_v17, %v1442_v5  ;;  %1950 = vmatmul.f32.gmra.mxu2 %v4367_v9  ;;  %v1528_v33 = vpop.f32.mrf.mxu3  ;;  %4915 = vst [vmem:[#allocation45_spill] sm:$0xff] %v4421_v60  ;;  %v1590_v17 = vld [vmem:[%s4808_s1 + $0x70] sm:$0xff]  ;;  %v1757_v14 = vsub.f32 %v4411_v8, %v4421_v60 }
 0x1f3   : > { %4914 = vst [vmem:[#allocation44_spill] sm:$0xff] %v4414_v4 }
 0x1f4   : > { %v1243_v58 = vpop.f32.mrf.mxu0  ;;  %v1348_v51 = vpop.f32.mrf.mxu1 }
 0x1f5   : > { %v1349_v30 = vadd.f32 %v1348_v51, %v1239_v2  ;;  %v1445_v55 = vpop.f32.mrf.mxu2  ;;  %v1635_v51 = vsel %vm166_vm0, %v1590_v17, 0  ;;  %v1244_v2 = vadd.f32 %v1243_v58, %v4051_v44 }
 0x1f6   : > { %2066 = vmatmul.f32.gmra.mxu3 %v4398_v20  ;;  %v4446_v20 = vand.u32 4294901760, %v1635_v51 }
 0x1f7   : > { %v1446_v41 = vadd.f32 %v1445_v55, %v1349_v30  ;;  %1751 = vmatmul.f32.gmra.mxu0 %v4418_v46  ;;  %1854 = vmatmul.f32.gmra.mxu1 %v4356_v56  ;;  %v4441_v55 = vand.u32 4294901760, %v1757_v14  ;;  %v4444_v30 = vand.u32 4294901760, %v4434_v34 }
 0x1f8   : > { %v4457_v58 = vsub.f32 %v1635_v51, %v4446_v20 }
 0x1f9   : > { %v4437_v5 = vadd.f32 %v1528_v33, %v1446_v41  ;;  %1955 = vmatmul.f32.gmra.mxu2 %v4388_v59  ;;  %v1532_v11 = vpop.f32.mrf.mxu3  ;;  %4917 = vst [vmem:[#allocation47_spill] sm:$0xff] %v4444_v30  ;;  %v1591_v33 = vld [vmem:[%s4808_s1 + $0x78] sm:$0xff]  ;;  %v1765_v44 = vsub.f32 %v4434_v34, %v4444_v30 }
 0x1fb   : > { %4916 = vst [vmem:[#allocation46_spill] sm:$0xff] %v4437_v5 }
 0x1fc   : > { %v1248_v9 = vpop.f32.mrf.mxu0  ;;  %v1354_v4 = vpop.f32.mrf.mxu1 }
 0x1fd   : > { %v1355_v61 = vadd.f32 %v1354_v4, %v1244_v2  ;;  %v1449_v39 = vpop.f32.mrf.mxu2  ;;  %v1638_v4 = vsel %vm166_vm0, %v1591_v33, 0  ;;  %v1249_v2 = vadd.f32 %v1248_v9, %v4067_v62 }
 0x1fe   : > { %2072 = vmatmul.f32.gmra.mxu3 %v4421_v60  ;;  %v4469_v60 = vand.u32 4294901760, %v1638_v4 }
 0x1ff   : > { %v1450_v17 = vadd.f32 %v1449_v39, %v1355_v61  ;;  %1759 = vmatmul.f32.gmra.mxu0 %v4441_v55  ;;  %1858 = vmatmul.f32.gmra.mxu1 %v4377_v26  ;;  %v4464_v39 = vand.u32 4294901760, %v1765_v44  ;;  %v4467_v61 = vand.u32 4294901760, %v4457_v58 }
 0x200   : > { %v4477_v9 = vsub.f32 %v1638_v4, %v4469_v60 }
 0x201   : > { %v4460_v41 = vadd.f32 %v1532_v11, %v1450_v17  ;;  %1960 = vmatmul.f32.gmra.mxu2 %v4411_v8  ;;  %v1536_v14 = vpop.f32.mrf.mxu3  ;;  %4918 = vst [vmem:[#allocation48_spill] sm:$0xff] %v4467_v61  ;;  %v1773_v62 = vsub.f32 %v4457_v58, %v4467_v61 }
 0x203   : > { %v4483_v44 = vand.u32 4294901760, %v1773_v62 }
 0x204   : > { %v1253_v59 = vpop.f32.mrf.mxu0  ;;  %v1360_v5 = vpop.f32.mrf.mxu1 }
 0x205   : > { %v1361_v51 = vadd.f32 %v1360_v5, %v1249_v2  ;;  %v1453_v47 = vpop.f32.mrf.mxu2  ;;  %v1254_v5 = vadd.f32 %v1253_v59, %v4099_v45 }
 0x206   : > { %2078 = vmatmul.f32.gmra.mxu3 %v4444_v30 }
 0x207   : > { %v1454_v11 = vadd.f32 %v1453_v47, %v1361_v51  ;;  %1767 = vmatmul.f32.gmra.mxu0 %v4464_v39  ;;  %1862 = vmatmul.f32.gmra.mxu1 %v4400_v10  ;;  %v4486_v47 = vand.u32 4294901760, %v4477_v9 }
 0x209   : > { %v4479_v33 = vadd.f32 %v1536_v14, %v1454_v11  ;;  %1965 = vmatmul.f32.gmra.mxu2 %v4434_v34  ;;  %v1540_v17 = vpop.f32.mrf.mxu3  ;;  %v1781_v14 = vsub.f32 %v4477_v9, %v4486_v47 }
 0x20b   : > { %4919 = vst [vmem:[#allocation49_spill] sm:$0xff] %v4479_v33  ;;  %v4497_v62 = vand.u32 4294901760, %v1781_v14 }
 0x20c   : > { %v1258_v2 = vpop.f32.mrf.mxu0  ;;  %v1366_v51 = vpop.f32.mrf.mxu1 }
 0x20d   : > { %v1367_v30 = vadd.f32 %v1366_v51, %v1254_v5  ;;  %v1457_v8 = vpop.f32.mrf.mxu2  ;;  %v1259_v11 = vadd.f32 %v1258_v2, %v4121_v1 }
 0x20e   : > { %2084 = vmatmul.f32.gmra.mxu3 %v4467_v61 }
 0x20f   : > { %v1458_v4 = vadd.f32 %v1457_v8, %v1367_v30  ;;  %1775 = vmatmul.f32.gmra.mxu0 %v4483_v44  ;;  %1866 = vmatmul.f32.gmra.mxu1 %v4423_v48 }
 0x211   : > { %v4493_v45 = vadd.f32 %v1540_v17, %v1458_v4  ;;  %1970 = vmatmul.f32.gmra.mxu2 %v4457_v58  ;;  %v1544_v59 = vpop.f32.mrf.mxu3 }
 0x213   : > { %4920 = vst [vmem:[#allocation50_spill] sm:$0xff] %v4493_v45 }
 0x214   : > { %v1263_v5 = vpop.f32.mrf.mxu0  ;;  %v1372_v51 = vpop.f32.mrf.mxu1 }
 0x215   : > { %v1373_v33 = vadd.f32 %v1372_v51, %v1259_v11  ;;  %v1461_v8 = vpop.f32.mrf.mxu2  ;;  %v1264_v1 = vadd.f32 %v1263_v5, %v4145_v29 }
 0x216   : > { %2090 = vmatmul.f32.gmra.mxu3 %v4486_v47 }
 0x217   : > { %v1462_v30 = vadd.f32 %v1461_v8, %v1373_v33  ;;  %1783 = vmatmul.f32.gmra.mxu0 %v4497_v62  ;;  %1870 = vmatmul.f32.gmra.mxu1 %v4446_v20 }
 0x219   : > { %v4502_v17 = vadd.f32 %v1544_v59, %v1462_v30  ;;  %1975 = vmatmul.f32.gmra.mxu2 %v4477_v9  ;;  %v1548_v4 = vpop.f32.mrf.mxu3 }
 0x21c   : > { %v1664_v2 = vpop.f32.mrf.mxu0  ;;  %v1378_v14 = vpop.f32.mrf.mxu1 }
 0x21d   : > { %v1379_v45 = vadd.f32 %v1378_v14, %v1264_v1  ;;  %v1465_v61 = vpop.f32.mrf.mxu2 }
 0x21e   : > { %2527 = vmatmul.f32.vlgmr.msra.gmra.mxu3 %v4086_v63 }
 0x21f   : > { %v1466_v11 = vadd.f32 %v1465_v61, %v1379_v45  ;;  %2117 = vmatmul.f32.vlgmr.msra.gmra.mxu0 %v4086_v63  ;;  %1874 = vmatmul.f32.gmra.mxu1 %v4469_v60 }
 0x221   : > { %v4509_v33 = vadd.f32 %v1548_v4, %v1466_v11  ;;  %2376 = vmatmul.f32.vlgmr.msra.gmra.mxu2 %v4133_v7  ;;  %v2001_v59 = vpop.f32.mrf.mxu3 }
 0x224   : > { %v1672_v51 = vpop.f32.mrf.mxu0  ;;  %v1815_v8 = vpop.f32.mrf.mxu1 }
 0x225   : > { %v1816_v30 = vadd.f32 %v1815_v8, %v1664_v2  ;;  %v1901_v29 = vpop.f32.mrf.mxu2 }
 0x226   : > { %2531 = vmatmul.f32.gmra.mxu3 %v4112_v49 }
 0x227   : > { %v1902_v5 = vadd.f32 %v1901_v29, %v1816_v30  ;;  %2121 = vmatmul.f32.gmra.mxu0 %v4112_v49  ;;  %2200 = vmatmul.f32.vlgmr.msra.gmra.mxu1 %v4086_v63 }
 0x229   : > { %v4515_v61 = vadd.f32 %v2001_v59, %v1902_v5  ;;  %2384 = vmatmul.f32.gmra.mxu2 %v4159_v50  ;;  %v2007_v45 = vpop.f32.mrf.mxu3 }
 0x22c   : > { %v1680_v4 = vpop.f32.mrf.mxu0  ;;  %v1819_v1 = vpop.f32.mrf.mxu1 }
 0x22d   : > { %v1820_v7 = vadd.f32 %v1819_v1, %v1672_v51  ;;  %v1906_v14 = vpop.f32.mrf.mxu2 }
 0x22e   : > { %2535 = vmatmul.f32.gmra.mxu3 %v4138_v43 }
 0x22f   : > { %v1907_v2 = vadd.f32 %v1906_v14, %v1820_v7  ;;  %2125 = vmatmul.f32.gmra.mxu0 %v4138_v43  ;;  %2204 = vmatmul.f32.gmra.mxu1 %v4112_v49 }
 0x231   : > { %v4521_v11 = vadd.f32 %v2007_v45, %v1907_v2  ;;  %2392 = vmatmul.f32.gmra.mxu2 %v4192_v35  ;;  %v2013_v59 = vpop.f32.mrf.mxu3 }
 0x234   : > { %v1688_v8 = vpop.f32.mrf.mxu0  ;;  %v1823_v30 = vpop.f32.mrf.mxu1 }
 0x235   : > { %v1824_v50 = vadd.f32 %v1823_v30, %v1680_v4  ;;  %v1911_v29 = vpop.f32.mrf.mxu2 }
 0x236   : > { %2539 = vmatmul.f32.gmra.mxu3 %v4165_v28 }
 0x237   : > { %v1912_v51 = vadd.f32 %v1911_v29, %v1824_v50  ;;  %2129 = vmatmul.f32.gmra.mxu0 %v4165_v28  ;;  %2208 = vmatmul.f32.gmra.mxu1 %v4138_v43 }
 0x239   : > { %v4527_v5 = vadd.f32 %v2013_v59, %v1912_v51  ;;  %2400 = vmatmul.f32.gmra.mxu2 %v4220_v57  ;;  %v2019_v45 = vpop.f32.mrf.mxu3 }
 0x23c   : > { %v1696_v1 = vpop.f32.mrf.mxu0  ;;  %v1827_v7 = vpop.f32.mrf.mxu1 }
 0x23d   : > { %v1828_v35 = vadd.f32 %v1827_v7, %v1688_v8  ;;  %v1916_v14 = vpop.f32.mrf.mxu2 }
 0x23e   : > { %2543 = vmatmul.f32.gmra.mxu3 %v4189_v38 }
 0x23f   : > { %v1917_v4 = vadd.f32 %v1916_v14, %v1828_v35  ;;  %2133 = vmatmul.f32.gmra.mxu0 %v4189_v38  ;;  %2212 = vmatmul.f32.gmra.mxu1 %v4165_v28 }
 0x241   : > { %v4533_v2 = vadd.f32 %v2019_v45, %v1917_v4  ;;  %2408 = vmatmul.f32.gmra.mxu2 %v4241_v21  ;;  %v2025_v59 = vpop.f32.mrf.mxu3 }
 0x244   : > { %v1704_v30 = vpop.f32.mrf.mxu0  ;;  %v1831_v50 = vpop.f32.mrf.mxu1 }
 0x245   : > { %v1832_v57 = vadd.f32 %v1831_v50, %v1696_v1  ;;  %v1921_v29 = vpop.f32.mrf.mxu2 }
 0x246   : > { %2547 = vmatmul.f32.gmra.mxu3 %v4222_v42 }
 0x247   : > { %v1922_v8 = vadd.f32 %v1921_v29, %v1832_v57  ;;  %2137 = vmatmul.f32.gmra.mxu0 %v4222_v42  ;;  %2216 = vmatmul.f32.gmra.mxu1 %v4189_v38 }
 0x249   : > { %v4539_v51 = vadd.f32 %v2025_v59, %v1922_v8  ;;  %2416 = vmatmul.f32.gmra.mxu2 %v4266_v24  ;;  %v2031_v45 = vpop.f32.mrf.mxu3 }
 0x24c   : > { %v1712_v7 = vpop.f32.mrf.mxu0  ;;  %v1835_v35 = vpop.f32.mrf.mxu1 }
 0x24d   : > { %v1836_v21 = vadd.f32 %v1835_v35, %v1704_v30  ;;  %v1926_v14 = vpop.f32.mrf.mxu2 }
 0x24e   : > { %2551 = vmatmul.f32.gmra.mxu3 %v4247_v22 }
 0x24f   : > { %v1927_v1 = vadd.f32 %v1926_v14, %v1836_v21  ;;  %2141 = vmatmul.f32.gmra.mxu0 %v4247_v22  ;;  %2220 = vmatmul.f32.gmra.mxu1 %v4222_v42 }
 0x251   : > { %v4545_v4 = vadd.f32 %v2031_v45, %v1927_v1  ;;  %2424 = vmatmul.f32.gmra.mxu2 %v4303_v53  ;;  %v2037_v59 = vpop.f32.mrf.mxu3 }
 0x254   : > { %v1720_v50 = vpop.f32.mrf.mxu0  ;;  %v1839_v57 = vpop.f32.mrf.mxu1 }
 0x255   : > { %v1840_v24 = vadd.f32 %v1839_v57, %v1712_v7  ;;  %v1931_v29 = vpop.f32.mrf.mxu2 }
 0x256   : > { %2555 = vmatmul.f32.gmra.mxu3 %v4271_v12 }
 0x257   : > { %v1932_v30 = vadd.f32 %v1931_v29, %v1840_v24  ;;  %2145 = vmatmul.f32.gmra.mxu0 %v4271_v12  ;;  %2224 = vmatmul.f32.gmra.mxu1 %v4247_v22 }
 0x259   : > { %v4551_v8 = vadd.f32 %v2037_v59, %v1932_v30  ;;  %2432 = vmatmul.f32.gmra.mxu2 %v4327_v19  ;;  %v2043_v45 = vpop.f32.mrf.mxu3 }
 0x25c   : > { %v1728_v35 = vpop.f32.mrf.mxu0  ;;  %v1843_v21 = vpop.f32.mrf.mxu1 }
 0x25d   : > { %v1844_v53 = vadd.f32 %v1843_v21, %v1720_v50  ;;  %v1936_v14 = vpop.f32.mrf.mxu2 }
 0x25e   : > { %2559 = vmatmul.f32.gmra.mxu3 %v4308_v27 }
 0x25f   : > { %v1937_v7 = vadd.f32 %v1936_v14, %v1844_v53  ;;  %2149 = vmatmul.f32.gmra.mxu0 %v4308_v27  ;;  %2228 = vmatmul.f32.gmra.mxu1 %v4271_v12 }
 0x261   : > { %v4557_v1 = vadd.f32 %v2043_v45, %v1937_v7  ;;  %2440 = vmatmul.f32.gmra.mxu2 %v4351_v18  ;;  %v2049_v59 = vpop.f32.mrf.mxu3 }
 0x264   : > { %v1736_v57 = vpop.f32.mrf.mxu0  ;;  %v1847_v24 = vpop.f32.mrf.mxu1 }
 0x265   : > { %v1941_v19 = vpop.f32.mrf.mxu2 }
 0x266   : > { %2563 = vmatmul.f32.gmra.mxu3 %v4332_v37 }
 0x267   : > { %2153 = vmatmul.f32.gmra.mxu0 %v4332_v37  ;;  %2232 = vmatmul.f32.gmra.mxu1 %v4308_v27 }
 0x269   : > { %2448 = vmatmul.f32.gmra.mxu2 %v4372_v3  ;;  %v2055_v50 = vpop.f32.mrf.mxu3 }
 0x26c   : > { %v1744_v29 = vpop.f32.mrf.mxu0  ;;  %v1851_v30 = vpop.f32.mrf.mxu1 }
 0x26d   : > { %v1946_v35 = vpop.f32.mrf.mxu2 }
 0x26e   : > { %2567 = vmatmul.f32.gmra.mxu3 %v4356_v56 }
 0x26f   : > { %2157 = vmatmul.f32.gmra.mxu0 %v4356_v56  ;;  %2236 = vmatmul.f32.gmra.mxu1 %v4332_v37 }
 0x271   : > { %2456 = vmatmul.f32.gmra.mxu2 %v4395_v54  ;;  %v2061_v18 = vpop.f32.mrf.mxu3 }
 0x274   : > { %v1752_v45 = vpop.f32.mrf.mxu0  ;;  %v1855_v21 = vpop.f32.mrf.mxu1 }
 0x275   : > { %v1951_v53 = vpop.f32.mrf.mxu2 }
 0x276   : > { %2571 = vmatmul.f32.gmra.mxu3 %v4377_v26 }
 0x277   : > { %2161 = vmatmul.f32.gmra.mxu0 %v4377_v26  ;;  %2240 = vmatmul.f32.gmra.mxu1 %v4356_v56 }
 0x279   : > { %2464 = vmatmul.f32.gmra.mxu2 %v4418_v46  ;;  %v2067_v3 = vpop.f32.mrf.mxu3 }
 0x27c   : > { %v1760_v14 = vpop.f32.mrf.mxu0  ;;  %v1859_v7 = vpop.f32.mrf.mxu1 }
 0x27d   : > { %v1956_v59 = vpop.f32.mrf.mxu2 }
 0x27e   : > { %2575 = vmatmul.f32.gmra.mxu3 %v4400_v10 }
 0x27f   : > { %2165 = vmatmul.f32.gmra.mxu0 %v4400_v10  ;;  %2244 = vmatmul.f32.gmra.mxu1 %v4377_v26 }
 0x281   : > { %2472 = vmatmul.f32.gmra.mxu2 %v4441_v55  ;;  %v2073_v54 = vpop.f32.mrf.mxu3 }
 0x284   : > { %v1768_v57 = vpop.f32.mrf.mxu0  ;;  %v1863_v24 = vpop.f32.mrf.mxu1 }
 0x285   : > { %v1864_v19 = vadd.f32 %v1863_v24, %v1760_v14  ;;  %v1961_v50 = vpop.f32.mrf.mxu2 }
 0x286   : > { %2579 = vmatmul.f32.gmra.mxu3 %v4423_v48 }
 0x287   : > { %v1962_v46 = vadd.f32 %v1961_v50, %v1864_v19  ;;  %2169 = vmatmul.f32.gmra.mxu0 %v4423_v48  ;;  %2248 = vmatmul.f32.gmra.mxu1 %v4400_v10 }
 0x289   : > { %v4579_v29 = vadd.f32 %v2073_v54, %v1962_v46  ;;  %2480 = vmatmul.f32.gmra.mxu2 %v4464_v39  ;;  %v2079_v30 = vpop.f32.mrf.mxu3 }
 0x28c   : > { %v1776_v35 = vpop.f32.mrf.mxu0  ;;  %v1867_v18 = vpop.f32.mrf.mxu1 }
 0x28d   : > { %v1868_v55 = vadd.f32 %v1867_v18, %v1768_v57  ;;  %v1966_v45 = vpop.f32.mrf.mxu2 }
 0x28e   : > { %2583 = vmatmul.f32.gmra.mxu3 %v4446_v20 }
 0x28f   : > { %v1967_v21 = vadd.f32 %v1966_v45, %v1868_v55  ;;  %2173 = vmatmul.f32.gmra.mxu0 %v4446_v20  ;;  %2252 = vmatmul.f32.gmra.mxu1 %v4423_v48  ;;  %v4921_v55 = vld [vmem:[#allocation17_spill] sm:$0xff] }
 0x291   : > { %v4585_v53 = vadd.f32 %v2079_v30, %v1967_v21  ;;  %2488 = vmatmul.f32.gmra.mxu2 %v4483_v44  ;;  %v2085_v3 = vpop.f32.mrf.mxu3 }
 0x294   : > { %v1784_v14 = vpop.f32.mrf.mxu0  ;;  %v1871_v7 = vpop.f32.mrf.mxu1 }
 0x295   : > { %v1872_v39 = vadd.f32 %v1871_v7, %v1776_v35  ;;  %v1971_v59 = vpop.f32.mrf.mxu2 }
 0x296   : > { %2587 = vmatmul.f32.gmra.mxu3 %v4469_v60 }
 0x297   : > { %v1972_v54 = vadd.f32 %v1971_v59, %v1872_v39  ;;  %2177 = vmatmul.f32.gmra.mxu0 %v4469_v60  ;;  %2256 = vmatmul.f32.gmra.mxu1 %v4446_v20 }
 0x299   : > { %v4591_v57 = vadd.f32 %v2085_v3, %v1972_v54  ;;  %2496 = vmatmul.f32.gmra.mxu2 %v4497_v62  ;;  %v2091_v24 = vpop.f32.mrf.mxu3  ;;  %v726_v62 = vadd.f32 %v4009_v0, %v4921_v55 }
 0x29c   : > { %v2118_v19 = vpop.f32.mrf.mxu0  ;;  %v1875_v50 = vpop.f32.mrf.mxu1 }
 0x29d   : > { %v1876_v44 = vadd.f32 %v1875_v50, %v1784_v14  ;;  %v1976_v46 = vpop.f32.mrf.mxu2  ;;  %v2119_v45 = vadd.f32 %v2118_v19, %v4515_v61  ;;  %v809_v14 = vadd.f32 %v4019_v13, %v726_v62 }
 0x29e   : > { %2913 = vmatmul.f32.vlgmr.msrb.gmra.mxu3 %v4086_v63 }
 0x29f   : > { %v1977_v30 = vadd.f32 %v1976_v46, %v1876_v44  ;;  %2613 = vmatmul.f32.vlgmr.msrb.gmra.mxu0 %v4105_v52  ;;  %2260 = vmatmul.f32.gmra.mxu1 %v4469_v60 }
 0x2a1   : > { %v4597_v35 = vadd.f32 %v2091_v24, %v1977_v30  ;;  %2830 = vmatmul.f32.vlgmr.msrb.gmra.mxu2 %v4086_v63  ;;  %v2528_v18 = vpop.f32.mrf.mxu3  ;;  %v4922_v63 = vld [vmem:[#allocation18_spill] sm:$0xff] }
 0x2a2   : > { %v730_v61 = vadd.f32 %v4017_v25, %v4922_v63 }
 0x2a4   : > { %v2122_v21 = vpop.f32.mrf.mxu0  ;;  %v2201_v3 = vpop.f32.mrf.mxu1  ;;  %v813_v19 = vadd.f32 %v4029_v32, %v730_v61  ;;  %v4928_v61 = vld [vmem:[#allocation27_spill] sm:$0xff] }
 0x2a5   : > { %v2202_v7 = vadd.f32 %v2201_v3, %v2119_v45  ;;  %v2377_v39 = vpop.f32.mrf.mxu2  ;;  %v2123_v13 = vadd.f32 %v2122_v21, %v4521_v11 }
 0x2a6   : > { %v4604_v52 = vadd.f32 %v2528_v18, %v2377_v39  ;;  %2917 = vmatmul.f32.gmra.mxu3 %v4112_v49 }
 0x2a7   : > { %v3018_v59 = vmul.f32 %v2202_v7, %v809_v14  ;;  %2618 = vmatmul.f32.gmra.mxu0 %v4129_v6  ;;  %2713 = vmatmul.f32.vlgmr.msrb.gmra.mxu1 %v4110_v23  ;;  %v4927_v7 = vld [vmem:[#allocation26_spill] sm:$0xff] }
 0x2a9   : > { %3209 = vst [vmem:[%s4197_s5 + $0x20] sm:$0xff] %v3018_v59  ;;  %2834 = vmatmul.f32.gmra.mxu2 %v4112_v49  ;;  %v2532_v0 = vpop.f32.mrf.mxu3  ;;  %v4923_v49 = vld [vmem:[#allocation19_spill] sm:$0xff] }
 0x2aa   : > { %v734_v6 = vadd.f32 %v4027_v31, %v4923_v49  ;;  %v4931_v49 = vld [vmem:[#allocation29_spill] sm:$0xff] }
 0x2ac   : > { %v2126_v54 = vpop.f32.mrf.mxu0  ;;  %v2205_v24 = vpop.f32.mrf.mxu1  ;;  %v817_v18 = vadd.f32 %v4039_v40, %v734_v6  ;;  %v4932_v6 = vld [vmem:[#allocation28_spill] sm:$0xff] }
 0x2ad   : > { %v2206_v50 = vadd.f32 %v2205_v24, %v2123_v13  ;;  %v2385_v44 = vpop.f32.mrf.mxu2  ;;  %v2127_v32 = vadd.f32 %v2126_v54, %v4527_v5  ;;  %v4926_v5 = vld [vmem:[#allocation25_spill] sm:$0xff] }
 0x2ae   : > { %v4615_v46 = vadd.f32 %v2532_v0, %v2385_v44  ;;  %2921 = vmatmul.f32.gmra.mxu3 %v4138_v43 }
 0x2af   : > { %v3019_v23 = vmul.f32 %v2206_v50, %v813_v19  ;;  %2623 = vmatmul.f32.gmra.mxu0 %v4153_v15  ;;  %2719 = vmatmul.f32.gmra.mxu1 %v4136_v16  ;;  %v4924_v16 = vld [vmem:[#allocation13_spill] sm:$0xff] }
 0x2b1   : > { %3210 = vst [vmem:[%s4197_s5 + $0x28] sm:$0xff] %v3019_v23  ;;  %2838 = vmatmul.f32.gmra.mxu2 %v4138_v43  ;;  %v2536_v25 = vpop.f32.mrf.mxu3  ;;  %v4925_v43 = vld [vmem:[#allocation20_spill] sm:$0xff]  ;;  %v4930_v23 = vld [vmem:[#allocation41_spill] sm:$0xff] }
 0x2b2   : > { %v738_v21 = vadd.f32 %v4926_v5, %v4925_v43 }
 0x2b4   : > { %v2130_v11 = vpop.f32.mrf.mxu0  ;;  %v2209_v30 = vpop.f32.mrf.mxu1  ;;  %v821_v39 = vadd.f32 %v4927_v7, %v738_v21 }
 0x2b5   : > { %v2210_v55 = vadd.f32 %v2209_v30, %v2127_v32  ;;  %v2393_v62 = vpop.f32.mrf.mxu2  ;;  %v2131_v40 = vadd.f32 %v2130_v11, %v4533_v2 }
 0x2b6   : > { %v4626_v45 = vadd.f32 %v2536_v25, %v2393_v62  ;;  %2925 = vmatmul.f32.gmra.mxu3 %v4165_v28  ;;  %v4933_v62 = vld [vmem:[#allocation44_spill] sm:$0xff] }
 0x2b7   : > { %v3020_v15 = vmul.f32 %v2210_v55, %v817_v18  ;;  %2628 = vmatmul.f32.gmra.mxu0 %v4180_v36  ;;  %2725 = vmatmul.f32.gmra.mxu1 %v4924_v16  ;;  %v4934_v16 = vld [vmem:[#allocation16_spill] sm:$0xff] }
 0x2b9   : > { %3211 = vst [vmem:[%s4197_s5 + $0x30] sm:$0xff] %v3020_v15  ;;  %2842 = vmatmul.f32.gmra.mxu2 %v4165_v28  ;;  %v2540_v31 = vpop.f32.mrf.mxu3  ;;  %v4929_v28 = vld [vmem:[#allocation15_spill] sm:$0xff] }
 0x2bc   : > { %v2134_v3 = vpop.f32.mrf.mxu0  ;;  %v2213_v14 = vpop.f32.mrf.mxu1 }
 0x2bd   : > { %v2214_v59 = vadd.f32 %v2213_v14, %v2131_v40  ;;  %v2401_v0 = vpop.f32.mrf.mxu2  ;;  %v2135_v13 = vadd.f32 %v2134_v3, %v4539_v51  ;;  %v4936_v14 = vld [vmem:[#allocation46_spill] sm:$0xff] }
 0x2be   : > { %v4637_v63 = vadd.f32 %v2540_v31, %v2401_v0  ;;  %2929 = vmatmul.f32.gmra.mxu3 %v4189_v38  ;;  %v4935_v31 = vld [vmem:[#allocation30_spill] sm:$0xff] }
 0x2bf   : > { %v3021_v36 = vmul.f32 %v2214_v59, %v821_v39  ;;  %2633 = vmatmul.f32.gmra.mxu0 %v4928_v61  ;;  %2731 = vmatmul.f32.gmra.mxu1 %v4929_v28  ;;  %v4937_v39 = vld [vmem:[#allocation32_spill] sm:$0xff]  ;;  %v4938_v59 = vld [vmem:[#allocation31_spill] sm:$0xff] }
 0x2c1   : > { %3212 = vst [vmem:[%s4197_s5 + $0x38] sm:$0xff] %v3021_v36  ;;  %2846 = vmatmul.f32.gmra.mxu2 %v4189_v38  ;;  %v2544_v2 = vpop.f32.mrf.mxu3 }
 0x2c4   : > { %v2138_v54 = vpop.f32.mrf.mxu0  ;;  %v2217_v24 = vpop.f32.mrf.mxu1 }
 0x2c5   : > { %v2218_v19 = vadd.f32 %v2217_v24, %v2135_v13  ;;  %v2409_v50 = vpop.f32.mrf.mxu2  ;;  %v2139_v51 = vadd.f32 %v2138_v54, %v4545_v4  ;;  %v4939_v54 = vld [vmem:[#allocation34_spill] sm:$0xff]  ;;  %v4940_v24 = vld [vmem:[#allocation33_spill] sm:$0xff] }
 0x2c6   : > { %v4645_v44 = vadd.f32 %v2544_v2, %v2409_v50  ;;  %2933 = vmatmul.f32.gmra.mxu3 %v4222_v42 }
 0x2c7   : > { %v3052_v25 = vmul.f32 %v2218_v19, %v4930_v23  ;;  %2638 = vmatmul.f32.gmra.mxu0 %v4931_v49  ;;  %2737 = vmatmul.f32.gmra.mxu1 %v4932_v6  ;;  %v4942_v49 = vld [vmem:[#allocation35_spill] sm:$0xff] }
 0x2c9   : > { %3217 = vst [vmem:[%s4197_s5 + $0x60] sm:$0xff] %v3052_v25  ;;  %2850 = vmatmul.f32.gmra.mxu2 %v4222_v42  ;;  %v2548_v38 = vpop.f32.mrf.mxu3  ;;  %v4941_v25 = vld [vmem:[#allocation36_spill] sm:$0xff] }
 0x2cc   : > { %v2142_v32 = vpop.f32.mrf.mxu0  ;;  %v2221_v11 = vpop.f32.mrf.mxu1 }
 0x2cd   : > { %v2222_v30 = vadd.f32 %v2221_v11, %v2139_v51  ;;  %v2417_v18 = vpop.f32.mrf.mxu2  ;;  %v2143_v4 = vadd.f32 %v2142_v32, %v4551_v8  ;;  %v4944_v11 = vld [vmem:[#allocation37_spill] sm:$0xff] }
 0x2ce   : > { %v4654_v55 = vadd.f32 %v2548_v38, %v2417_v18  ;;  %2937 = vmatmul.f32.gmra.mxu3 %v4247_v22 }
 0x2cf   : > { %v3053_v15 = vmul.f32 %v2222_v30, %v4933_v62  ;;  %2643 = vmatmul.f32.gmra.mxu0 %v4934_v16  ;;  %2743 = vmatmul.f32.gmra.mxu1 %v4935_v31  ;;  %v4946_v31 = vld [vmem:[#allocation39_spill] sm:$0xff] }
 0x2d1   : > { %3218 = vst [vmem:[%s4197_s5 + $0x68] sm:$0xff] %v3053_v15  ;;  %2854 = vmatmul.f32.gmra.mxu2 %v4247_v22  ;;  %v2552_v42 = vpop.f32.mrf.mxu3 }
 0x2d4   : > { %v2146_v43 = vpop.f32.mrf.mxu0  ;;  %v2225_v5 = vpop.f32.mrf.mxu1 }
 0x2d5   : > { %v2226_v21 = vadd.f32 %v2225_v5, %v2143_v4  ;;  %v2425_v40 = vpop.f32.mrf.mxu2  ;;  %v2147_v8 = vadd.f32 %v2146_v43, %v4557_v1 }
 0x2d6   : > { %v4663_v3 = vadd.f32 %v2552_v42, %v2425_v40  ;;  %2941 = vmatmul.f32.gmra.mxu3 %v4271_v12  ;;  %v4947_v40 = vld [vmem:[#allocation42_spill] sm:$0xff] }
 0x2d7   : > { %v3054_v7 = vmul.f32 %v2226_v21, %v4936_v14  ;;  %2648 = vmatmul.f32.gmra.mxu0 %v4937_v39  ;;  %2749 = vmatmul.f32.gmra.mxu1 %v4938_v59  ;;  %v4948_v14 = vld [vmem:[#allocation43_spill] sm:$0xff] }
 0x2d9   : > { %3219 = vst [vmem:[%s4197_s5 + $0x70] sm:$0xff] %v3054_v7  ;;  %2858 = vmatmul.f32.gmra.mxu2 %v4271_v12  ;;  %v2556_v22 = vpop.f32.mrf.mxu3 }
 0x2dc   : > { %v2150_v0 = vpop.f32.mrf.mxu0  ;;  %v2229_v36 = vpop.f32.mrf.mxu1 }
 0x2dd   : > { %v2230_v61 = vadd.f32 %v2229_v36, %v2147_v8  ;;  %v2433_v28 = vpop.f32.mrf.mxu2 }
 0x2de   : > { %v4672_v2 = vadd.f32 %v2556_v22, %v2433_v28  ;;  %2945 = vmatmul.f32.gmra.mxu3 %v4308_v27 }
 0x2df   : > { %v3055_v13 = vmul.f32 %v2230_v61, %v4460_v41  ;;  %2653 = vmatmul.f32.gmra.mxu0 %v4939_v54  ;;  %2755 = vmatmul.f32.gmra.mxu1 %v4940_v24 }
 0x2e1   : > { %3220 = vst [vmem:[%s4197_s5 + $0x78] sm:$0xff] %v3055_v13  ;;  %2862 = vmatmul.f32.gmra.mxu2 %v4308_v27  ;;  %v2560_v12 = vpop.f32.mrf.mxu3  ;;  %v4943_v27 = vld [vmem:[#allocation38_spill] sm:$0xff] }
 0x2e4   : > { %v2154_v19 = vpop.f32.mrf.mxu0  ;;  %v2233_v1 = vpop.f32.mrf.mxu1 }
 0x2e5   : > { %v2441_v50 = vpop.f32.mrf.mxu2 }
 0x2e6   : > { %v4680_v23 = vadd.f32 %v2560_v12, %v2441_v50  ;;  %2949 = vmatmul.f32.gmra.mxu3 %v4332_v37 }
 0x2e7   : > { %2658 = vmatmul.f32.gmra.mxu0 %v4941_v25  ;;  %2761 = vmatmul.f32.gmra.mxu1 %v4942_v49 }
 0x2e9   : > { %2866 = vmatmul.f32.gmra.mxu2 %v4332_v37  ;;  %v2564_v41 = vpop.f32.mrf.mxu3  ;;  %v4945_v37 = vld [vmem:[#allocation40_spill] sm:$0xff] }
 0x2ec   : > { %v2158_v6 = vpop.f32.mrf.mxu0  ;;  %v2237_v38 = vpop.f32.mrf.mxu1 }
 0x2ed   : > { %v2449_v51 = vpop.f32.mrf.mxu2 }
 0x2ee   : > { %v4686_v32 = vadd.f32 %v2564_v41, %v2449_v51  ;;  %2953 = vmatmul.f32.gmra.mxu3 %v4356_v56 }
 0x2ef   : > { %2663 = vmatmul.f32.gmra.mxu0 %v4943_v27  ;;  %2767 = vmatmul.f32.gmra.mxu1 %v4944_v11  ;;  %v4952_v27 = vld [vmem:[#allocation21_spill] sm:$0xff] }
 0x2f1   : > { %2870 = vmatmul.f32.gmra.mxu2 %v4356_v56  ;;  %v2568_v30 = vpop.f32.mrf.mxu3 }
 0x2f4   : > { %v2162_v18 = vpop.f32.mrf.mxu0  ;;  %v2241_v62 = vpop.f32.mrf.mxu1 }
 0x2f5   : > { %v2457_v15 = vpop.f32.mrf.mxu2 }
 0x2f6   : > { %v4692_v16 = vadd.f32 %v2568_v30, %v2457_v15  ;;  %2957 = vmatmul.f32.gmra.mxu3 %v4377_v26  ;;  %v4954_v30 = vld [vmem:[#allocation7_spill] sm:$0xff] }
 0x2f7   : > { %2668 = vmatmul.f32.gmra.mxu0 %v4945_v37  ;;  %2773 = vmatmul.f32.gmra.mxu1 %v4946_v31 }
 0x2f9   : > { %2874 = vmatmul.f32.gmra.mxu2 %v4377_v26  ;;  %v2572_v42 = vpop.f32.mrf.mxu3 }
 0x2fc   : > { %v2166_v4 = vpop.f32.mrf.mxu0  ;;  %v2245_v43 = vpop.f32.mrf.mxu1 }
 0x2fd   : > { %v2167_v5 = vadd.f32 %v2166_v4, %v4579_v29  ;;  %v2465_v56 = vpop.f32.mrf.mxu2  ;;  %v4949_v29 = vld [vmem:[#allocation45_spill] sm:$0xff]  ;;  %v4955_v43 = vld [vmem:[#allocation22_spill] sm:$0xff] }
 0x2fe   : > { %v4699_v21 = vadd.f32 %v2572_v42, %v2465_v56  ;;  %2961 = vmatmul.f32.gmra.mxu3 %v4400_v10 }
 0x2ff   : > { %2779 = vmatmul.f32.gmra.mxu1 %v4947_v40  ;;  %2673 = vmatmul.f32.gmra.mxu0 %v4948_v14  ;;  %v4957_v14 = vld [vmem:[#allocation9_spill] sm:$0xff] }
 0x301   : > { %2878 = vmatmul.f32.gmra.mxu2 %v4400_v10  ;;  %v2576_v7 = vpop.f32.mrf.mxu3 }
 0x304   : > { %v2170_v39 = vpop.f32.mrf.mxu0  ;;  %v2249_v59 = vpop.f32.mrf.mxu1 }
 0x305   : > { %v2171_v26 = vadd.f32 %v2170_v39, %v4585_v53  ;;  %v4706_v22 = vadd.f32 %v2249_v59, %v2167_v5  ;;  %v2473_v8 = vpop.f32.mrf.mxu2  ;;  %v4950_v53 = vld [vmem:[#allocation47_spill] sm:$0xff]  ;;  %v4956_v5 = vld [vmem:[#allocation8_spill] sm:$0xff] }
 0x306   : > { %2965 = vmatmul.f32.gmra.mxu3 %v4423_v48  ;;  %v746_v56 = vadd.f32 %v4956_v5, %v4955_v43 }
 0x307   : > { %2785 = vmatmul.f32.gmra.mxu1 %v4949_v29  ;;  %2678 = vmatmul.f32.gmra.mxu0 %v4434_v34 }
 0x308   : > { %v829_v7 = vadd.f32 %v4957_v14, %v746_v56 }
 0x309   : > { %2882 = vmatmul.f32.gmra.mxu2 %v4423_v48  ;;  %v2580_v0 = vpop.f32.mrf.mxu3 }
 0x30c   : > { %v2174_v36 = vpop.f32.mrf.mxu0  ;;  %v2253_v61 = vpop.f32.mrf.mxu1 }
 0x30d   : > { %v2175_v10 = vadd.f32 %v2174_v36, %v4591_v57  ;;  %v4713_v28 = vadd.f32 %v2253_v61, %v2171_v26  ;;  %v2481_v13 = vpop.f32.mrf.mxu2  ;;  %v4951_v57 = vld [vmem:[#allocation48_spill] sm:$0xff]  ;;  %v4958_v61 = vld [vmem:[#allocation23_spill] sm:$0xff] }
 0x30e   : > { %2969 = vmatmul.f32.gmra.mxu3 %v4446_v20 }
 0x30f   : > { %2791 = vmatmul.f32.gmra.mxu1 %v4950_v53  ;;  %2683 = vmatmul.f32.gmra.mxu0 %v4457_v58 }
 0x311   : > { %2886 = vmatmul.f32.gmra.mxu2 %v4446_v20  ;;  %v2584_v54 = vpop.f32.mrf.mxu3 }
 0x312   : > { %v4960_v54 = vld [vmem:[#allocation11_spill] sm:$0xff] }
 0x314   : > { %v2178_v34 = vpop.f32.mrf.mxu0  ;;  %v2257_v24 = vpop.f32.mrf.mxu1 }
 0x315   : > { %v2179_v48 = vadd.f32 %v2178_v34, %v4597_v35  ;;  %v4720_v12 = vadd.f32 %v2257_v24, %v2175_v10  ;;  %v2489_v19 = vpop.f32.mrf.mxu2  ;;  %v4959_v10 = vld [vmem:[#allocation10_spill] sm:$0xff] }
 0x316   : > { %2973 = vmatmul.f32.gmra.mxu3 %v4469_v60  ;;  %v750_v13 = vadd.f32 %v4959_v10, %v4958_v61 }
 0x317   : > { %2797 = vmatmul.f32.gmra.mxu1 %v4951_v57  ;;  %2688 = vmatmul.f32.gmra.mxu0 %v4477_v9  ;;  %v4953_v9 = vld [vmem:[#allocation6_spill] sm:$0xff] }
 0x318   : > { %v742_v11 = vadd.f32 %v4953_v9, %v4952_v27  ;;  %v833_v34 = vadd.f32 %v4960_v54, %v750_v13 }
 0x319   : > { %2890 = vmatmul.f32.gmra.mxu2 %v4469_v60  ;;  %v2588_v1 = vpop.f32.mrf.mxu3 }
 0x31a   : > { %v825_v18 = vadd.f32 %v4954_v30, %v742_v11 }
 0x31c   : > { %v2614_v58 = vpop.f32.mrf.mxu0  ;;  %v2261_v50 = vpop.f32.mrf.mxu1 }
 0x31d   : > { %v4726_v20 = vadd.f32 %v2261_v50, %v2179_v48  ;;  %v2497_v25 = vpop.f32.mrf.mxu2  ;;  %v2615_v49 = vadd.f32 %v2614_v58, %v4604_v52 }
 0x31e   : > { %v4961_v25 = vld [vmem:[#allocation24_spill] sm:$0xff] }
 0x31f   : > { %2803 = vmatmul.f32.gmra.mxu1 %v4486_v47 }
 0x321   : > { %v2914_v35 = vpop.f32.mrf.mxu3 }
 0x324   : > { %v2619_v41 = vpop.f32.mrf.mxu0  ;;  %v2714_v6 = vpop.f32.mrf.mxu1 }
 0x325   : > { %v2715_v38 = vadd.f32 %v2714_v6, %v2615_v49  ;;  %v2831_v51 = vpop.f32.mrf.mxu2  ;;  %v2620_v37 = vadd.f32 %v2619_v41, %v4615_v46  ;;  %v4963_v6 = vld [vmem:[#allocation14_spill] sm:$0xff] }
 0x327   : > { %v2832_v60 = vadd.f32 %v2831_v51, %v2715_v38 }
 0x329   : > { %v2915_v62 = vadd.f32 %v2914_v35, %v2832_v60  ;;  %v2918_v15 = vpop.f32.mrf.mxu3  ;;  %v4962_v35 = vld [vmem:[#allocation12_spill] sm:$0xff] }
 0x32a   : > { %v754_v49 = vadd.f32 %v4962_v35, %v4961_v25 }
 0x32b   : > { %v3035_v47 = vmul.f32 %v2915_v62, %v825_v18 }
 0x32c   : > { %v2624_v31 = vpop.f32.mrf.mxu0  ;;  %v2720_v42 = vpop.f32.mrf.mxu1  ;;  %v837_v38 = vadd.f32 %v4963_v6, %v754_v49 }
 0x32d   : > { %3213 = vst [vmem:[%s4197_s5 + $0x40] sm:$0xff] %v3035_v47  ;;  %v2721_v52 = vadd.f32 %v2720_v42, %v2620_v37  ;;  %v2835_v4 = vpop.f32.mrf.mxu2  ;;  %v2625_v26 = vadd.f32 %v2624_v31, %v4626_v45  ;;  %v4964_v31 = vld [vmem:[#allocation49_spill] sm:$0xff] }
 0x32f   : > { %v2836_v40 = vadd.f32 %v2835_v4, %v2721_v52 }
 0x331   : > { %v2919_v39 = vadd.f32 %v2918_v15, %v2836_v40  ;;  %v2922_v59 = vpop.f32.mrf.mxu3 }
 0x333   : > { %v3036_v8 = vmul.f32 %v2919_v39, %v829_v7  ;;  %v4965_v7 = vld [vmem:[#allocation50_spill] sm:$0xff] }
 0x334   : > { %v2629_v46 = vpop.f32.mrf.mxu0  ;;  %v2726_v29 = vpop.f32.mrf.mxu1 }
 0x335   : > { %3214 = vst [vmem:[%s4197_s5 + $0x48] sm:$0xff] %v3036_v8  ;;  %v2727_v0 = vadd.f32 %v2726_v29, %v2625_v26  ;;  %v2839_v36 = vpop.f32.mrf.mxu2  ;;  %v2630_v19 = vadd.f32 %v2629_v46, %v4637_v63 }
 0x337   : > { %v2840_v53 = vadd.f32 %v2839_v36, %v2727_v0 }
 0x339   : > { %v2923_v24 = vadd.f32 %v2922_v59, %v2840_v53  ;;  %v2926_v48 = vpop.f32.mrf.mxu3 }
 0x33b   : > { %v3037_v57 = vmul.f32 %v2923_v24, %v833_v34 }
 0x33c   : > { %v2634_v45 = vpop.f32.mrf.mxu0  ;;  %v2732_v1 = vpop.f32.mrf.mxu1 }
 0x33d   : > { %3215 = vst [vmem:[%s4197_s5 + $0x50] sm:$0xff] %v3037_v57  ;;  %v2733_v58 = vadd.f32 %v2732_v1, %v2630_v19  ;;  %v2843_v50 = vpop.f32.mrf.mxu2  ;;  %v2635_v9 = vadd.f32 %v2634_v45, %v4645_v44 }
 0x33f   : > { %v2844_v41 = vadd.f32 %v2843_v50, %v2733_v58 }
 0x341   : > { %v2927_v51 = vadd.f32 %v2926_v48, %v2844_v41  ;;  %v2930_v27 = vpop.f32.mrf.mxu3 }
 0x343   : > { %v3038_v11 = vmul.f32 %v2927_v51, %v837_v38 }
 0x344   : > { %v2639_v63 = vpop.f32.mrf.mxu0  ;;  %v2738_v60 = vpop.f32.mrf.mxu1 }
 0x345   : > { %3216 = vst [vmem:[%s4197_s5 + $0x58] sm:$0xff] %v3038_v11  ;;  %v2739_v30 = vadd.f32 %v2738_v60, %v2635_v9  ;;  %v2847_v18 = vpop.f32.mrf.mxu2  ;;  %v2640_v47 = vadd.f32 %v2639_v63, %v4654_v55 }
 0x347   : > { %v2848_v62 = vadd.f32 %v2847_v18, %v2739_v30 }
 0x349   : > { %v2931_v15 = vadd.f32 %v2930_v27, %v2848_v62  ;;  %v2934_v37 = vpop.f32.mrf.mxu3 }
 0x34b   : > { %v3069_v42 = vmul.f32 %v2931_v15, %v4964_v31 }
 0x34c   : > { %v2644_v52 = vpop.f32.mrf.mxu0  ;;  %v2744_v4 = vpop.f32.mrf.mxu1 }
 0x34d   : > { %3221 = vst [vmem:[%s4197_s5 + $0x80] sm:$0xff] %v3069_v42  ;;  %v2745_v43 = vadd.f32 %v2744_v4, %v2640_v47  ;;  %v2851_v5 = vpop.f32.mrf.mxu2  ;;  %v2645_v14 = vadd.f32 %v2644_v52, %v4663_v3 }
 0x34f   : > { %v2852_v44 = vadd.f32 %v2851_v5, %v2745_v43 }
 0x351   : > { %v2935_v56 = vadd.f32 %v2934_v37, %v2852_v44  ;;  %v2938_v40 = vpop.f32.mrf.mxu3 }
 0x353   : > { %v3070_v39 = vmul.f32 %v2935_v56, %v4965_v7 }
 0x354   : > { %v2649_v59 = vpop.f32.mrf.mxu0  ;;  %v2750_v26 = vpop.f32.mrf.mxu1 }
 0x355   : > { %3222 = vst [vmem:[%s4197_s5 + $0x88] sm:$0xff] %v3070_v39  ;;  %v2751_v8 = vadd.f32 %v2750_v26, %v2645_v14  ;;  %v2855_v55 = vpop.f32.mrf.mxu2  ;;  %v2650_v36 = vadd.f32 %v2649_v59, %v4672_v2 }
 0x357   : > { %v2856_v46 = vadd.f32 %v2855_v55, %v2751_v8 }
 0x359   : > { %v2939_v29 = vadd.f32 %v2938_v40, %v2856_v46  ;;  %v2942_v0 = vpop.f32.mrf.mxu3 }
 0x35b   : > { %v3071_v61 = vmul.f32 %v2939_v29, %v4502_v17 }
 0x35c   : > { %v2654_v10 = vpop.f32.mrf.mxu0  ;;  %v2756_v13 = vpop.f32.mrf.mxu1 }
 0x35d   : > { %3223 = vst [vmem:[%s4197_s5 + $0x90] sm:$0xff] %v3071_v61  ;;  %v2757_v53 = vadd.f32 %v2756_v13, %v2650_v36  ;;  %v2859_v3 = vpop.f32.mrf.mxu2  ;;  %v2655_v48 = vadd.f32 %v2654_v10, %v4680_v23 }
 0x35f   : > { %v2860_v54 = vadd.f32 %v2859_v3, %v2757_v53 }
 0x361   : > { %v2943_v34 = vadd.f32 %v2942_v0, %v2860_v54  ;;  %v2946_v24 = vpop.f32.mrf.mxu3 }
 0x363   : > { %v3072_v19 = vmul.f32 %v2943_v34, %v4509_v33 }
 0x364   : > { %v2659_v57 = vpop.f32.mrf.mxu0  ;;  %v2762_v45 = vpop.f32.mrf.mxu1 }
 0x365   : > { %3224 = vst [vmem:[%s4197_s5 + $0x98] sm:$0xff] %v3072_v19  ;;  %v2763_v1 = vadd.f32 %v2762_v45, %v2655_v48  ;;  %v2863_v2 = vpop.f32.mrf.mxu2  ;;  %v2660_v25 = vadd.f32 %v2659_v57, %v4686_v32 }
 0x367   : > { %v2864_v58 = vadd.f32 %v2863_v2, %v2763_v1 }
 0x369   : > { %v2947_v17 = vadd.f32 %v2946_v24, %v2864_v58  ;;  %v2950_v50 = vpop.f32.mrf.mxu3 }
 0x36b   : > { %v3086_v35 = vmul.f32 %v2947_v17, %v4706_v22 }
 0x36c   : > { %v2664_v49 = vpop.f32.mrf.mxu0  ;;  %v2768_v41 = vpop.f32.mrf.mxu1 }
 0x36d   : > { %3225 = vst [vmem:[%s4197_s5 + $0xa0] sm:$0xff] %v3086_v35  ;;  %v2769_v23 = vadd.f32 %v2768_v41, %v2660_v25  ;;  %v2867_v6 = vpop.f32.mrf.mxu2  ;;  %v2665_v27 = vadd.f32 %v2664_v49, %v4692_v16 }
 0x36f   : > { %v2868_v33 = vadd.f32 %v2867_v6, %v2769_v23 }
 0x371   : > { %v2951_v38 = vadd.f32 %v2950_v50, %v2868_v33  ;;  %v2954_v51 = vpop.f32.mrf.mxu3 }
 0x373   : > { %v3087_v9 = vmul.f32 %v2951_v38, %v4713_v28 }
 0x374   : > { %v2669_v11 = vpop.f32.mrf.mxu0  ;;  %v2774_v63 = vpop.f32.mrf.mxu1 }
 0x375   : > { %3226 = vst [vmem:[%s4197_s5 + $0xa8] sm:$0xff] %v3087_v9  ;;  %v2775_v32 = vadd.f32 %v2774_v63, %v2665_v27  ;;  %v2871_v22 = vpop.f32.mrf.mxu2  ;;  %v2670_v62 = vadd.f32 %v2669_v11, %v4699_v21 }
 0x377   : > { %v2872_v60 = vadd.f32 %v2871_v22, %v2775_v32 }
 0x379   : > { %v2955_v30 = vadd.f32 %v2954_v51, %v2872_v60  ;;  %v2958_v18 = vpop.f32.mrf.mxu3 }
 0x37b   : > { %v3088_v15 = vmul.f32 %v2955_v30, %v4720_v12 }
 0x37c   : > { %v2780_v37 = vpop.f32.mrf.mxu1  ;;  %v2674_v16 = vpop.f32.mrf.mxu0 }
 0x37d   : > { %3227 = vst [vmem:[%s4197_s5 + $0xb0] sm:$0xff] %v3088_v15  ;;  %v2781_v28 = vadd.f32 %v2780_v37, %v2670_v62  ;;  %v2875_v47 = vpop.f32.mrf.mxu2 }
 0x37f   : > { %v2876_v31 = vadd.f32 %v2875_v47, %v2781_v28 }
 0x381   : > { %v2959_v42 = vadd.f32 %v2958_v18, %v2876_v31  ;;  %v2962_v52 = vpop.f32.mrf.mxu3 }
 0x383   : > { %v3089_v21 = vmul.f32 %v2959_v42, %v4726_v20 }
 0x384   : > { %v2786_v12 = vpop.f32.mrf.mxu1  ;;  %v2679_v4 = vpop.f32.mrf.mxu0 }
 0x385   : > { %3228 = vst [vmem:[%s4197_s5 + $0xb8] sm:$0xff] %v3089_v21  ;;  %v2879_v43 = vpop.f32.mrf.mxu2 }
 0x386   : > { %3308 = shalt.err (!%p3305_p3)
}
 0x387   : > { %s3347_s28 = smov 128   ;;  %s3348_s5 = smov 256  }
 0x388   : > { %s3349_s7 = smov 8  }
 0x389   : > { %3233 = dma.vmem_to_hbm [thread:$0]  (%p3403_p5), %s3108_s23, 3072, %s3110_s24, %s3096_s13, %s3347_s28, %s3348_s5, %s3349_s7   ;;  %v2966_v20 = vpop.f32.mrf.mxu3 }
 0x38c   : > { %v2792_v5 = vpop.f32.mrf.mxu1  ;;  %v2684_v44 = vpop.f32.mrf.mxu0 }
 0x38d   : > { %v2883_v56 = vpop.f32.mrf.mxu2 }
 0x391   : > { %v2970_v40 = vpop.f32.mrf.mxu3 }
 0x394   : > { %v2798_v14 = vpop.f32.mrf.mxu1  ;;  %v2689_v7 = vpop.f32.mrf.mxu0 }
 0x395   : > { %v2887_v39 = vpop.f32.mrf.mxu2 }
 0x399   : > { %v2974_v59 = vpop.f32.mrf.mxu3 }
 0x39c   : > { %v2804_v26 = vpop.f32.mrf.mxu1 }
 0x39d   : > { %v2891_v8 = vpop.f32.mrf.mxu2 }
 0x39e PF: > { %p3239_p4 = scmp.ge.s32.totalorder %s3343_s12, 2  ;;  %s3124_s8 = sand.u32 1, %s3331_s9  }
 0x39f   : > { %s3125_s19 = scalar_lea.sflag [#allocation4], %s3124_s8 }
 0x3a0   : > { %p3236_p7 = pnand %p3239_p4, %p3407_p6 }
 0x3a2   : > { %p3237_p5 = pneg %p3236_p7 }
 0x3a4   : > { %3326 = dma.done.wait (%p3237_p5), %s3125_s19, 3072  }
 0x3a5   : > { %3328 = vsyncadd (%p3237_p5), %s3125_s19, 4294964224  ;;  %p12_p8 = scmp.ge.s32.totalorder %s3390_s15, 4   ;;  %s4966_s9 = smov %s3335_s10 }
 0x3a6   : > { %s4967_s10 = smov %s3339_s11  ;;  %s4968_s11 = smov %s3401_s18 }
 0x3a7   : > { %s4969_s12 = smov %s3390_s15  ;;  %14 = sbr.rel (!%p12_p8) target bundleno = 3 (0x3), region = 71 }
 0x3ac   :  { %3131 = vsyncpa [#allocation4], 1 }
 0x3ad   :  { %3133 = vsyncpa [#allocation4 + $0x1], 1 }

// kernel: tpu_custom_call.1
= control target key start
LH: loop header
LB: loop body
LE: loop exit
PB: predicated region body
PF: predicated region fallthrough
CT: control target
= control target key end

     0   :  { %7 = vsyncpa [#allocation4], 0  ;;  %s4807_s0 = inlined_call_operand.vmem [shape: s32[4,256], index: 0, kind: input, shape index: {}]   ;;  %s4808_s1 = inlined_call_operand.vmem [shape: f32[128,16], index: 1, kind: input, shape index: {}]   ;;  %s4809_s2 = inlined_call_operand.hbm [shape: f32[6,32,256], index: 2, kind: output, shape index: {}]  }
   0x1   :  { %9 = vsyncpa [#allocation4 + $0x1], 0  ;;  %s3365_s9 = smov 0   ;;  %s3367_s10 = smov 0  }
   0x2   :  { %s3369_s11 = smov 0   ;;  %s3371_s12 = smov 0  }
   0x3 LB: > { %s3386_s13 = sadd.s32 4294967295, %s3343_s12   ;;  %s3172_s14 = sadd.s32 4294967294, %s3343_s12   ;;  %s3343_s12 = sphi %s3371_s12, %s4969_s12   ;;  %s3339_s11 = sphi %s3369_s11, %s4968_s11   ;;  %s3335_s10 = sphi %s3367_s10, %s4967_s10   ;;  %s3331_s9 = sphi %s3365_s9, %s4966_s9  }
   0x4   : > { %s3390_s15 = sadd.s32 1, %s3343_s12   ;;  %s69_s16 = sadd.s32 1, %s3339_s11 }
   0x5   : > { %s66_s17 = ssub.s32 %s3343_s12, %s3390_s15  ;;  %p79_p0 = scmp.ne.s32.totalorder %s3339_s11, %s3335_s10 }
   0x6   : > { %p67_p1 = scmp.eq.s32.totalorder %s66_s17, 0  ;;  %p80_p2 = scmp.eq.s32.totalorder %s3386_s13, 1 }
   0x7   : > { %p85_p3 = scmp.ne.s32.totalorder %s3335_s10, %s3331_s9  ;;  %p86_p4 = scmp.eq.s32.totalorder %s3172_s14, 1 }
   0x8   : > { %s3401_s18 = scalar_select %p67_p1, %s3339_s11, %s69_s16  }
   0x9   : > { %p3403_p5 = por %p80_p2, %p79_p0  ;;  %p3407_p6 = por %p86_p4, %p85_p3 }
   0xa   : > { %p3175_p7 = scmp.ge.s32.totalorder %s3343_s12, 1  ;;  %p114_p8 = scmp.lt.s32.totalorder %s3343_s12, 3 }
   0xc   : > { %p115_p9 = pnand %p3175_p7, %p114_p8 }
   0xe   : > { %118 = sbr.rel (%p115_p9) target bundleno = 926 (0x39e), region = 28 }
  0x13   : > { %p135_p10 = scmp.lt.s32.totalorder %s3386_s13, 1  ;;  %v140_v0 = vlaneseq  ;;  %v150_v1 = vld [vmem:[%s4808_s1] sm:$0xff]  ;;  %vm166_vm0 = vcmask 130048   ;;  %v151_v2 = vld [vmem:[%s4808_s1 + $0x8] sm:$0xff]  ;;  %v152_v8 = vld [vmem:[%s4808_s1 + $0x10] sm:$0xff]  ;;  %v4810_v18 = vmov 1.0  }
  0x14   : > { %v168_v3 = vsel %vm166_vm0, %v150_v1, 0  ;;  %v171_v4 = vsel %vm166_vm0, %v151_v2, 0  ;;  %v174_v12 = vsel %vm166_vm0, %v152_v8, 0  ;;  %v4812_v20 = vmov 0.0   ;;  %v153_v28 = vld [vmem:[%s4808_s1 + $0x18] sm:$0xff]  ;;  %v154_v44 = vld [vmem:[%s4808_s1 + $0x20] sm:$0xff] }
  0x15   : > { %s136_s25 = scalar_select %p135_p10, %s3386_s13, 1  ;;  %v3423_v5 = vshrl.u32 %v140_v0, 7  ;;  %v3425_v6 = vand.u32 4294901760, %v168_v3  ;;  %v3427_v7 = vand.u32 4294901760, %v171_v4  ;;  %v3459_v17 = vand.u32 4294901760, %v174_v12  ;;  %v155_v51 = vld [vmem:[%s4808_s1 + $0x28] sm:$0xff] }
  0x16   : > { %v177_v36 = vsel %vm166_vm0, %v153_v28, 0  ;;  %v180_v47 = vsel %vm166_vm0, %v154_v44, 0  ;;  %v183_v54 = vsel %vm166_vm0, %v155_v51, 0  ;;  %v156_v58 = vld [vmem:[%s4808_s1 + $0x30] sm:$0xff]  ;;  %v157_v1 = vld [vmem:[%s4808_s1 + $0x38] sm:$0xff]  ;;  %s3229_s17 = sshll.u32 %s3386_s13, 3 }
  0x17   : > { %s3176_s28 = sshll.u32 %s136_s25, 2  ;;  %v3433_v9 = vadd.s32 8, %v3423_v5  ;;  %v3436_v10 = vsub.f32 %v168_v3, %v3425_v6  ;;  %v3439_v11 = vsub.f32 %v171_v4, %v3427_v7  ;;  %v3500_v33 = vsub.f32 %v174_v12, %v3459_v17  ;;  %v160_v44 = vld [vmem:[%s4808_s1 + $0x50] sm:$0xff]  ;;  %s3301_s30 = scalar_lea.hbm %s4809_s2, 384 }
  0x18   : > { %s3444_s3 = scalar_lea.vmem %s4807_s0, %s3176_s28  ;;  %v3516_v43 = vand.u32 4294901760, %v177_v36  ;;  %v3543_v50 = vand.u32 4294901760, %v180_v47  ;;  %v3567_v57 = vand.u32 4294901760, %v183_v54  ;;  %v186_v61 = vsel %vm166_vm0, %v156_v58, 0  ;;  %v161_v58 = vld [vmem:[%s4808_s1 + $0x58] sm:$0xff]  ;;  %s132_s28 = sand.u32 1, %s3335_s10  }
  0x19   : > { %v3277_v13 = vld [vmem:[%s3444_s3] ss:$0 sm:$0xff]  ;;  %v3449_v14 = vand.u32 4294901760, %v3436_v10  ;;  %v3452_v15 = vld [vmem:[%s3444_s3 + $0x1] ss:$0 sm:$0xff]  ;;  %v3457_v16 = vand.u32 4294901760, %v3439_v11 }
  0x1a   : > { %vm145_vm1 = vcmp.eq.s32.totalorder %v3433_v9, %v3277_v13  ;;  %vm144_vm2 = vcmp.eq.s32.totalorder %v3423_v5, %v3277_v13  ;;  %vm858_vm3 = vcmp.eq.s32.totalorder %v3433_v9, %v3452_v15  ;;  %v3514_v42 = vand.u32 4294901760, %v3500_v33  ;;  %s3232_s4 = smul.u32 192, %s132_s28  ;;  %s3096_s13 = scalar_lea.sflag [#allocation4], %s132_s28 }
  0x1b   : > { %3179 = vmatpush.msk.msra.mxu0 %vm145_vm1, %v4810_v18  ;;  %v236_v19 = vsub.f32 %v3436_v10, %v3449_v14  ;;  %v3178_v21 = vsel %vm145_vm1, 1.0, %v4812_v20  ;;  %3181 = vmatpush.msk.msra.mxu3 %vm145_vm1, %v4810_v18  ;;  %v3177_v22 = vsel %vm144_vm2, 1.0, %v4812_v20  ;;  %v3186_v25 = vsel %vm858_vm3, 1.0, %v4812_v20 }
  0x1c   : > { %v377_v23 = vsub.f32 %v3178_v21, %v3178_v21  ;;  %v383_v24 = vsub.f32 %v3177_v22, %v3177_v22  ;;  %v3489_v27 = vsub.f32 %v3186_v25, %v3186_v25  ;;  %v244_v32 = vsub.f32 %v3439_v11, %v3457_v16  ;;  %v158_v22 = vld [vmem:[%s4808_s1 + $0x40] sm:$0xff]  ;;  %s4197_s5 = scalar_lea.vmem [#allocation3], %s3232_s4 }
  0x1d   : > { %3180 = vmatpush.msk.msra.mxu0 %vm144_vm2, %v4810_v18  ;;  %v3484_v26 = vand.u32 4294901760, %v236_v19  ;;  %3182 = vmatpush.msk.msra.mxu3 %vm144_vm2, %v4810_v18  ;;  %v252_v45 = vsub.f32 %v3500_v33, %v3514_v42  ;;  %v3528_v46 = vsub.f32 %v177_v36, %v3516_v43  ;;  %v3558_v53 = vsub.f32 %v180_v47, %v3543_v50  ;;  %s3107_s23 = sshll.u32 %s4197_s5, 4  ;;  %s3108_s23 = int_to_ptr.vmem [resolvable:$true] %s3107_s23 }
  0x1e   : > { %469 = vmatpush.msra.mxu2 %v377_v23  ;;  %v378_v29 = vand.u32 4294901760, %v377_v23  ;;  %575 = vmatmul.f32.vlgmr.msra.gmra.mxu3 %v3449_v14  ;;  %v384_v30 = vand.u32 4294901760, %v383_v24  ;;  %v1090_v31 = vand.u32 4294901760, %v3489_v27  ;;  %v3511_v41 = vand.u32 4294901760, %v244_v32 }
  0x1f   : > { %238 = vmatmul.f32.vlgmr.msra.gmra.mxu0 %v3484_v26  ;;  %v3538_v48 = vand.u32 4294901760, %v252_v45  ;;  %v3541_v49 = vand.u32 4294901760, %v3528_v46  ;;  %v3565_v56 = vand.u32 4294901760, %v3558_v53  ;;  %v3578_v60 = vsub.f32 %v183_v54, %v3567_v57 }
  0x20   : > { %472 = vmatpush.msra.mxu2 %v383_v24  ;;  %v379_v34 = vsub.f32 %v377_v23, %v378_v29  ;;  %v385_v35 = vsub.f32 %v383_v24, %v384_v30  ;;  %686 = vmatpush.msrb.mxu0 %v378_v29  ;;  %v1091_v37 = vsub.f32 %v3489_v27, %v1090_v31  ;;  %v3587_v0 = vand.u32 4294901760, %v186_v61 }
  0x21   : > { %475 = vmatmul.f32.vlgmr.msra.gmra.mxu2 %v3436_v10  ;;  %v260_v52 = vsub.f32 %v3528_v46, %v3541_v49  ;;  %v268_v59 = vsub.f32 %v3558_v53, %v3565_v56  ;;  %v3585_v63 = vand.u32 4294901760, %v3578_v60  ;;  %v189_v4 = vsel %vm166_vm0, %v157_v1, 0 }
  0x22   : > { %v380_v38 = vand.u32 4294901760, %v379_v34  ;;  %3187 = vmatpush.msk.msrb.mxu2 %vm858_vm3, %v4810_v18  ;;  %v386_v39 = vand.u32 4294901760, %v385_v35  ;;  %690 = vmatpush.msrb.mxu0 %v384_v30  ;;  %v1092_v40 = vand.u32 4294901760, %v1091_v37  ;;  %v3598_v3 = vsub.f32 %v186_v61, %v3587_v0  ;;  %v159_v34 = vld [vmem:[%s4808_s1 + $0x48] sm:$0xff] }
  0x23   : > { %v3562_v55 = vand.u32 4294901760, %v260_v52  ;;  %v3582_v62 = vand.u32 4294901760, %v268_v59  ;;  %v276_v2 = vsub.f32 %v3578_v60, %v3585_v63  ;;  %vm857_vm4 = vcmp.eq.s32.totalorder %v3423_v5, %v3452_v15 }
  0x24   : > { %1181 = vmatpush.msra.mxu0 %v3489_v27  ;;  %381 = vmatpush.msra.mxu1 %v380_v38  ;;  %v3185_v8 = vsel %vm857_vm4, 1.0, %v4812_v20  ;;  %v3619_v13 = vand.u32 4294901760, %v3598_v3  ;;  %v3621_v19 = vand.u32 4294901760, %v189_v4  ;;  %v192_v28 = vsel %vm166_vm0, %v158_v22, 0 }
  0x25   : > { %1093 = vmatpush.msrb.mxu3 %v1092_v40  ;;  %3188 = vmatpush.msk.msrb.mxu2 %vm857_vm4, %v4810_v18  ;;  %v3616_v12 = vand.u32 4294901760, %v276_v2  ;;  %v1095_v21 = vsub.f32 %v3185_v8, %v3185_v8  ;;  %v3643_v32 = vand.u32 4294901760, %v192_v28  ;;  %v195_v37 = vsel %vm166_vm0, %v159_v34, 0  ;;  %v163_v34 = vld [vmem:[%s4808_s1 + $0x68] sm:$0xff] }
  0x26   : > { %387 = vmatpush.msra.mxu1 %v386_v39  ;;  %581 = vmatmul.f32.gmra.mxu3 %v3457_v16  ;;  %v284_v24 = vsub.f32 %v3598_v3, %v3619_v13  ;;  %v3634_v25 = vsub.f32 %v189_v4, %v3621_v19  ;;  %v3671_v40 = vand.u32 4294901760, %v195_v37  ;;  %v198_v47 = vsel %vm166_vm0, %v160_v44, 0 }
  0x27   : > { %246 = vmatmul.f32.gmra.mxu0 %v3511_v41  ;;  %389 = vmatmul.f32.vlgmr.msra.gmra.mxu1 %v3425_v6  ;;  %v1096_v23 = vand.u32 4294901760, %v1095_v21  ;;  %v3658_v36 = vsub.f32 %v192_v28, %v3643_v32  ;;  %v3691_v54 = vand.u32 4294901760, %v198_v47  ;;  %v201_v1 = vsel %vm166_vm0, %v161_v58, 0 }
  0x28   : > { %3183 = vmatpush.msk.msrb.mxu1 %vm145_vm1, %v4810_v18  ;;  %1398 = vmatpush.msra.mxu2 %v1090_v31  ;;  %v3638_v30 = vand.u32 4294901760, %v284_v24  ;;  %v3641_v31 = vand.u32 4294901760, %v3634_v25  ;;  %v3682_v45 = vsub.f32 %v195_v37, %v3671_v40  ;;  %v3711_v8 = vand.u32 4294901760, %v201_v1 }
  0x29   : > { %480 = vmatmul.f32.gmra.mxu2 %v3439_v11  ;;  %1184 = vmatpush.msra.mxu0 %v1095_v21  ;;  %v1097_v27 = vsub.f32 %v1095_v21, %v1096_v23  ;;  %v3669_v39 = vand.u32 4294901760, %v3658_v36  ;;  %v3702_v61 = vsub.f32 %v198_v47, %v3691_v54  ;;  %v162_v21 = vld [vmem:[%s4808_s1 + $0x60] sm:$0xff]  ;;  %v207_v44 = vsel %vm166_vm0, %v163_v34, 0 }
  0x2a   : > { %3184 = vmatpush.msk.msrb.mxu1 %vm144_vm2, %v4810_v18  ;;  %1402 = vmatpush.msra.mxu2 %v1096_v23  ;;  %v292_v35 = vsub.f32 %v3634_v25, %v3641_v31  ;;  %v3689_v52 = vand.u32 4294901760, %v3682_v45  ;;  %v3722_v23 = vsub.f32 %v201_v1, %v3711_v8  ;;  %v204_v24 = vsel %vm166_vm0, %v162_v21, 0 }
  0x2b   : > { %v1098_v29 = vand.u32 4294901760, %v1097_v27  ;;  %v300_v15 = vsub.f32 %v3658_v36, %v3669_v39  ;;  %v3709_v4 = vand.u32 4294901760, %v3702_v61  ;;  %v3751_v58 = vand.u32 4294901760, %v207_v44 }
  0x2c   : > { %3189 = vmatpush.msk.msra.mxu1 %vm858_vm3, %v4810_v18  ;;  %v3666_v38 = vand.u32 4294901760, %v292_v35  ;;  %v308_v59 = vsub.f32 %v3682_v45, %v3689_v52  ;;  %v3729_v28 = vand.u32 4294901760, %v3722_v23 }
  0x2d   : > { %1099 = vmatpush.msrb.mxu3 %v1098_v29  ;;  %v3686_v51 = vand.u32 4294901760, %v300_v15  ;;  %4850 = vst [vmem:[#allocation6_spill] sm:$0xff] %v3709_v4  ;;  %v316_v22 = vsub.f32 %v3702_v61, %v3709_v4  ;;  %v3731_v29 = vand.u32 4294901760, %v204_v24  ;;  %v3762_v21 = vsub.f32 %v207_v44, %v3751_v58 }
  0x2e   : > { %587 = vmatmul.f32.gmra.mxu3 %v3514_v42  ;;  %3190 = vmatpush.msk.msra.mxu1 %vm857_vm4, %v4810_v18  ;;  %v3706_v2 = vand.u32 4294901760, %v308_v59  ;;  %4851 = vst [vmem:[#allocation7_spill] sm:$0xff] %v3729_v28  ;;  %v324_v35 = vsub.f32 %v3722_v23, %v3729_v28  ;;  %v164_v59 = vld [vmem:[%s4808_s1 + $0x70] sm:$0xff] }
  0x2f   : > { %254 = vmatmul.f32.gmra.mxu0 %v3538_v48  ;;  %393 = vmatmul.f32.gmra.mxu1 %v3427_v7  ;;  %v3726_v27 = vand.u32 4294901760, %v316_v22  ;;  %v3742_v37 = vsub.f32 %v204_v24, %v3731_v29  ;;  %4854 = vst [vmem:[#allocation10_spill] sm:$0xff] %v3762_v21  ;;  %v210_v22 = vsel %vm166_vm0, %v164_v59, 0  ;;  %v3769_v34 = vand.u32 4294901760, %v3762_v21 }
  0x30   : > { %3191 = vmatpush.msk.msra.mxu3 %vm858_vm3, %v4810_v18  ;;  %v3746_v15 = vand.u32 4294901760, %v324_v35  ;;  %v3771_v35 = vand.u32 4294901760, %v210_v22 }
  0x31   : > { %485 = vmatmul.f32.gmra.mxu2 %v3500_v33  ;;  %4852 = vst [vmem:[#allocation8_spill] sm:$0xff] %v3742_v37  ;;  %v3749_v47 = vand.u32 4294901760, %v3742_v37  ;;  %v340_v44 = vsub.f32 %v3762_v21, %v3769_v34 }
  0x32   : > { %3192 = vmatpush.msk.msra.mxu3 %vm857_vm4, %v4810_v18  ;;  %4855 = vst [vmem:[#allocation11_spill] sm:$0xff] %v3769_v34  ;;  %v165_v18 = vld [vmem:[%s4808_s1 + $0x78] sm:$0xff]  ;;  %v3782_v59 = vsub.f32 %v210_v22, %v3771_v35 }
  0x33   : > { %4853 = vst [vmem:[#allocation9_spill] sm:$0xff] %v3749_v47  ;;  %v332_v1 = vsub.f32 %v3742_v37, %v3749_v47  ;;  %v3786_v20 = vand.u32 4294901760, %v340_v44 }
  0x34   : > { %4856 = vst [vmem:[#allocation12_spill] sm:$0xff] %v3782_v59 }
  0x35   : > { %v3766_v24 = vand.u32 4294901760, %v332_v1  ;;  %v213_v1 = vsel %vm166_vm0, %v165_v18, 0 }
  0x36   : > { %593 = vmatmul.f32.gmra.mxu3 %v3541_v49 }
  0x37   : > { %262 = vmatmul.f32.gmra.mxu0 %v3562_v55  ;;  %397 = vmatmul.f32.gmra.mxu1 %v3459_v17 }
  0x39   : > { %490 = vmatmul.f32.gmra.mxu2 %v3528_v46 }
  0x3e   : > { %599 = vmatmul.f32.gmra.mxu3 %v3565_v56 }
  0x3f   : > { %270 = vmatmul.f32.gmra.mxu0 %v3582_v62  ;;  %401 = vmatmul.f32.gmra.mxu1 %v3516_v43 }
  0x41   : > { %495 = vmatmul.f32.gmra.mxu2 %v3558_v53 }
  0x46   : > { %605 = vmatmul.f32.gmra.mxu3 %v3585_v63 }
  0x47   : > { %278 = vmatmul.f32.gmra.mxu0 %v3616_v12  ;;  %405 = vmatmul.f32.gmra.mxu1 %v3543_v50 }
  0x49   : > { %500 = vmatmul.f32.gmra.mxu2 %v3578_v60 }
  0x4e   : > { %611 = vmatmul.f32.gmra.mxu3 %v3619_v13 }
  0x4f   : > { %286 = vmatmul.f32.gmra.mxu0 %v3638_v30  ;;  %409 = vmatmul.f32.gmra.mxu1 %v3567_v57 }
  0x51   : > { %505 = vmatmul.f32.gmra.mxu2 %v3598_v3 }
  0x56   : > { %617 = vmatmul.f32.gmra.mxu3 %v3641_v31 }
  0x57   : > { %294 = vmatmul.f32.gmra.mxu0 %v3666_v38  ;;  %413 = vmatmul.f32.gmra.mxu1 %v3587_v0 }
  0x59   : > { %510 = vmatmul.f32.gmra.mxu2 %v3634_v25 }
  0x5e   : > { %623 = vmatmul.f32.gmra.mxu3 %v3669_v39 }
  0x5f   : > { %302 = vmatmul.f32.gmra.mxu0 %v3686_v51  ;;  %417 = vmatmul.f32.gmra.mxu1 %v3621_v19 }
  0x61   : > { %515 = vmatmul.f32.gmra.mxu2 %v3658_v36 }
  0x66   : > { %629 = vmatmul.f32.gmra.mxu3 %v3689_v52 }
  0x67   : > { %310 = vmatmul.f32.gmra.mxu0 %v3706_v2  ;;  %421 = vmatmul.f32.gmra.mxu1 %v3643_v32 }
  0x69   : > { %520 = vmatmul.f32.gmra.mxu2 %v3682_v45 }
  0x6e   : > { %635 = vmatmul.f32.gmra.mxu3 %v3709_v4 }
  0x6f   : > { %318 = vmatmul.f32.gmra.mxu0 %v3726_v27  ;;  %425 = vmatmul.f32.gmra.mxu1 %v3671_v40 }
  0x71   : > { %525 = vmatmul.f32.gmra.mxu2 %v3702_v61 }
  0x76   : > { %641 = vmatmul.f32.gmra.mxu3 %v3729_v28  ;;  %v3789_v28 = vand.u32 4294901760, %v3782_v59 }
  0x77   : > { %326 = vmatmul.f32.gmra.mxu0 %v3746_v15  ;;  %429 = vmatmul.f32.gmra.mxu1 %v3691_v54 }
  0x78   : > { %4857 = vst [vmem:[#allocation13_spill] sm:$0xff] %v3789_v28  ;;  %v348_v22 = vsub.f32 %v3782_v59, %v3789_v28 }
  0x79   : > { %530 = vmatmul.f32.gmra.mxu2 %v3722_v23 }
  0x7a   : > { %v3802_v44 = vand.u32 4294901760, %v348_v22 }
  0x7e   : > { %647 = vmatmul.f32.gmra.mxu3 %v3749_v47  ;;  %v3791_v47 = vand.u32 4294901760, %v213_v1 }
  0x7f   : > { %334 = vmatmul.f32.gmra.mxu0 %v3766_v24  ;;  %433 = vmatmul.f32.gmra.mxu1 %v3711_v8 }
  0x80   : > { %v3799_v18 = vsub.f32 %v213_v1, %v3791_v47 }
  0x81   : > { %535 = vmatmul.f32.gmra.mxu2 %v3742_v37 }
  0x82   : > { %4858 = vst [vmem:[#allocation14_spill] sm:$0xff] %v3799_v18  ;;  %v3805_v37 = vand.u32 4294901760, %v3799_v18 }
  0x84   : > { %4859 = vst [vmem:[#allocation15_spill] sm:$0xff] %v3805_v37 }
  0x86   : > { %653 = vmatmul.f32.gmra.mxu3 %v3769_v34  ;;  %v356_v34 = vsub.f32 %v3799_v18, %v3805_v37 }
  0x87   : > { %342 = vmatmul.f32.gmra.mxu0 %v3786_v20  ;;  %437 = vmatmul.f32.gmra.mxu1 %v3731_v29 }
  0x88   : > { %v3813_v1 = vand.u32 4294901760, %v356_v34 }
  0x89   : > { %540 = vmatmul.f32.gmra.mxu2 %v3762_v21 }
  0x8e   : > { %659 = vmatmul.f32.gmra.mxu3 %v3789_v28 }
  0x8f   : > { %350 = vmatmul.f32.gmra.mxu0 %v3802_v44  ;;  %441 = vmatmul.f32.gmra.mxu1 %v3751_v58 }
  0x91   : > { %545 = vmatmul.f32.gmra.mxu2 %v3782_v59 }
  0x96   : > { %665 = vmatmul.f32.gmra.mxu3 %v3805_v37 }
  0x97   : > { %358 = vmatmul.f32.gmra.mxu0 %v3813_v1  ;;  %445 = vmatmul.f32.gmra.mxu1 %v3771_v35 }
  0x99   : > { %550 = vmatmul.f32.gmra.mxu2 %v3799_v18 }
  0x9c   : > { %v239_v22 = vpop.f32.mrf.mxu0 }
  0x9e   : > { %1101 = vmatmul.f32.vlgmr.msrb.gmra.mxu3 %v3425_v6 }
  0x9f   : > { %692 = vmatmul.f32.vlgmr.msrb.gmra.mxu0 %v3425_v6  ;;  %449 = vmatmul.f32.gmra.mxu1 %v3791_v47 }
  0xa1   : > { %950 = vmatmul.f32.vlgmr.msrb.gmra.mxu2 %v3484_v26  ;;  %v576_v28 = vpop.f32.mrf.mxu3 }
  0xa4   : > { %v247_v34 = vpop.f32.mrf.mxu0  ;;  %v390_v59 = vpop.f32.mrf.mxu1 }
  0xa5   : > { %v476_v21 = vpop.f32.mrf.mxu2 }
  0xa6   : > { %1105 = vmatmul.f32.gmra.mxu3 %v3427_v7 }
  0xa7   : > { %696 = vmatmul.f32.gmra.mxu0 %v3427_v7  ;;  %775 = vmatmul.f32.vlgmr.msrb.gmra.mxu1 %v3425_v6 }
  0xa9   : > { %958 = vmatmul.f32.gmra.mxu2 %v3511_v41  ;;  %v582_v22 = vpop.f32.mrf.mxu3 }
  0xac   : > { %v255_v37 = vpop.f32.mrf.mxu0  ;;  %v394_v18 = vpop.f32.mrf.mxu1 }
  0xad   : > { %v481_v4 = vpop.f32.mrf.mxu2 }
  0xae   : > { %1109 = vmatmul.f32.gmra.mxu3 %v3459_v17 }
  0xaf   : > { %700 = vmatmul.f32.gmra.mxu0 %v3459_v17  ;;  %779 = vmatmul.f32.gmra.mxu1 %v3427_v7 }
  0xb1   : > { %966 = vmatmul.f32.gmra.mxu2 %v3538_v48  ;;  %v588_v26 = vpop.f32.mrf.mxu3 }
  0xb4   : > { %v263_v28 = vpop.f32.mrf.mxu0  ;;  %v398_v21 = vpop.f32.mrf.mxu1 }
  0xb5   : > { %v486_v59 = vpop.f32.mrf.mxu2 }
  0xb6   : > { %1113 = vmatmul.f32.gmra.mxu3 %v3516_v43 }
  0xb7   : > { %704 = vmatmul.f32.gmra.mxu0 %v3516_v43  ;;  %783 = vmatmul.f32.gmra.mxu1 %v3459_v17 }
  0xb9   : > { %974 = vmatmul.f32.gmra.mxu2 %v3562_v55  ;;  %v594_v41 = vpop.f32.mrf.mxu3 }
  0xbc   : > { %v271_v4 = vpop.f32.mrf.mxu0  ;;  %v402_v37 = vpop.f32.mrf.mxu1 }
  0xbd   : > { %v491_v18 = vpop.f32.mrf.mxu2 }
  0xbe   : > { %1117 = vmatmul.f32.gmra.mxu3 %v3543_v50 }
  0xbf   : > { %708 = vmatmul.f32.gmra.mxu0 %v3543_v50  ;;  %787 = vmatmul.f32.gmra.mxu1 %v3516_v43 }
  0xc1   : > { %982 = vmatmul.f32.gmra.mxu2 %v3582_v62  ;;  %v600_v48 = vpop.f32.mrf.mxu3 }
  0xc4   : > { %v279_v34 = vpop.f32.mrf.mxu0  ;;  %v406_v22 = vpop.f32.mrf.mxu1 }
  0xc5   : > { %v407_v26 = vadd.f32 %v406_v22, %v271_v4  ;;  %v496_v28 = vpop.f32.mrf.mxu2 }
  0xc6   : > { %1121 = vmatmul.f32.gmra.mxu3 %v3567_v57 }
  0xc7   : > { %v497_v55 = vadd.f32 %v496_v28, %v407_v26  ;;  %712 = vmatmul.f32.gmra.mxu0 %v3567_v57  ;;  %791 = vmatmul.f32.gmra.mxu1 %v3543_v50 }
  0xc9   : > { %v3842_v21 = vadd.f32 %v600_v48, %v497_v55  ;;  %990 = vmatmul.f32.gmra.mxu2 %v3616_v12  ;;  %v606_v59 = vpop.f32.mrf.mxu3 }
  0xcc   : > { %v287_v41 = vpop.f32.mrf.mxu0  ;;  %v410_v37 = vpop.f32.mrf.mxu1 }
  0xcd   : > { %v411_v62 = vadd.f32 %v410_v37, %v279_v34  ;;  %v501_v18 = vpop.f32.mrf.mxu2 }
  0xce   : > { %1125 = vmatmul.f32.gmra.mxu3 %v3587_v0 }
  0xcf   : > { %v502_v4 = vadd.f32 %v501_v18, %v411_v62  ;;  %716 = vmatmul.f32.gmra.mxu0 %v3587_v0  ;;  %795 = vmatmul.f32.gmra.mxu1 %v3567_v57 }
  0xd1   : > { %v3848_v22 = vadd.f32 %v606_v59, %v502_v4  ;;  %998 = vmatmul.f32.gmra.mxu2 %v3638_v30  ;;  %v612_v48 = vpop.f32.mrf.mxu3 }
  0xd4   : > { %v295_v26 = vpop.f32.mrf.mxu0  ;;  %v414_v28 = vpop.f32.mrf.mxu1 }
  0xd5   : > { %v415_v12 = vadd.f32 %v414_v28, %v287_v41  ;;  %v506_v55 = vpop.f32.mrf.mxu2 }
  0xd6   : > { %1129 = vmatmul.f32.gmra.mxu3 %v3621_v19 }
  0xd7   : > { %v507_v34 = vadd.f32 %v506_v55, %v415_v12  ;;  %720 = vmatmul.f32.gmra.mxu0 %v3621_v19  ;;  %799 = vmatmul.f32.gmra.mxu1 %v3587_v0 }
  0xd9   : > { %v3854_v37 = vadd.f32 %v612_v48, %v507_v34  ;;  %1006 = vmatmul.f32.gmra.mxu2 %v3666_v38  ;;  %v618_v59 = vpop.f32.mrf.mxu3 }
  0xdc   : > { %v303_v62 = vpop.f32.mrf.mxu0  ;;  %v418_v18 = vpop.f32.mrf.mxu1 }
  0xdd   : > { %v419_v30 = vadd.f32 %v418_v18, %v295_v26  ;;  %v511_v4 = vpop.f32.mrf.mxu2 }
  0xde   : > { %1133 = vmatmul.f32.gmra.mxu3 %v3643_v32 }
  0xdf   : > { %v512_v41 = vadd.f32 %v511_v4, %v419_v30  ;;  %724 = vmatmul.f32.gmra.mxu0 %v3643_v32  ;;  %803 = vmatmul.f32.gmra.mxu1 %v3621_v19 }
  0xe1   : > { %v3860_v28 = vadd.f32 %v618_v59, %v512_v41  ;;  %1014 = vmatmul.f32.gmra.mxu2 %v3686_v51  ;;  %v624_v48 = vpop.f32.mrf.mxu3 }
  0xe3   : > { %4860 = vst [vmem:[#allocation16_spill] sm:$0xff] %v3860_v28 }
  0xe4   : > { %v311_v12 = vpop.f32.mrf.mxu0  ;;  %v422_v55 = vpop.f32.mrf.mxu1 }
  0xe5   : > { %v423_v38 = vadd.f32 %v422_v55, %v303_v62  ;;  %v516_v34 = vpop.f32.mrf.mxu2 }
  0xe6   : > { %1137 = vmatmul.f32.gmra.mxu3 %v3671_v40 }
  0xe7   : > { %v517_v26 = vadd.f32 %v516_v34, %v423_v38  ;;  %728 = vmatmul.f32.gmra.mxu0 %v3671_v40  ;;  %807 = vmatmul.f32.gmra.mxu1 %v3643_v32 }
  0xe9   : > { %v3866_v18 = vadd.f32 %v624_v48, %v517_v26  ;;  %1022 = vmatmul.f32.gmra.mxu2 %v3706_v2  ;;  %v630_v59 = vpop.f32.mrf.mxu3 }
  0xeb   : > { %4861 = vst [vmem:[#allocation17_spill] sm:$0xff] %v3866_v18 }
  0xec   : > { %v319_v30 = vpop.f32.mrf.mxu0  ;;  %v426_v4 = vpop.f32.mrf.mxu1 }
  0xed   : > { %v427_v51 = vadd.f32 %v426_v4, %v311_v12  ;;  %v521_v41 = vpop.f32.mrf.mxu2 }
  0xee   : > { %1141 = vmatmul.f32.gmra.mxu3 %v3691_v54 }
  0xef   : > { %v522_v62 = vadd.f32 %v521_v41, %v427_v51  ;;  %732 = vmatmul.f32.gmra.mxu0 %v3691_v54  ;;  %811 = vmatmul.f32.gmra.mxu1 %v3671_v40 }
  0xf1   : > { %v3872_v55 = vadd.f32 %v630_v59, %v522_v62  ;;  %1030 = vmatmul.f32.gmra.mxu2 %v3726_v27  ;;  %v636_v48 = vpop.f32.mrf.mxu3 }
  0xf3   : > { %4862 = vst [vmem:[#allocation18_spill] sm:$0xff] %v3872_v55 }
  0xf4   : > { %v327_v38 = vpop.f32.mrf.mxu0  ;;  %v430_v34 = vpop.f32.mrf.mxu1 }
  0xf5   : > { %v431_v2 = vadd.f32 %v430_v34, %v319_v30  ;;  %v526_v26 = vpop.f32.mrf.mxu2 }
  0xf6   : > { %1145 = vmatmul.f32.gmra.mxu3 %v3711_v8 }
  0xf7   : > { %v527_v12 = vadd.f32 %v526_v26, %v431_v2  ;;  %736 = vmatmul.f32.gmra.mxu0 %v3711_v8  ;;  %815 = vmatmul.f32.gmra.mxu1 %v3691_v54 }
  0xf9   : > { %v3878_v4 = vadd.f32 %v636_v48, %v527_v12  ;;  %1038 = vmatmul.f32.gmra.mxu2 %v3746_v15  ;;  %v642_v59 = vpop.f32.mrf.mxu3  ;;  %v3888_v15 = vld [vmem:[%s3444_s3 + $0x2] ss:$0 sm:$0xff] }
  0xfa   : > { %vm1571_vm5 = vcmp.eq.s32.totalorder %v3433_v9, %v3888_v15  ;;  %vm1570_vm6 = vcmp.eq.s32.totalorder %v3423_v5, %v3888_v15 }
  0xfb   : > { %4863 = vst [vmem:[#allocation19_spill] sm:$0xff] %v3878_v4 }
  0xfc   : > { %v335_v51 = vpop.f32.mrf.mxu0  ;;  %v434_v27 = vpop.f32.mrf.mxu1 }
  0xfd   : > { %v435_v41 = vadd.f32 %v434_v27, %v327_v38  ;;  %v531_v62 = vpop.f32.mrf.mxu2 }
  0xfe   : > { %1149 = vmatmul.f32.gmra.mxu3 %v3731_v29 }
  0xff   : > { %v532_v30 = vadd.f32 %v531_v62, %v435_v41  ;;  %740 = vmatmul.f32.gmra.mxu0 %v3731_v29  ;;  %819 = vmatmul.f32.gmra.mxu1 %v3711_v8  ;;  %v4866_v41 = vmov 1.0  }
 0x100   : > { %3197 = vmatpush.msk.msrb.mxu3 %vm1571_vm5, %v4866_v41  ;;  %3195 = vmatpush.msk.msrb.mxu0 %vm1571_vm5, %v4866_v41 }
 0x101   : > { %v3884_v34 = vadd.f32 %v642_v59, %v532_v30  ;;  %1046 = vmatmul.f32.gmra.mxu2 %v3766_v24  ;;  %v648_v48 = vpop.f32.mrf.mxu3  ;;  %v4865_v59 = vmov 0.0  }
 0x102   : > { %v3194_v24 = vsel %vm1571_vm5, 1.0, %v4865_v59  ;;  %3196 = vmatpush.msk.msrb.mxu0 %vm1570_vm6, %v4866_v41  ;;  %3198 = vmatpush.msk.msrb.mxu3 %vm1570_vm6, %v4866_v41 }
 0x103   : > { %4864 = vst [vmem:[#allocation20_spill] sm:$0xff] %v3884_v34  ;;  %v3899_v27 = vsub.f32 %v3194_v24, %v3194_v24 }
 0x104   : > { %v343_v2 = vpop.f32.mrf.mxu0  ;;  %v438_v26 = vpop.f32.mrf.mxu1 }
 0x105   : > { %v439_v12 = vadd.f32 %v438_v26, %v335_v51  ;;  %v536_v4 = vpop.f32.mrf.mxu2  ;;  %1894 = vmatpush.msrb.mxu2 %v3899_v27  ;;  %v4824_v62 = vand.u32 4294901760, %v3899_v27 }
 0x106   : > { %1153 = vmatmul.f32.gmra.mxu3 %v3751_v58 }
 0x107   : > { %v537_v38 = vadd.f32 %v536_v4, %v439_v12  ;;  %744 = vmatmul.f32.gmra.mxu0 %v3751_v58  ;;  %823 = vmatmul.f32.gmra.mxu1 %v3731_v29  ;;  %v1804_v12 = vsub.f32 %v3899_v27, %v4824_v62 }
 0x109   : > { %v3909_v4 = vadd.f32 %v648_v48, %v537_v38  ;;  %1054 = vmatmul.f32.gmra.mxu2 %v3786_v20  ;;  %v654_v51 = vpop.f32.mrf.mxu3  ;;  %v1805_v55 = vand.u32 4294901760, %v1804_v12 }
 0x10b   : > { %4867 = vst [vmem:[#allocation21_spill] sm:$0xff] %v3909_v4  ;;  %1806 = vmatpush.msrb.mxu1 %v1805_v55 }
 0x10c   : > { %v351_v30 = vpop.f32.mrf.mxu0  ;;  %v442_v26 = vpop.f32.mrf.mxu1 }
 0x10d   : > { %v443_v24 = vadd.f32 %v442_v26, %v343_v2  ;;  %v541_v34 = vpop.f32.mrf.mxu2 }
 0x10e   : > { %1157 = vmatmul.f32.gmra.mxu3 %v3771_v35 }
 0x10f   : > { %v542_v48 = vadd.f32 %v541_v34, %v443_v24  ;;  %748 = vmatmul.f32.gmra.mxu0 %v3771_v35  ;;  %827 = vmatmul.f32.gmra.mxu1 %v3751_v58 }
 0x111   : > { %v3920_v20 = vadd.f32 %v654_v51, %v542_v48  ;;  %1062 = vmatmul.f32.gmra.mxu2 %v3802_v44  ;;  %v660_v38 = vpop.f32.mrf.mxu3 }
 0x113   : > { %4868 = vst [vmem:[#allocation22_spill] sm:$0xff] %v3920_v20 }
 0x114   : > { %v359_v4 = vpop.f32.mrf.mxu0  ;;  %v446_v18 = vpop.f32.mrf.mxu1 }
 0x115   : > { %v447_v28 = vadd.f32 %v446_v18, %v351_v30  ;;  %v546_v62 = vpop.f32.mrf.mxu2 }
 0x116   : > { %1161 = vmatmul.f32.gmra.mxu3 %v3791_v47 }
 0x117   : > { %v547_v2 = vadd.f32 %v546_v62, %v447_v28  ;;  %752 = vmatmul.f32.gmra.mxu0 %v3791_v47  ;;  %831 = vmatmul.f32.gmra.mxu1 %v3771_v35 }
 0x119   : > { %v3926_v34 = vadd.f32 %v660_v38, %v547_v2  ;;  %1070 = vmatmul.f32.gmra.mxu2 %v3813_v1  ;;  %v666_v55 = vpop.f32.mrf.mxu3 }
 0x11b   : > { %4869 = vst [vmem:[#allocation23_spill] sm:$0xff] %v3926_v34 }
 0x11c   : > { %v693_v51 = vpop.f32.mrf.mxu0  ;;  %v450_v26 = vpop.f32.mrf.mxu1 }
 0x11d   : > { %v451_v44 = vadd.f32 %v450_v26, %v359_v4  ;;  %v551_v12 = vpop.f32.mrf.mxu2 }
 0x11e   : > { %1487 = vmatmul.f32.vlgmr.msra.gmra.mxu3 %v3425_v6 }
 0x11f   : > { %v552_v18 = vadd.f32 %v551_v12, %v451_v44  ;;  %1187 = vmatmul.f32.vlgmr.msra.gmra.mxu0 %v3436_v10  ;;  %835 = vmatmul.f32.gmra.mxu1 %v3791_v47 }
 0x121   : > { %v3932_v28 = vadd.f32 %v666_v55, %v552_v18  ;;  %1404 = vmatmul.f32.vlgmr.msra.gmra.mxu2 %v3425_v6  ;;  %v1102_v62 = vpop.f32.mrf.mxu3 }
 0x123   : > { %4870 = vst [vmem:[#allocation24_spill] sm:$0xff] %v3932_v28 }
 0x124   : > { %v697_v30 = vpop.f32.mrf.mxu0  ;;  %v776_v24 = vpop.f32.mrf.mxu1 }
 0x125   : > { %v951_v1 = vpop.f32.mrf.mxu2 }
 0x126   : > { %v3935_v48 = vadd.f32 %v1102_v62, %v951_v1  ;;  %1491 = vmatmul.f32.gmra.mxu3 %v3427_v7 }
 0x127   : > { %1192 = vmatmul.f32.gmra.mxu0 %v3439_v11  ;;  %1287 = vmatmul.f32.vlgmr.msra.gmra.mxu1 %v3449_v14 }
 0x129   : > { %1408 = vmatmul.f32.gmra.mxu2 %v3427_v7  ;;  %v1106_v10 = vpop.f32.mrf.mxu3 }
 0x12c   : > { %v701_v4 = vpop.f32.mrf.mxu0  ;;  %v780_v38 = vpop.f32.mrf.mxu1 }
 0x12d   : > { %v959_v2 = vpop.f32.mrf.mxu2 }
 0x12e   : > { %v3941_v55 = vadd.f32 %v1106_v10, %v959_v2  ;;  %1495 = vmatmul.f32.gmra.mxu3 %v3459_v17 }
 0x12f   : > { %1197 = vmatmul.f32.gmra.mxu0 %v3500_v33  ;;  %1293 = vmatmul.f32.gmra.mxu1 %v3457_v16 }
 0x131   : > { %1412 = vmatmul.f32.gmra.mxu2 %v3459_v17  ;;  %v1110_v6 = vpop.f32.mrf.mxu3 }
 0x134   : > { %v705_v11 = vpop.f32.mrf.mxu0  ;;  %v784_v51 = vpop.f32.mrf.mxu1 }
 0x135   : > { %v967_v14 = vpop.f32.mrf.mxu2 }
 0x136   : > { %v3947_v26 = vadd.f32 %v1110_v6, %v967_v14  ;;  %1499 = vmatmul.f32.gmra.mxu3 %v3516_v43 }
 0x137   : > { %1202 = vmatmul.f32.gmra.mxu0 %v3528_v46  ;;  %1299 = vmatmul.f32.gmra.mxu1 %v3514_v42 }
 0x139   : > { %1416 = vmatmul.f32.gmra.mxu2 %v3516_v43  ;;  %v1114_v7 = vpop.f32.mrf.mxu3 }
 0x13c   : > { %v3953_v33 = vpop.f32.mrf.mxu0  ;;  %v788_v16 = vpop.f32.mrf.mxu1 }
 0x13d   : > { %v975_v44 = vpop.f32.mrf.mxu2 }
 0x13e   : > { %v3955_v17 = vadd.f32 %v1114_v7, %v975_v44  ;;  %1503 = vmatmul.f32.gmra.mxu3 %v3543_v50  ;;  %v4873_v7 = vld [vmem:[#allocation6_spill] sm:$0xff] }
 0x13f   : > { %1207 = vmatmul.f32.gmra.mxu0 %v3558_v53  ;;  %1305 = vmatmul.f32.gmra.mxu1 %v3541_v49  ;;  %v3193_v53 = vsel %vm1570_vm6, 1.0, %v4865_v59 }
 0x140   : > { %v1808_v49 = vsub.f32 %v3193_v53, %v3193_v53 }
 0x141   : > { %1420 = vmatmul.f32.gmra.mxu2 %v3543_v50  ;;  %v1118_v46 = vpop.f32.mrf.mxu3  ;;  %v4871_v50 = vand.u32 4294901760, %v3899_v27 }
 0x142   : > { %v1809_v62 = vand.u32 4294901760, %v1808_v49  ;;  %1897 = vmatpush.msrb.mxu2 %v1808_v49  ;;  %v4876_v46 = vld [vmem:[#allocation8_spill] sm:$0xff] }
 0x143   : > { %2111 = vmatpush.msra.mxu0 %v4871_v50  ;;  %v1576_v50 = vld [vmem:[%s4808_s1] sm:$0xff] }
 0x144   : > { %v3961_v12 = vpop.f32.mrf.mxu0  ;;  %v3963_v42 = vpop.f32.mrf.mxu1  ;;  %v1810_v30 = vsub.f32 %v1808_v49, %v1809_v62 }
 0x145   : > { %v983_v43 = vpop.f32.mrf.mxu2  ;;  %2115 = vmatpush.msra.mxu0 %v1809_v62 }
 0x146   : > { %1507 = vmatmul.f32.gmra.mxu3 %v3567_v57  ;;  %v1811_v1 = vand.u32 4294901760, %v1810_v30  ;;  %v4877_v43 = vld [vmem:[#allocation7_spill] sm:$0xff]  ;;  %v4880_v30 = vld [vmem:[#allocation10_spill] sm:$0xff] }
 0x147   : > { %1212 = vmatmul.f32.gmra.mxu0 %v3578_v60  ;;  %1311 = vmatmul.f32.gmra.mxu1 %v3565_v56 }
 0x148   : > { %1812 = vmatpush.msrb.mxu1 %v1811_v1 }
 0x149   : > { %1424 = vmatmul.f32.gmra.mxu2 %v3567_v57  ;;  %v1122_v18 = vpop.f32.mrf.mxu3 }
 0x14a   : > { %3199 = vmatpush.msk.msra.mxu1 %vm1571_vm5, %v4866_v41  ;;  %v4065_v18 = vld [vmem:[%s3444_s3 + $0x3] ss:$0 sm:$0xff]  ;;  %s3106_s3 = scalar_lea.hbm %s4809_s2, %s3229_s17 }
 0x14b   : > { %vm2284_vm7 = vcmp.eq.s32.totalorder %v3433_v9, %v4065_v18  ;;  %vm2283_vm8 = vcmp.eq.s32.totalorder %v3423_v5, %v4065_v18  ;;  %v1586_v9 = vld [vmem:[%s4808_s1 + $0x50] sm:$0xff]  ;;  %s3109_s24 = sshll.u32 %s3106_s3, 4  ;;  %s3110_s24 = int_to_ptr.hbm [resolvable:$true] %s3109_s24 }
 0x14c   : > { %v3985_v24 = vpop.f32.mrf.mxu0  ;;  %v3987_v60 = vpop.f32.mrf.mxu1  ;;  %3200 = vmatpush.msk.msra.mxu1 %vm1570_vm6, %v4866_v41  ;;  %v3202_v1 = vsel %vm2284_vm7, 1.0, %v4865_v59  ;;  %3203 = vmatpush.msk.msra.mxu2 %vm2284_vm7, %v4866_v41  ;;  %v1623_v5 = vsel %vm166_vm0, %v1586_v9, 0  ;;  %s3295_s25 = sshra.s32 %s3110_s24, 4  ;;  %s3296_s25 = int_to_ptr.hbm [resolvable:$true] %s3295_s25 }
 0x14d   : > { %v991_v56 = vpop.f32.mrf.mxu2  ;;  %s3297_s26 = scalar_lea.hbm %s3296_s25, 192  ;;  %p3302_p0 = scmp.lt.s32.totalorder %s3296_s25, %s4809_s2 }
 0x14e   : > { %1511 = vmatmul.f32.gmra.mxu3 %v3587_v0  ;;  %v4881_v56 = vld [vmem:[#allocation9_spill] sm:$0xff]  ;;  %3204 = vmatpush.msk.msra.mxu2 %vm2283_vm8, %v4866_v41  ;;  %p3298_p11 = scmp.ne.s32.totalorder %s3296_s25, %s3297_s26  ;;  %p3303_p1 = scmp.lt.s32.totalorder %s3301_s30, %s3297_s26 }
 0x14f   : > { %1217 = vmatmul.f32.gmra.mxu0 %v3598_v3  ;;  %1317 = vmatmul.f32.gmra.mxu1 %v3585_v63 }
 0x150   : > { %p3299_p12 = pnand %p3298_p11, %p3403_p5  ;;  %p3304_p2 = por %p3303_p1, %p3302_p0 }
 0x151   : > { %1428 = vmatmul.f32.gmra.mxu2 %v3587_v0  ;;  %v1126_v57 = vpop.f32.mrf.mxu3 }
 0x152   : > { %p3300_p13 = pneg %p3299_p12 }
 0x154   : > { %v4001_v27 = vpop.f32.mrf.mxu0  ;;  %v4003_v10 = vpop.f32.mrf.mxu1  ;;  %p3305_p3 = pnand %p3304_p2, %p3300_p13 }
 0x155   : > { %v999_v3 = vpop.f32.mrf.mxu2 }
 0x156   : > { %1515 = vmatmul.f32.gmra.mxu3 %v3621_v19  ;;  %v4084_v3 = vsub.f32 %v3202_v1, %v3202_v1 }
 0x157   : > { %1222 = vmatmul.f32.gmra.mxu0 %v3634_v25  ;;  %1323 = vmatmul.f32.gmra.mxu1 %v3619_v13 }
 0x159   : > { %1432 = vmatmul.f32.gmra.mxu2 %v3621_v19  ;;  %v1130_v63 = vpop.f32.mrf.mxu3 }
 0x15c   : > { %v4009_v0 = vpop.f32.mrf.mxu0  ;;  %v4011_v4 = vpop.f32.mrf.mxu1 }
 0x15d   : > { %v1007_v15 = vpop.f32.mrf.mxu2 }
 0x15e   : > { %1519 = vmatmul.f32.gmra.mxu3 %v3643_v32  ;;  %v4825_v15 = vand.u32 4294901760, %v4084_v3 }
 0x15f   : > { %1227 = vmatmul.f32.gmra.mxu0 %v3658_v36  ;;  %1329 = vmatmul.f32.gmra.mxu1 %v3641_v31 }
 0x161   : > { %1436 = vmatmul.f32.gmra.mxu2 %v3643_v32  ;;  %v1134_v38 = vpop.f32.mrf.mxu3 }
 0x164   : > { %v4017_v25 = vpop.f32.mrf.mxu0  ;;  %v4019_v13 = vpop.f32.mrf.mxu1 }
 0x165   : > { %v1015_v19 = vpop.f32.mrf.mxu2 }
 0x166   : > { %v4021_v2 = vadd.f32 %v1134_v38, %v1015_v19  ;;  %1523 = vmatmul.f32.gmra.mxu3 %v3671_v40 }
 0x167   : > { %1232 = vmatmul.f32.gmra.mxu0 %v3682_v45  ;;  %1335 = vmatmul.f32.gmra.mxu1 %v3669_v39 }
 0x169   : > { %1440 = vmatmul.f32.gmra.mxu2 %v3671_v40  ;;  %v1138_v36 = vpop.f32.mrf.mxu3 }
 0x16c   : > { %v4027_v31 = vpop.f32.mrf.mxu0  ;;  %v4029_v32 = vpop.f32.mrf.mxu1 }
 0x16d   : > { %v1023_v6 = vpop.f32.mrf.mxu2 }
 0x16e   : > { %v4031_v11 = vadd.f32 %v1138_v36, %v1023_v6  ;;  %1527 = vmatmul.f32.gmra.mxu3 %v3691_v54  ;;  %v2517_v6 = vsub.f32 %v4084_v3, %v4825_v15 }
 0x16f   : > { %1237 = vmatmul.f32.gmra.mxu0 %v3702_v61  ;;  %1341 = vmatmul.f32.gmra.mxu1 %v3689_v52 }
 0x171   : > { %1444 = vmatmul.f32.gmra.mxu2 %v3691_v54  ;;  %v1142_v45 = vpop.f32.mrf.mxu3 }
 0x174   : > { %v4037_v39 = vpop.f32.mrf.mxu0  ;;  %v4039_v40 = vpop.f32.mrf.mxu1 }
 0x175   : > { %4872 = vst [vmem:[#allocation25_spill] sm:$0xff] %v4037_v39  ;;  %v1031_v51 = vpop.f32.mrf.mxu2 }
 0x176   : > { %v4041_v14 = vadd.f32 %v1142_v45, %v1031_v51  ;;  %1531 = vmatmul.f32.gmra.mxu3 %v3711_v8  ;;  %v4884_v51 = vld [vmem:[#allocation12_spill] sm:$0xff] }
 0x177   : > { %1242 = vmatmul.f32.gmra.mxu0 %v3722_v23  ;;  %1347 = vmatmul.f32.gmra.mxu1 %v4873_v7  ;;  %v4885_v7 = vld [vmem:[#allocation11_spill] sm:$0xff] }
 0x179   : > { %1448 = vmatmul.f32.gmra.mxu2 %v3711_v8  ;;  %v1146_v52 = vpop.f32.mrf.mxu3 }
 0x17c   : > { %v4047_v61 = vpop.f32.mrf.mxu0  ;;  %v4049_v54 = vpop.f32.mrf.mxu1 }
 0x17d   : > { %4874 = vst [vmem:[#allocation6_spill] sm:$0xff] %v4047_v61  ;;  %v1039_v16 = vpop.f32.mrf.mxu2 }
 0x17e   : > { %4875 = vst [vmem:[#allocation26_spill] sm:$0xff] %v4049_v54  ;;  %v4051_v44 = vadd.f32 %v1146_v52, %v1039_v16  ;;  %1535 = vmatmul.f32.gmra.mxu3 %v3731_v29  ;;  %v2518_v16 = vand.u32 4294901760, %v2517_v6 }
 0x17f   : > { %1247 = vmatmul.f32.gmra.mxu0 %v4876_v46  ;;  %1353 = vmatmul.f32.gmra.mxu1 %v4877_v43 }
 0x180   : > { %2519 = vmatpush.msra.mxu3 %v2518_v16 }
 0x181   : > { %1452 = vmatmul.f32.gmra.mxu2 %v3731_v29  ;;  %v1150_v23 = vpop.f32.mrf.mxu3  ;;  %v1593_v29 = vsel %vm166_vm0, %v1576_v50, 0 }
 0x182   : > { %v4086_v63 = vand.u32 4294901760, %v1593_v29 }
 0x184   : > { %v4057_v53 = vpop.f32.mrf.mxu0  ;;  %v4059_v8 = vpop.f32.mrf.mxu1  ;;  %v4105_v52 = vsub.f32 %v1593_v29, %v4086_v63  ;;  %v1578_v29 = vld [vmem:[%s4808_s1 + $0x10] sm:$0xff] }
 0x185   : > { %4878 = vst [vmem:[#allocation8_spill] sm:$0xff] %v4057_v53  ;;  %v1047_v49 = vpop.f32.mrf.mxu2 }
 0x186   : > { %4879 = vst [vmem:[#allocation7_spill] sm:$0xff] %v4059_v8  ;;  %v4067_v62 = vadd.f32 %v1150_v23, %v1047_v49  ;;  %1539 = vmatmul.f32.gmra.mxu3 %v3751_v58  ;;  %v4110_v23 = vand.u32 4294901760, %v4105_v52 }
 0x187   : > { %1252 = vmatmul.f32.gmra.mxu0 %v4880_v30  ;;  %1359 = vmatmul.f32.gmra.mxu1 %v4881_v56 }
 0x189   : > { %1456 = vmatmul.f32.gmra.mxu2 %v3751_v58  ;;  %v1154_v57 = vpop.f32.mrf.mxu3  ;;  %v1577_v58 = vld [vmem:[%s4808_s1 + $0x8] sm:$0xff] }
 0x18a   : > { %v1596_v46 = vsel %vm166_vm0, %v1577_v58, 0  ;;  %v1599_v58 = vsel %vm166_vm0, %v1578_v29, 0 }
 0x18b   : > { %v4112_v49 = vand.u32 4294901760, %v1596_v46 }
 0x18c   : > { %v4089_v38 = vpop.f32.mrf.mxu0  ;;  %v4091_v19 = vpop.f32.mrf.mxu1 }
 0x18d   : > { %4882 = vst [vmem:[#allocation10_spill] sm:$0xff] %v4089_v38  ;;  %v1055_v36 = vpop.f32.mrf.mxu2  ;;  %v4129_v6 = vsub.f32 %v1596_v46, %v4112_v49  ;;  %v1579_v46 = vld [vmem:[%s4808_s1 + $0x18] sm:$0xff] }
 0x18e   : > { %4883 = vst [vmem:[#allocation9_spill] sm:$0xff] %v4091_v19  ;;  %v4099_v45 = vadd.f32 %v1154_v57, %v1055_v36  ;;  %1543 = vmatmul.f32.gmra.mxu3 %v3771_v35  ;;  %v4889_v57 = vld [vmem:[#allocation13_spill] sm:$0xff]  ;;  %v1661_v36 = vsub.f32 %v4105_v52, %v4110_v23  ;;  %v710_v19 = vadd.f32 %v3953_v33, %v3842_v21 }
 0x18f   : > { %1257 = vmatmul.f32.gmra.mxu0 %v4884_v51  ;;  %1365 = vmatmul.f32.gmra.mxu1 %v4885_v7  ;;  %v4136_v16 = vand.u32 4294901760, %v4129_v6 }
 0x190   : > { %v4133_v7 = vand.u32 4294901760, %v1661_v36  ;;  %v793_v21 = vadd.f32 %v3963_v42, %v710_v19 }
 0x191   : > { %1460 = vmatmul.f32.gmra.mxu2 %v3771_v35  ;;  %v1158_v43 = vpop.f32.mrf.mxu3  ;;  %v4888_v35 = vld [vmem:[#allocation14_spill] sm:$0xff]  ;;  %v1669_v36 = vsub.f32 %v4129_v6, %v4136_v16 }
 0x194   : > { %v4114_v50 = vpop.f32.mrf.mxu0  ;;  %v4116_v30 = vpop.f32.mrf.mxu1 }
 0x195   : > { %4886 = vst [vmem:[#allocation12_spill] sm:$0xff] %v4114_v50  ;;  %v1063_v56 = vpop.f32.mrf.mxu2  ;;  %v4159_v50 = vand.u32 4294901760, %v1669_v36 }
 0x196   : > { %4887 = vst [vmem:[#allocation11_spill] sm:$0xff] %v4116_v30  ;;  %v4121_v1 = vadd.f32 %v1158_v43, %v1063_v56  ;;  %1547 = vmatmul.f32.gmra.mxu3 %v3791_v47  ;;  %v4138_v43 = vand.u32 4294901760, %v1599_v58 }
 0x197   : > { %1262 = vmatmul.f32.gmra.mxu0 %v4888_v35  ;;  %1371 = vmatmul.f32.gmra.mxu1 %v4889_v57 }
 0x198   : > { %v4153_v15 = vsub.f32 %v1599_v58, %v4138_v43 }
 0x199   : > { %1464 = vmatmul.f32.gmra.mxu2 %v3791_v47  ;;  %v1162_v51 = vpop.f32.mrf.mxu3  ;;  %v4891_v47 = vld [vmem:[#allocation15_spill] sm:$0xff] }
 0x19c   : > { %v1188_v56 = vpop.f32.mrf.mxu0  ;;  %v4140_v35 = vpop.f32.mrf.mxu1 }
 0x19d   : > { %4890 = vst [vmem:[#allocation14_spill] sm:$0xff] %v4140_v35  ;;  %v1071_v57 = vpop.f32.mrf.mxu2  ;;  %v1602_v35 = vsel %vm166_vm0, %v1579_v46, 0  ;;  %v1580_v46 = vld [vmem:[%s4808_s1 + $0x20] sm:$0xff] }
 0x19e   : > { %v4145_v29 = vadd.f32 %v1162_v51, %v1071_v57  ;;  %2000 = vmatmul.f32.vlgmr.msrb.gmra.mxu3 %v4110_v23  ;;  %v1189_v57 = vadd.f32 %v1188_v56, %v3935_v48  ;;  %v4165_v28 = vand.u32 4294901760, %v1602_v35 }
 0x19f   : > { %1663 = vmatmul.f32.vlgmr.msrb.gmra.mxu0 %v4133_v7  ;;  %1377 = vmatmul.f32.gmra.mxu1 %v4891_v47  ;;  %v4163_v47 = vand.u32 4294901760, %v4153_v15 }
 0x1a0   : > { %2607 = vmatpush.msrb.mxu0 %v4084_v3  ;;  %v4180_v36 = vsub.f32 %v1602_v35, %v4165_v28 }
 0x1a1   : > { %1900 = vmatmul.f32.vlgmr.msrb.gmra.mxu2 %v4105_v52  ;;  %v1488_v51 = vpop.f32.mrf.mxu3  ;;  %4892 = vst [vmem:[#allocation13_spill] sm:$0xff] %v4163_v47  ;;  %v1677_v56 = vsub.f32 %v4153_v15, %v4163_v47 }
 0x1a3   : > { %v4192_v35 = vand.u32 4294901760, %v1677_v56 }
 0x1a4   : > { %v1193_v58 = vpop.f32.mrf.mxu0  ;;  %v1288_v30 = vpop.f32.mrf.mxu1 }
 0x1a5   : > { %v1289_v38 = vadd.f32 %v1288_v30, %v1189_v57  ;;  %v1405_v34 = vpop.f32.mrf.mxu2  ;;  %v1605_v30 = vsel %vm166_vm0, %v1580_v46, 0  ;;  %v1194_v57 = vadd.f32 %v1193_v58, %v3941_v55  ;;  %v4195_v46 = vand.u32 4294901760, %v4180_v36 }
 0x1a6   : > { %2006 = vmatmul.f32.gmra.mxu3 %v4136_v16  ;;  %v714_v58 = vadd.f32 %v3961_v12, %v3848_v22 }
 0x1a7   : > { %v1406_v48 = vadd.f32 %v1405_v34, %v1289_v38  ;;  %1671 = vmatmul.f32.gmra.mxu0 %v4159_v50  ;;  %1814 = vmatmul.f32.vlgmr.msrb.gmra.mxu1 %v4086_v63  ;;  %v4189_v38 = vand.u32 4294901760, %v1605_v30  ;;  %4893 = vst [vmem:[#allocation15_spill] sm:$0xff] %v4195_v46 }
 0x1a8   : > { %3205 = vmatpush.msk.msrb.mxu1 %vm2284_vm7, %v4866_v41  ;;  %v797_v56 = vadd.f32 %v3987_v60, %v714_v58  ;;  %v1582_v60 = vld [vmem:[%s4808_s1 + $0x30] sm:$0xff] }
 0x1a9   : > { %v1489_v34 = vadd.f32 %v1488_v51, %v1406_v48  ;;  %1905 = vmatmul.f32.gmra.mxu2 %v4129_v6  ;;  %v1492_v33 = vpop.f32.mrf.mxu3  ;;  %v1581_v51 = vld [vmem:[%s4808_s1 + $0x28] sm:$0xff]  ;;  %v4205_v55 = vsub.f32 %v1605_v30, %v4189_v38  ;;  %v1611_v58 = vsel %vm166_vm0, %v1582_v60, 0 }
 0x1aa   : > { %3206 = vmatpush.msk.msrb.mxu1 %vm2283_vm8, %v4866_v41 }
 0x1ab   : > { %v3002_v53 = vmul.f32 %v1489_v34, %v793_v21  ;;  %4894 = vst [vmem:[#allocation27_spill] sm:$0xff] %v4205_v55  ;;  %v4217_v34 = vand.u32 4294901760, %v4205_v55 }
 0x1ac   : > { %v1198_v20 = vpop.f32.mrf.mxu0  ;;  %v1294_v8 = vpop.f32.mrf.mxu1 }
 0x1ad   : > { %3006 = vst [vmem:[%s4197_s5] sm:$0xff] %v3002_v53  ;;  %v1295_v42 = vadd.f32 %v1294_v8, %v1194_v57  ;;  %v1409_v19 = vpop.f32.mrf.mxu2  ;;  %v1685_v53 = vsub.f32 %v4180_v36, %v4195_v46  ;;  %v1608_v8 = vsel %vm166_vm0, %v1581_v51, 0  ;;  %v1199_v22 = vadd.f32 %v1198_v20, %v3947_v26 }
 0x1ae   : > { %2012 = vmatmul.f32.gmra.mxu3 %v4163_v47  ;;  %4895 = vst [vmem:[#allocation28_spill] sm:$0xff] %v4217_v34  ;;  %v718_v20 = vadd.f32 %v3985_v24, %v3854_v37 }
 0x1af   : > { %v1410_v48 = vadd.f32 %v1409_v19, %v1295_v42  ;;  %1679 = vmatmul.f32.gmra.mxu0 %v4192_v35  ;;  %1818 = vmatmul.f32.gmra.mxu1 %v4112_v49  ;;  %v4220_v57 = vand.u32 4294901760, %v1685_v53  ;;  %v4222_v42 = vand.u32 4294901760, %v1608_v8 }
 0x1b1   : > { %v1493_v21 = vadd.f32 %v1492_v33, %v1410_v48  ;;  %1910 = vmatmul.f32.gmra.mxu2 %v4153_v15  ;;  %v1496_v30 = vpop.f32.mrf.mxu3  ;;  %v1693_v33 = vsub.f32 %v4205_v55, %v4217_v34  ;;  %v801_v48 = vadd.f32 %v4003_v10, %v718_v20  ;;  %v1583_v10 = vld [vmem:[%s4808_s1 + $0x38] sm:$0xff] }
 0x1b3   : > { %v3003_v12 = vmul.f32 %v1493_v21, %v797_v56  ;;  %v4241_v21 = vand.u32 4294901760, %v1693_v33 }
 0x1b4   : > { %v1203_v19 = vpop.f32.mrf.mxu0  ;;  %v1300_v61 = vpop.f32.mrf.mxu1 }
 0x1b5   : > { %3007 = vst [vmem:[%s4197_s5 + $0x8] sm:$0xff] %v3003_v12  ;;  %v1301_v51 = vadd.f32 %v1300_v61, %v1199_v22  ;;  %v1413_v54 = vpop.f32.mrf.mxu2  ;;  %v4236_v61 = vsub.f32 %v1608_v8, %v4222_v42  ;;  %v1204_v37 = vadd.f32 %v1203_v19, %v3955_v17  ;;  %v4247_v22 = vand.u32 4294901760, %v1611_v58 }
 0x1b6   : > { %2018 = vmatmul.f32.gmra.mxu3 %v4195_v46 }
 0x1b7   : > { %v1414_v26 = vadd.f32 %v1413_v54, %v1301_v51  ;;  %1687 = vmatmul.f32.gmra.mxu0 %v4220_v57  ;;  %1822 = vmatmul.f32.gmra.mxu1 %v4138_v43  ;;  %4896 = vst [vmem:[#allocation29_spill] sm:$0xff] %v4236_v61  ;;  %v4245_v54 = vand.u32 4294901760, %v4236_v61  ;;  %v4261_v20 = vsub.f32 %v1611_v58, %v4247_v22 }
 0x1b9   : > { %v1497_v53 = vadd.f32 %v1496_v30, %v1414_v26  ;;  %1915 = vmatmul.f32.gmra.mxu2 %v4180_v36  ;;  %v1500_v56 = vpop.f32.mrf.mxu3  ;;  %4897 = vst [vmem:[#allocation30_spill] sm:$0xff] %v4245_v54  ;;  %v4898_v30 = vld [vmem:[#allocation16_spill] sm:$0xff]  ;;  %v1701_v19 = vsub.f32 %v4236_v61, %v4245_v54  ;;  %v1614_v26 = vsel %vm166_vm0, %v1583_v10, 0 }
 0x1ba   : > { %v722_v33 = vadd.f32 %v4001_v27, %v4898_v30  ;;  %4899 = vst [vmem:[#allocation16_spill] sm:$0xff] %v4261_v20 }
 0x1bb   : > { %v3004_v24 = vmul.f32 %v1497_v53, %v801_v48 }
 0x1bc   : > { %v1208_v8 = vpop.f32.mrf.mxu0  ;;  %v1306_v12 = vpop.f32.mrf.mxu1  ;;  %v805_v48 = vadd.f32 %v4011_v4, %v722_v33  ;;  %v1584_v4 = vld [vmem:[%s4808_s1 + $0x40] sm:$0xff] }
 0x1bd   : > { %3008 = vst [vmem:[%s4197_s5 + $0x10] sm:$0xff] %v3004_v24  ;;  %v1307_v51 = vadd.f32 %v1306_v12, %v1204_v37  ;;  %v1417_v60 = vpop.f32.mrf.mxu2  ;;  %v4266_v24 = vand.u32 4294901760, %v1701_v19  ;;  %v4269_v8 = vand.u32 4294901760, %v4261_v20  ;;  %v4271_v12 = vand.u32 4294901760, %v1614_v26 }
 0x1be   : > { %2024 = vmatmul.f32.gmra.mxu3 %v4217_v34 }
 0x1bf   : > { %v1418_v17 = vadd.f32 %v1417_v60, %v1307_v51  ;;  %1695 = vmatmul.f32.gmra.mxu0 %v4241_v21  ;;  %1826 = vmatmul.f32.gmra.mxu1 %v4165_v28  ;;  %4900 = vst [vmem:[#allocation31_spill] sm:$0xff] %v4269_v8  ;;  %v1709_v10 = vsub.f32 %v4261_v20, %v4269_v8 }
 0x1c0   : > { %v4293_v30 = vsub.f32 %v1614_v26, %v4271_v12 }
 0x1c1   : > { %v1501_v53 = vadd.f32 %v1500_v56, %v1418_v17  ;;  %1920 = vmatmul.f32.gmra.mxu2 %v4205_v55  ;;  %v1504_v27 = vpop.f32.mrf.mxu3  ;;  %v3201_v56 = vsel %vm2283_vm8, 1.0, %v4865_v59  ;;  %v1617_v17 = vsel %vm166_vm0, %v1584_v4, 0  ;;  %v4902_v59 = vand.u32 4294901760, %v4084_v3  ;;  %v1585_v4 = vld [vmem:[%s4808_s1 + $0x48] sm:$0xff] }
 0x1c2   : > { %4901 = vst [vmem:[#allocation32_spill] sm:$0xff] %v4293_v30  ;;  %v2521_v33 = vsub.f32 %v3201_v56, %v3201_v56  ;;  %v4306_v26 = vand.u32 4294901760, %v4293_v30  ;;  %v4308_v27 = vand.u32 4294901760, %v1617_v17 }
 0x1c3   : > { %v3005_v37 = vmul.f32 %v1501_v53, %v805_v48  ;;  %2824 = vmatpush.msrb.mxu2 %v4902_v59  ;;  %v4303_v53 = vand.u32 4294901760, %v1709_v10 }
 0x1c4   : > { %v1213_v51 = vpop.f32.mrf.mxu0  ;;  %v1312_v60 = vpop.f32.mrf.mxu1  ;;  %v2522_v48 = vand.u32 4294901760, %v2521_v33  ;;  %2610 = vmatpush.msrb.mxu0 %v2521_v33  ;;  %4903 = vst [vmem:[#allocation33_spill] sm:$0xff] %v4306_v26  ;;  %v1717_v56 = vsub.f32 %v4293_v30, %v4306_v26  ;;  %v4319_v10 = vsub.f32 %v1617_v17, %v4308_v27 }
 0x1c5   : > { %3009 = vst [vmem:[%s4197_s5 + $0x18] sm:$0xff] %v3005_v37  ;;  %v1421_v58 = vpop.f32.mrf.mxu2 }
 0x1c6   : > { %2030 = vmatmul.f32.gmra.mxu3 %v4245_v54  ;;  %v2523_v37 = vsub.f32 %v2521_v33, %v2522_v48  ;;  %2828 = vmatpush.msrb.mxu2 %v2522_v48  ;;  %4904 = vst [vmem:[#allocation34_spill] sm:$0xff] %v4319_v10  ;;  %v1620_v33 = vsel %vm166_vm0, %v1585_v4, 0  ;;  %v4330_v48 = vand.u32 4294901760, %v4319_v10 }
 0x1c7   : > { %1703 = vmatmul.f32.gmra.mxu0 %v4266_v24  ;;  %1830 = vmatmul.f32.gmra.mxu1 %v4189_v38 }
 0x1c8   : > { %v2524_v58 = vand.u32 4294901760, %v2523_v37  ;;  %4905 = vst [vmem:[#allocation35_spill] sm:$0xff] %v4330_v48  ;;  %v4332_v37 = vand.u32 4294901760, %v1620_v33 }
 0x1c9   : > { %1925 = vmatmul.f32.gmra.mxu2 %v4236_v61  ;;  %v1508_v19 = vpop.f32.mrf.mxu3 }
 0x1ca   : > { %2525 = vmatpush.msra.mxu3 %v2524_v58  ;;  %v4327_v19 = vand.u32 4294901760, %v1717_v56  ;;  %v4347_v58 = vsub.f32 %v1620_v33, %v4332_v37  ;;  %v4356_v56 = vand.u32 4294901760, %v1623_v5  ;;  %v1587_v33 = vld [vmem:[%s4808_s1 + $0x58] sm:$0xff] }
 0x1cc   : > { %v1218_v3 = vpop.f32.mrf.mxu0  ;;  %v1318_v51 = vpop.f32.mrf.mxu1  ;;  %3207 = vmatpush.msk.msrb.mxu3 %vm2284_vm7, %v4866_v41  ;;  %4906 = vst [vmem:[#allocation36_spill] sm:$0xff] %v4347_v58  ;;  %v4354_v4 = vand.u32 4294901760, %v4347_v58  ;;  %v4367_v9 = vsub.f32 %v1623_v5, %v4356_v56  ;;  %v1588_v5 = vld [vmem:[%s4808_s1 + $0x60] sm:$0xff] }
 0x1cd   : > { %v1425_v60 = vpop.f32.mrf.mxu2 }
 0x1ce   : > { %2036 = vmatmul.f32.gmra.mxu3 %v4269_v8  ;;  %v1725_v60 = vsub.f32 %v4319_v10, %v4330_v48  ;;  %4907 = vst [vmem:[#allocation37_spill] sm:$0xff] %v4354_v4 }
 0x1cf   : > { %1711 = vmatmul.f32.gmra.mxu0 %v4303_v53  ;;  %1834 = vmatmul.f32.gmra.mxu1 %v4222_v42  ;;  %4908 = vst [vmem:[#allocation38_spill] sm:$0xff] %v4367_v9 }
 0x1d0   : > { %3208 = vmatpush.msk.msrb.mxu3 %vm2283_vm8, %v4866_v41  ;;  %v4351_v18 = vand.u32 4294901760, %v1725_v60  ;;  %v1626_v60 = vsel %vm166_vm0, %v1587_v33, 0 }
 0x1d1   : > { %1930 = vmatmul.f32.gmra.mxu2 %v4261_v20  ;;  %v1512_v59 = vpop.f32.mrf.mxu3 }
 0x1d4   : > { %v1223_v17 = vpop.f32.mrf.mxu0  ;;  %v1324_v3 = vpop.f32.mrf.mxu1 }
 0x1d5   : > { %v1429_v51 = vpop.f32.mrf.mxu2 }
 0x1d6   : > { %2042 = vmatmul.f32.gmra.mxu3 %v4306_v26  ;;  %v1733_v51 = vsub.f32 %v4347_v58, %v4354_v4  ;;  %v4377_v26 = vand.u32 4294901760, %v1626_v60 }
 0x1d7   : > { %1719 = vmatmul.f32.gmra.mxu0 %v4327_v19  ;;  %1838 = vmatmul.f32.gmra.mxu1 %v4247_v22 }
 0x1d9   : > { %1935 = vmatmul.f32.gmra.mxu2 %v4293_v30  ;;  %v1516_v41 = vpop.f32.mrf.mxu3 }
 0x1dc   : > { %v1228_v59 = vpop.f32.mrf.mxu0  ;;  %v1330_v17 = vpop.f32.mrf.mxu1 }
 0x1dd   : > { %v1433_v3 = vpop.f32.mrf.mxu2  ;;  %v1229_v17 = vadd.f32 %v1228_v59, %v4021_v2  ;;  %v4388_v59 = vsub.f32 %v1626_v60, %v4377_v26 }
 0x1de   : > { %2048 = vmatmul.f32.gmra.mxu3 %v4330_v48  ;;  %v4372_v3 = vand.u32 4294901760, %v1733_v51  ;;  %v4375_v48 = vand.u32 4294901760, %v4367_v9 }
 0x1df   : > { %1727 = vmatmul.f32.gmra.mxu0 %v4351_v18  ;;  %1842 = vmatmul.f32.gmra.mxu1 %v4271_v12  ;;  %4910 = vst [vmem:[#allocation40_spill] sm:$0xff] %v4388_v59 }
 0x1e0   : > { %4909 = vst [vmem:[#allocation39_spill] sm:$0xff] %v4375_v48  ;;  %v1741_v2 = vsub.f32 %v4367_v9, %v4375_v48 }
 0x1e1   : > { %1940 = vmatmul.f32.gmra.mxu2 %v4319_v10  ;;  %v1520_v41 = vpop.f32.mrf.mxu3 }
 0x1e4   : > { %v1233_v8 = vpop.f32.mrf.mxu0  ;;  %v1336_v30 = vpop.f32.mrf.mxu1 }
 0x1e5   : > { %v1337_v54 = vadd.f32 %v1336_v30, %v1229_v17  ;;  %v1437_v20 = vpop.f32.mrf.mxu2  ;;  %v1629_v30 = vsel %vm166_vm0, %v1588_v5, 0 }
 0x1e6   : > { %2054 = vmatmul.f32.gmra.mxu3 %v4354_v4  ;;  %v1234_v4 = vadd.f32 %v1233_v8, %v4031_v11  ;;  %v4400_v10 = vand.u32 4294901760, %v1629_v30 }
 0x1e7   : > { %v1438_v33 = vadd.f32 %v1437_v20, %v1337_v54  ;;  %1735 = vmatmul.f32.gmra.mxu0 %v4372_v3  ;;  %1846 = vmatmul.f32.gmra.mxu1 %v4308_v27  ;;  %v4395_v54 = vand.u32 4294901760, %v1741_v2  ;;  %v4398_v20 = vand.u32 4294901760, %v4388_v59 }
 0x1e8   : > { %v4411_v8 = vsub.f32 %v1629_v30, %v4400_v10 }
 0x1e9   : > { %v4391_v51 = vadd.f32 %v1520_v41, %v1438_v33  ;;  %1945 = vmatmul.f32.gmra.mxu2 %v4347_v58  ;;  %v1524_v17 = vpop.f32.mrf.mxu3  ;;  %4912 = vst [vmem:[#allocation42_spill] sm:$0xff] %v4398_v20  ;;  %v1589_v41 = vld [vmem:[%s4808_s1 + $0x68] sm:$0xff]  ;;  %v1749_v11 = vsub.f32 %v4388_v59, %v4398_v20 }
 0x1ea   : > { %4913 = vst [vmem:[#allocation43_spill] sm:$0xff] %v4411_v8 }
 0x1eb   : > { %4911 = vst [vmem:[#allocation41_spill] sm:$0xff] %v4391_v51 }
 0x1ec   : > { %v1238_v34 = vpop.f32.mrf.mxu0  ;;  %v1342_v61 = vpop.f32.mrf.mxu1 }
 0x1ed   : > { %v1343_v60 = vadd.f32 %v1342_v61, %v1234_v4  ;;  %v1441_v46 = vpop.f32.mrf.mxu2  ;;  %v1632_v61 = vsel %vm166_vm0, %v1589_v41, 0  ;;  %v1239_v2 = vadd.f32 %v1238_v34, %v4041_v14 }
 0x1ee   : > { %2060 = vmatmul.f32.gmra.mxu3 %v4375_v48  ;;  %v4423_v48 = vand.u32 4294901760, %v1632_v61 }
 0x1ef   : > { %v1442_v5 = vadd.f32 %v1441_v46, %v1343_v60  ;;  %1743 = vmatmul.f32.gmra.mxu0 %v4395_v54  ;;  %1850 = vmatmul.f32.gmra.mxu1 %v4332_v37  ;;  %v4418_v46 = vand.u32 4294901760, %v1749_v11  ;;  %v4421_v60 = vand.u32 4294901760, %v4411_v8 }
 0x1f0   : > { %v4434_v34 = vsub.f32 %v1632_v61, %v4423_v48 }
 0x1f1   : > { %v4414_v4 = vadd.f32 %v1524_v17, %v1442_v5  ;;  %1950 = vmatmul.f32.gmra.mxu2 %v4367_v9  ;;  %v1528_v33 = vpop.f32.mrf.mxu3  ;;  %4915 = vst [vmem:[#allocation45_spill] sm:$0xff] %v4421_v60  ;;  %v1590_v17 = vld [vmem:[%s4808_s1 + $0x70] sm:$0xff]  ;;  %v1757_v14 = vsub.f32 %v4411_v8, %v4421_v60 }
 0x1f3   : > { %4914 = vst [vmem:[#allocation44_spill] sm:$0xff] %v4414_v4 }
 0x1f4   : > { %v1243_v58 = vpop.f32.mrf.mxu0  ;;  %v1348_v51 = vpop.f32.mrf.mxu1 }
 0x1f5   : > { %v1349_v30 = vadd.f32 %v1348_v51, %v1239_v2  ;;  %v1445_v55 = vpop.f32.mrf.mxu2  ;;  %v1635_v51 = vsel %vm166_vm0, %v1590_v17, 0  ;;  %v1244_v2 = vadd.f32 %v1243_v58, %v4051_v44 }
 0x1f6   : > { %2066 = vmatmul.f32.gmra.mxu3 %v4398_v20  ;;  %v4446_v20 = vand.u32 4294901760, %v1635_v51 }
 0x1f7   : > { %v1446_v41 = vadd.f32 %v1445_v55, %v1349_v30  ;;  %1751 = vmatmul.f32.gmra.mxu0 %v4418_v46  ;;  %1854 = vmatmul.f32.gmra.mxu1 %v4356_v56  ;;  %v4441_v55 = vand.u32 4294901760, %v1757_v14  ;;  %v4444_v30 = vand.u32 4294901760, %v4434_v34 }
 0x1f8   : > { %v4457_v58 = vsub.f32 %v1635_v51, %v4446_v20 }
 0x1f9   : > { %v4437_v5 = vadd.f32 %v1528_v33, %v1446_v41  ;;  %1955 = vmatmul.f32.gmra.mxu2 %v4388_v59  ;;  %v1532_v11 = vpop.f32.mrf.mxu3  ;;  %4917 = vst [vmem:[#allocation47_spill] sm:$0xff] %v4444_v30  ;;  %v1591_v33 = vld [vmem:[%s4808_s1 + $0x78] sm:$0xff]  ;;  %v1765_v44 = vsub.f32 %v4434_v34, %v4444_v30 }
 0x1fb   : > { %4916 = vst [vmem:[#allocation46_spill] sm:$0xff] %v4437_v5 }
 0x1fc   : > { %v1248_v9 = vpop.f32.mrf.mxu0  ;;  %v1354_v4 = vpop.f32.mrf.mxu1 }
 0x1fd   : > { %v1355_v61 = vadd.f32 %v1354_v4, %v1244_v2  ;;  %v1449_v39 = vpop.f32.mrf.mxu2  ;;  %v1638_v4 = vsel %vm166_vm0, %v1591_v33, 0  ;;  %v1249_v2 = vadd.f32 %v1248_v9, %v4067_v62 }
 0x1fe   : > { %2072 = vmatmul.f32.gmra.mxu3 %v4421_v60  ;;  %v4469_v60 = vand.u32 4294901760, %v1638_v4 }
 0x1ff   : > { %v1450_v17 = vadd.f32 %v1449_v39, %v1355_v61  ;;  %1759 = vmatmul.f32.gmra.mxu0 %v4441_v55  ;;  %1858 = vmatmul.f32.gmra.mxu1 %v4377_v26  ;;  %v4464_v39 = vand.u32 4294901760, %v1765_v44  ;;  %v4467_v61 = vand.u32 4294901760, %v4457_v58 }
 0x200   : > { %v4477_v9 = vsub.f32 %v1638_v4, %v4469_v60 }
 0x201   : > { %v4460_v41 = vadd.f32 %v1532_v11, %v1450_v17  ;;  %1960 = vmatmul.f32.gmra.mxu2 %v4411_v8  ;;  %v1536_v14 = vpop.f32.mrf.mxu3  ;;  %4918 = vst [vmem:[#allocation48_spill] sm:$0xff] %v4467_v61  ;;  %v1773_v62 = vsub.f32 %v4457_v58, %v4467_v61 }
 0x203   : > { %v4483_v44 = vand.u32 4294901760, %v1773_v62 }
 0x204   : > { %v1253_v59 = vpop.f32.mrf.mxu0  ;;  %v1360_v5 = vpop.f32.mrf.mxu1 }
 0x205   : > { %v1361_v51 = vadd.f32 %v1360_v5, %v1249_v2  ;;  %v1453_v47 = vpop.f32.mrf.mxu2  ;;  %v1254_v5 = vadd.f32 %v1253_v59, %v4099_v45 }
 0x206   : > { %2078 = vmatmul.f32.gmra.mxu3 %v4444_v30 }
 0x207   : > { %v1454_v11 = vadd.f32 %v1453_v47, %v1361_v51  ;;  %1767 = vmatmul.f32.gmra.mxu0 %v4464_v39  ;;  %1862 = vmatmul.f32.gmra.mxu1 %v4400_v10  ;;  %v4486_v47 = vand.u32 4294901760, %v4477_v9 }
 0x209   : > { %v4479_v33 = vadd.f32 %v1536_v14, %v1454_v11  ;;  %1965 = vmatmul.f32.gmra.mxu2 %v4434_v34  ;;  %v1540_v17 = vpop.f32.mrf.mxu3  ;;  %v1781_v14 = vsub.f32 %v4477_v9, %v4486_v47 }
 0x20b   : > { %4919 = vst [vmem:[#allocation49_spill] sm:$0xff] %v4479_v33  ;;  %v4497_v62 = vand.u32 4294901760, %v1781_v14 }
 0x20c   : > { %v1258_v2 = vpop.f32.mrf.mxu0  ;;  %v1366_v51 = vpop.f32.mrf.mxu1 }
 0x20d   : > { %v1367_v30 = vadd.f32 %v1366_v51, %v1254_v5  ;;  %v1457_v8 = vpop.f32.mrf.mxu2  ;;  %v1259_v11 = vadd.f32 %v1258_v2, %v4121_v1 }
 0x20e   : > { %2084 = vmatmul.f32.gmra.mxu3 %v4467_v61 }
 0x20f   : > { %v1458_v4 = vadd.f32 %v1457_v8, %v1367_v30  ;;  %1775 = vmatmul.f32.gmra.mxu0 %v4483_v44  ;;  %1866 = vmatmul.f32.gmra.mxu1 %v4423_v48 }
 0x211   : > { %v4493_v45 = vadd.f32 %v1540_v17, %v1458_v4  ;;  %1970 = vmatmul.f32.gmra.mxu2 %v4457_v58  ;;  %v1544_v59 = vpop.f32.mrf.mxu3 }
 0x213   : > { %4920 = vst [vmem:[#allocation50_spill] sm:$0xff] %v4493_v45 }
 0x214   : > { %v1263_v5 = vpop.f32.mrf.mxu0  ;;  %v1372_v51 = vpop.f32.mrf.mxu1 }
 0x215   : > { %v1373_v33 = vadd.f32 %v1372_v51, %v1259_v11  ;;  %v1461_v8 = vpop.f32.mrf.mxu2  ;;  %v1264_v1 = vadd.f32 %v1263_v5, %v4145_v29 }
 0x216   : > { %2090 = vmatmul.f32.gmra.mxu3 %v4486_v47 }
 0x217   : > { %v1462_v30 = vadd.f32 %v1461_v8, %v1373_v33  ;;  %1783 = vmatmul.f32.gmra.mxu0 %v4497_v62  ;;  %1870 = vmatmul.f32.gmra.mxu1 %v4446_v20 }
 0x219   : > { %v4502_v17 = vadd.f32 %v1544_v59, %v1462_v30  ;;  %1975 = vmatmul.f32.gmra.mxu2 %v4477_v9  ;;  %v1548_v4 = vpop.f32.mrf.mxu3 }
 0x21c   : > { %v1664_v2 = vpop.f32.mrf.mxu0  ;;  %v1378_v14 = vpop.f32.mrf.mxu1 }
 0x21d   : > { %v1379_v45 = vadd.f32 %v1378_v14, %v1264_v1  ;;  %v1465_v61 = vpop.f32.mrf.mxu2 }
 0x21e   : > { %2527 = vmatmul.f32.vlgmr.msra.gmra.mxu3 %v4086_v63 }
 0x21f   : > { %v1466_v11 = vadd.f32 %v1465_v61, %v1379_v45  ;;  %2117 = vmatmul.f32.vlgmr.msra.gmra.mxu0 %v4086_v63  ;;  %1874 = vmatmul.f32.gmra.mxu1 %v4469_v60 }
 0x221   : > { %v4509_v33 = vadd.f32 %v1548_v4, %v1466_v11  ;;  %2376 = vmatmul.f32.vlgmr.msra.gmra.mxu2 %v4133_v7  ;;  %v2001_v59 = vpop.f32.mrf.mxu3 }
 0x224   : > { %v1672_v51 = vpop.f32.mrf.mxu0  ;;  %v1815_v8 = vpop.f32.mrf.mxu1 }
 0x225   : > { %v1816_v30 = vadd.f32 %v1815_v8, %v1664_v2  ;;  %v1901_v29 = vpop.f32.mrf.mxu2 }
 0x226   : > { %2531 = vmatmul.f32.gmra.mxu3 %v4112_v49 }
 0x227   : > { %v1902_v5 = vadd.f32 %v1901_v29, %v1816_v30  ;;  %2121 = vmatmul.f32.gmra.mxu0 %v4112_v49  ;;  %2200 = vmatmul.f32.vlgmr.msra.gmra.mxu1 %v4086_v63 }
 0x229   : > { %v4515_v61 = vadd.f32 %v2001_v59, %v1902_v5  ;;  %2384 = vmatmul.f32.gmra.mxu2 %v4159_v50  ;;  %v2007_v45 = vpop.f32.mrf.mxu3 }
 0x22c   : > { %v1680_v4 = vpop.f32.mrf.mxu0  ;;  %v1819_v1 = vpop.f32.mrf.mxu1 }
 0x22d   : > { %v1820_v7 = vadd.f32 %v1819_v1, %v1672_v51  ;;  %v1906_v14 = vpop.f32.mrf.mxu2 }
 0x22e   : > { %2535 = vmatmul.f32.gmra.mxu3 %v4138_v43 }
 0x22f   : > { %v1907_v2 = vadd.f32 %v1906_v14, %v1820_v7  ;;  %2125 = vmatmul.f32.gmra.mxu0 %v4138_v43  ;;  %2204 = vmatmul.f32.gmra.mxu1 %v4112_v49 }
 0x231   : > { %v4521_v11 = vadd.f32 %v2007_v45, %v1907_v2  ;;  %2392 = vmatmul.f32.gmra.mxu2 %v4192_v35  ;;  %v2013_v59 = vpop.f32.mrf.mxu3 }
 0x234   : > { %v1688_v8 = vpop.f32.mrf.mxu0  ;;  %v1823_v30 = vpop.f32.mrf.mxu1 }
 0x235   : > { %v1824_v50 = vadd.f32 %v1823_v30, %v1680_v4  ;;  %v1911_v29 = vpop.f32.mrf.mxu2 }
 0x236   : > { %2539 = vmatmul.f32.gmra.mxu3 %v4165_v28 }
 0x237   : > { %v1912_v51 = vadd.f32 %v1911_v29, %v1824_v50  ;;  %2129 = vmatmul.f32.gmra.mxu0 %v4165_v28  ;;  %2208 = vmatmul.f32.gmra.mxu1 %v4138_v43 }
 0x239   : > { %v4527_v5 = vadd.f32 %v2013_v59, %v1912_v51  ;;  %2400 = vmatmul.f32.gmra.mxu2 %v4220_v57  ;;  %v2019_v45 = vpop.f32.mrf.mxu3 }
 0x23c   : > { %v1696_v1 = vpop.f32.mrf.mxu0  ;;  %v1827_v7 = vpop.f32.mrf.mxu1 }
 0x23d   : > { %v1828_v35 = vadd.f32 %v1827_v7, %v1688_v8  ;;  %v1916_v14 = vpop.f32.mrf.mxu2 }
 0x23e   : > { %2543 = vmatmul.f32.gmra.mxu3 %v4189_v38 }
 0x23f   : > { %v1917_v4 = vadd.f32 %v1916_v14, %v1828_v35  ;;  %2133 = vmatmul.f32.gmra.mxu0 %v4189_v38  ;;  %2212 = vmatmul.f32.gmra.mxu1 %v4165_v28 }
 0x241   : > { %v4533_v2 = vadd.f32 %v2019_v45, %v1917_v4  ;;  %2408 = vmatmul.f32.gmra.mxu2 %v4241_v21  ;;  %v2025_v59 = vpop.f32.mrf.mxu3 }
 0x244   : > { %v1704_v30 = vpop.f32.mrf.mxu0  ;;  %v1831_v50 = vpop.f32.mrf.mxu1 }
 0x245   : > { %v1832_v57 = vadd.f32 %v1831_v50, %v1696_v1  ;;  %v1921_v29 = vpop.f32.mrf.mxu2 }
 0x246   : > { %2547 = vmatmul.f32.gmra.mxu3 %v4222_v42 }
 0x247   : > { %v1922_v8 = vadd.f32 %v1921_v29, %v1832_v57  ;;  %2137 = vmatmul.f32.gmra.mxu0 %v4222_v42  ;;  %2216 = vmatmul.f32.gmra.mxu1 %v4189_v38 }
 0x249   : > { %v4539_v51 = vadd.f32 %v2025_v59, %v1922_v8  ;;  %2416 = vmatmul.f32.gmra.mxu2 %v4266_v24  ;;  %v2031_v45 = vpop.f32.mrf.mxu3 }
 0x24c   : > { %v1712_v7 = vpop.f32.mrf.mxu0  ;;  %v1835_v35 = vpop.f32.mrf.mxu1 }
 0x24d   : > { %v1836_v21 = vadd.f32 %v1835_v35, %v1704_v30  ;;  %v1926_v14 = vpop.f32.mrf.mxu2 }
 0x24e   : > { %2551 = vmatmul.f32.gmra.mxu3 %v4247_v22 }
 0x24f   : > { %v1927_v1 = vadd.f32 %v1926_v14, %v1836_v21  ;;  %2141 = vmatmul.f32.gmra.mxu0 %v4247_v22  ;;  %2220 = vmatmul.f32.gmra.mxu1 %v4222_v42 }
 0x251   : > { %v4545_v4 = vadd.f32 %v2031_v45, %v1927_v1  ;;  %2424 = vmatmul.f32.gmra.mxu2 %v4303_v53  ;;  %v2037_v59 = vpop.f32.mrf.mxu3 }
 0x254   : > { %v1720_v50 = vpop.f32.mrf.mxu0  ;;  %v1839_v57 = vpop.f32.mrf.mxu1 }
 0x255   : > { %v1840_v24 = vadd.f32 %v1839_v57, %v1712_v7  ;;  %v1931_v29 = vpop.f32.mrf.mxu2 }
 0x256   : > { %2555 = vmatmul.f32.gmra.mxu3 %v4271_v12 }
 0x257   : > { %v1932_v30 = vadd.f32 %v1931_v29, %v1840_v24  ;;  %2145 = vmatmul.f32.gmra.mxu0 %v4271_v12  ;;  %2224 = vmatmul.f32.gmra.mxu1 %v4247_v22 }
 0x259   : > { %v4551_v8 = vadd.f32 %v2037_v59, %v1932_v30  ;;  %2432 = vmatmul.f32.gmra.mxu2 %v4327_v19  ;;  %v2043_v45 = vpop.f32.mrf.mxu3 }
 0x25c   : > { %v1728_v35 = vpop.f32.mrf.mxu0  ;;  %v1843_v21 = vpop.f32.mrf.mxu1 }
 0x25d   : > { %v1844_v53 = vadd.f32 %v1843_v21, %v1720_v50  ;;  %v1936_v14 = vpop.f32.mrf.mxu2 }
 0x25e   : > { %2559 = vmatmul.f32.gmra.mxu3 %v4308_v27 }
 0x25f   : > { %v1937_v7 = vadd.f32 %v1936_v14, %v1844_v53  ;;  %2149 = vmatmul.f32.gmra.mxu0 %v4308_v27  ;;  %2228 = vmatmul.f32.gmra.mxu1 %v4271_v12 }
 0x261   : > { %v4557_v1 = vadd.f32 %v2043_v45, %v1937_v7  ;;  %2440 = vmatmul.f32.gmra.mxu2 %v4351_v18  ;;  %v2049_v59 = vpop.f32.mrf.mxu3 }
 0x264   : > { %v1736_v57 = vpop.f32.mrf.mxu0  ;;  %v1847_v24 = vpop.f32.mrf.mxu1 }
 0x265   : > { %v1941_v19 = vpop.f32.mrf.mxu2 }
 0x266   : > { %2563 = vmatmul.f32.gmra.mxu3 %v4332_v37 }
 0x267   : > { %2153 = vmatmul.f32.gmra.mxu0 %v4332_v37  ;;  %2232 = vmatmul.f32.gmra.mxu1 %v4308_v27 }
 0x269   : > { %2448 = vmatmul.f32.gmra.mxu2 %v4372_v3  ;;  %v2055_v50 = vpop.f32.mrf.mxu3 }
 0x26c   : > { %v1744_v29 = vpop.f32.mrf.mxu0  ;;  %v1851_v30 = vpop.f32.mrf.mxu1 }
 0x26d   : > { %v1946_v35 = vpop.f32.mrf.mxu2 }
 0x26e   : > { %2567 = vmatmul.f32.gmra.mxu3 %v4356_v56 }
 0x26f   : > { %2157 = vmatmul.f32.gmra.mxu0 %v4356_v56  ;;  %2236 = vmatmul.f32.gmra.mxu1 %v4332_v37 }
 0x271   : > { %2456 = vmatmul.f32.gmra.mxu2 %v4395_v54  ;;  %v2061_v18 = vpop.f32.mrf.mxu3 }
 0x274   : > { %v1752_v45 = vpop.f32.mrf.mxu0  ;;  %v1855_v21 = vpop.f32.mrf.mxu1 }
 0x275   : > { %v1951_v53 = vpop.f32.mrf.mxu2 }
 0x276   : > { %2571 = vmatmul.f32.gmra.mxu3 %v4377_v26 }
 0x277   : > { %2161 = vmatmul.f32.gmra.mxu0 %v4377_v26  ;;  %2240 = vmatmul.f32.gmra.mxu1 %v4356_v56 }
 0x279   : > { %2464 = vmatmul.f32.gmra.mxu2 %v4418_v46  ;;  %v2067_v3 = vpop.f32.mrf.mxu3 }
 0x27c   : > { %v1760_v14 = vpop.f32.mrf.mxu0  ;;  %v1859_v7 = vpop.f32.mrf.mxu1 }
 0x27d   : > { %v1956_v59 = vpop.f32.mrf.mxu2 }
 0x27e   : > { %2575 = vmatmul.f32.gmra.mxu3 %v4400_v10 }
 0x27f   : > { %2165 = vmatmul.f32.gmra.mxu0 %v4400_v10  ;;  %2244 = vmatmul.f32.gmra.mxu1 %v4377_v26 }
 0x281   : > { %2472 = vmatmul.f32.gmra.mxu2 %v4441_v55  ;;  %v2073_v54 = vpop.f32.mrf.mxu3 }
 0x284   : > { %v1768_v57 = vpop.f32.mrf.mxu0  ;;  %v1863_v24 = vpop.f32.mrf.mxu1 }
 0x285   : > { %v1864_v19 = vadd.f32 %v1863_v24, %v1760_v14  ;;  %v1961_v50 = vpop.f32.mrf.mxu2 }
 0x286   : > { %2579 = vmatmul.f32.gmra.mxu3 %v4423_v48 }
 0x287   : > { %v1962_v46 = vadd.f32 %v1961_v50, %v1864_v19  ;;  %2169 = vmatmul.f32.gmra.mxu0 %v4423_v48  ;;  %2248 = vmatmul.f32.gmra.mxu1 %v4400_v10 }
 0x289   : > { %v4579_v29 = vadd.f32 %v2073_v54, %v1962_v46  ;;  %2480 = vmatmul.f32.gmra.mxu2 %v4464_v39  ;;  %v2079_v30 = vpop.f32.mrf.mxu3 }
 0x28c   : > { %v1776_v35 = vpop.f32.mrf.mxu0  ;;  %v1867_v18 = vpop.f32.mrf.mxu1 }
 0x28d   : > { %v1868_v55 = vadd.f32 %v1867_v18, %v1768_v57  ;;  %v1966_v45 = vpop.f32.mrf.mxu2 }
 0x28e   : > { %2583 = vmatmul.f32.gmra.mxu3 %v4446_v20 }
 0x28f   : > { %v1967_v21 = vadd.f32 %v1966_v45, %v1868_v55  ;;  %2173 = vmatmul.f32.gmra.mxu0 %v4446_v20  ;;  %2252 = vmatmul.f32.gmra.mxu1 %v4423_v48  ;;  %v4921_v55 = vld [vmem:[#allocation17_spill] sm:$0xff] }
 0x291   : > { %v4585_v53 = vadd.f32 %v2079_v30, %v1967_v21  ;;  %2488 = vmatmul.f32.gmra.mxu2 %v4483_v44  ;;  %v2085_v3 = vpop.f32.mrf.mxu3 }
 0x294   : > { %v1784_v14 = vpop.f32.mrf.mxu0  ;;  %v1871_v7 = vpop.f32.mrf.mxu1 }
 0x295   : > { %v1872_v39 = vadd.f32 %v1871_v7, %v1776_v35  ;;  %v1971_v59 = vpop.f32.mrf.mxu2 }
 0x296   : > { %2587 = vmatmul.f32.gmra.mxu3 %v4469_v60 }
 0x297   : > { %v1972_v54 = vadd.f32 %v1971_v59, %v1872_v39  ;;  %2177 = vmatmul.f32.gmra.mxu0 %v4469_v60  ;;  %2256 = vmatmul.f32.gmra.mxu1 %v4446_v20 }
 0x299   : > { %v4591_v57 = vadd.f32 %v2085_v3, %v1972_v54  ;;  %2496 = vmatmul.f32.gmra.mxu2 %v4497_v62  ;;  %v2091_v24 = vpop.f32.mrf.mxu3  ;;  %v726_v62 = vadd.f32 %v4009_v0, %v4921_v55 }
 0x29c   : > { %v2118_v19 = vpop.f32.mrf.mxu0  ;;  %v1875_v50 = vpop.f32.mrf.mxu1 }
 0x29d   : > { %v1876_v44 = vadd.f32 %v1875_v50, %v1784_v14  ;;  %v1976_v46 = vpop.f32.mrf.mxu2  ;;  %v2119_v45 = vadd.f32 %v2118_v19, %v4515_v61  ;;  %v809_v14 = vadd.f32 %v4019_v13, %v726_v62 }
 0x29e   : > { %2913 = vmatmul.f32.vlgmr.msrb.gmra.mxu3 %v4086_v63 }
 0x29f   : > { %v1977_v30 = vadd.f32 %v1976_v46, %v1876_v44  ;;  %2613 = vmatmul.f32.vlgmr.msrb.gmra.mxu0 %v4105_v52  ;;  %2260 = vmatmul.f32.gmra.mxu1 %v4469_v60 }
 0x2a1   : > { %v4597_v35 = vadd.f32 %v2091_v24, %v1977_v30  ;;  %2830 = vmatmul.f32.vlgmr.msrb.gmra.mxu2 %v4086_v63  ;;  %v2528_v18 = vpop.f32.mrf.mxu3  ;;  %v4922_v63 = vld [vmem:[#allocation18_spill] sm:$0xff] }
 0x2a2   : > { %v730_v61 = vadd.f32 %v4017_v25, %v4922_v63 }
 0x2a4   : > { %v2122_v21 = vpop.f32.mrf.mxu0  ;;  %v2201_v3 = vpop.f32.mrf.mxu1  ;;  %v813_v19 = vadd.f32 %v4029_v32, %v730_v61  ;;  %v4928_v61 = vld [vmem:[#allocation27_spill] sm:$0xff] }
 0x2a5   : > { %v2202_v7 = vadd.f32 %v2201_v3, %v2119_v45  ;;  %v2377_v39 = vpop.f32.mrf.mxu2  ;;  %v2123_v13 = vadd.f32 %v2122_v21, %v4521_v11 }
 0x2a6   : > { %v4604_v52 = vadd.f32 %v2528_v18, %v2377_v39  ;;  %2917 = vmatmul.f32.gmra.mxu3 %v4112_v49 }
 0x2a7   : > { %v3018_v59 = vmul.f32 %v2202_v7, %v809_v14  ;;  %2618 = vmatmul.f32.gmra.mxu0 %v4129_v6  ;;  %2713 = vmatmul.f32.vlgmr.msrb.gmra.mxu1 %v4110_v23  ;;  %v4927_v7 = vld [vmem:[#allocation26_spill] sm:$0xff] }
 0x2a9   : > { %3209 = vst [vmem:[%s4197_s5 + $0x20] sm:$0xff] %v3018_v59  ;;  %2834 = vmatmul.f32.gmra.mxu2 %v4112_v49  ;;  %v2532_v0 = vpop.f32.mrf.mxu3  ;;  %v4923_v49 = vld [vmem:[#allocation19_spill] sm:$0xff] }
 0x2aa   : > { %v734_v6 = vadd.f32 %v4027_v31, %v4923_v49  ;;  %v4931_v49 = vld [vmem:[#allocation29_spill] sm:$0xff] }
 0x2ac   : > { %v2126_v54 = vpop.f32.mrf.mxu0  ;;  %v2205_v24 = vpop.f32.mrf.mxu1  ;;  %v817_v18 = vadd.f32 %v4039_v40, %v734_v6  ;;  %v4932_v6 = vld [vmem:[#allocation28_spill] sm:$0xff] }
 0x2ad   : > { %v2206_v50 = vadd.f32 %v2205_v24, %v2123_v13  ;;  %v2385_v44 = vpop.f32.mrf.mxu2  ;;  %v2127_v32 = vadd.f32 %v2126_v54, %v4527_v5  ;;  %v4926_v5 = vld [vmem:[#allocation25_spill] sm:$0xff] }
 0x2ae   : > { %v4615_v46 = vadd.f32 %v2532_v0, %v2385_v44  ;;  %2921 = vmatmul.f32.gmra.mxu3 %v4138_v43 }
 0x2af   : > { %v3019_v23 = vmul.f32 %v2206_v50, %v813_v19  ;;  %2623 = vmatmul.f32.gmra.mxu0 %v4153_v15  ;;  %2719 = vmatmul.f32.gmra.mxu1 %v4136_v16  ;;  %v4924_v16 = vld [vmem:[#allocation13_spill] sm:$0xff] }
 0x2b1   : > { %3210 = vst [vmem:[%s4197_s5 + $0x28] sm:$0xff] %v3019_v23  ;;  %2838 = vmatmul.f32.gmra.mxu2 %v4138_v43  ;;  %v2536_v25 = vpop.f32.mrf.mxu3  ;;  %v4925_v43 = vld [vmem:[#allocation20_spill] sm:$0xff]  ;;  %v4930_v23 = vld [vmem:[#allocation41_spill] sm:$0xff] }
 0x2b2   : > { %v738_v21 = vadd.f32 %v4926_v5, %v4925_v43 }
 0x2b4   : > { %v2130_v11 = vpop.f32.mrf.mxu0  ;;  %v2209_v30 = vpop.f32.mrf.mxu1  ;;  %v821_v39 = vadd.f32 %v4927_v7, %v738_v21 }
 0x2b5   : > { %v2210_v55 = vadd.f32 %v2209_v30, %v2127_v32  ;;  %v2393_v62 = vpop.f32.mrf.mxu2  ;;  %v2131_v40 = vadd.f32 %v2130_v11, %v4533_v2 }
 0x2b6   : > { %v4626_v45 = vadd.f32 %v2536_v25, %v2393_v62  ;;  %2925 = vmatmul.f32.gmra.mxu3 %v4165_v28  ;;  %v4933_v62 = vld [vmem:[#allocation44_spill] sm:$0xff] }
 0x2b7   : > { %v3020_v15 = vmul.f32 %v2210_v55, %v817_v18  ;;  %2628 = vmatmul.f32.gmra.mxu0 %v4180_v36  ;;  %2725 = vmatmul.f32.gmra.mxu1 %v4924_v16  ;;  %v4934_v16 = vld [vmem:[#allocation16_spill] sm:$0xff] }
 0x2b9   : > { %3211 = vst [vmem:[%s4197_s5 + $0x30] sm:$0xff] %v3020_v15  ;;  %2842 = vmatmul.f32.gmra.mxu2 %v4165_v28  ;;  %v2540_v31 = vpop.f32.mrf.mxu3  ;;  %v4929_v28 = vld [vmem:[#allocation15_spill] sm:$0xff] }
 0x2bc   : > { %v2134_v3 = vpop.f32.mrf.mxu0  ;;  %v2213_v14 = vpop.f32.mrf.mxu1 }
 0x2bd   : > { %v2214_v59 = vadd.f32 %v2213_v14, %v2131_v40  ;;  %v2401_v0 = vpop.f32.mrf.mxu2  ;;  %v2135_v13 = vadd.f32 %v2134_v3, %v4539_v51  ;;  %v4936_v14 = vld [vmem:[#allocation46_spill] sm:$0xff] }
 0x2be   : > { %v4637_v63 = vadd.f32 %v2540_v31, %v2401_v0  ;;  %2929 = vmatmul.f32.gmra.mxu3 %v4189_v38  ;;  %v4935_v31 = vld [vmem:[#allocation30_spill] sm:$0xff] }
 0x2bf   : > { %v3021_v36 = vmul.f32 %v2214_v59, %v821_v39  ;;  %2633 = vmatmul.f32.gmra.mxu0 %v4928_v61  ;;  %2731 = vmatmul.f32.gmra.mxu1 %v4929_v28  ;;  %v4937_v39 = vld [vmem:[#allocation32_spill] sm:$0xff]  ;;  %v4938_v59 = vld [vmem:[#allocation31_spill] sm:$0xff] }
 0x2c1   : > { %3212 = vst [vmem:[%s4197_s5 + $0x38] sm:$0xff] %v3021_v36  ;;  %2846 = vmatmul.f32.gmra.mxu2 %v4189_v38  ;;  %v2544_v2 = vpop.f32.mrf.mxu3 }
 0x2c4   : > { %v2138_v54 = vpop.f32.mrf.mxu0  ;;  %v2217_v24 = vpop.f32.mrf.mxu1 }
 0x2c5   : > { %v2218_v19 = vadd.f32 %v2217_v24, %v2135_v13  ;;  %v2409_v50 = vpop.f32.mrf.mxu2  ;;  %v2139_v51 = vadd.f32 %v2138_v54, %v4545_v4  ;;  %v4939_v54 = vld [vmem:[#allocation34_spill] sm:$0xff]  ;;  %v4940_v24 = vld [vmem:[#allocation33_spill] sm:$0xff] }
 0x2c6   : > { %v4645_v44 = vadd.f32 %v2544_v2, %v2409_v50  ;;  %2933 = vmatmul.f32.gmra.mxu3 %v4222_v42 }
 0x2c7   : > { %v3052_v25 = vmul.f32 %v2218_v19, %v4930_v23  ;;  %2638 = vmatmul.f32.gmra.mxu0 %v4931_v49  ;;  %2737 = vmatmul.f32.gmra.mxu1 %v4932_v6  ;;  %v4942_v49 = vld [vmem:[#allocation35_spill] sm:$0xff] }
 0x2c9   : > { %3217 = vst [vmem:[%s4197_s5 + $0x60] sm:$0xff] %v3052_v25  ;;  %2850 = vmatmul.f32.gmra.mxu2 %v4222_v42  ;;  %v2548_v38 = vpop.f32.mrf.mxu3  ;;  %v4941_v25 = vld [vmem:[#allocation36_spill] sm:$0xff] }
 0x2cc   : > { %v2142_v32 = vpop.f32.mrf.mxu0  ;;  %v2221_v11 = vpop.f32.mrf.mxu1 }
 0x2cd   : > { %v2222_v30 = vadd.f32 %v2221_v11, %v2139_v51  ;;  %v2417_v18 = vpop.f32.mrf.mxu2  ;;  %v2143_v4 = vadd.f32 %v2142_v32, %v4551_v8  ;;  %v4944_v11 = vld [vmem:[#allocation37_spill] sm:$0xff] }
 0x2ce   : > { %v4654_v55 = vadd.f32 %v2548_v38, %v2417_v18  ;;  %2937 = vmatmul.f32.gmra.mxu3 %v4247_v22 }
 0x2cf   : > { %v3053_v15 = vmul.f32 %v2222_v30, %v4933_v62  ;;  %2643 = vmatmul.f32.gmra.mxu0 %v4934_v16  ;;  %2743 = vmatmul.f32.gmra.mxu1 %v4935_v31  ;;  %v4946_v31 = vld [vmem:[#allocation39_spill] sm:$0xff] }
 0x2d1   : > { %3218 = vst [vmem:[%s4197_s5 + $0x68] sm:$0xff] %v3053_v15  ;;  %2854 = vmatmul.f32.gmra.mxu2 %v4247_v22  ;;  %v2552_v42 = vpop.f32.mrf.mxu3 }
 0x2d4   : > { %v2146_v43 = vpop.f32.mrf.mxu0  ;;  %v2225_v5 = vpop.f32.mrf.mxu1 }
 0x2d5   : > { %v2226_v21 = vadd.f32 %v2225_v5, %v2143_v4  ;;  %v2425_v40 = vpop.f32.mrf.mxu2  ;;  %v2147_v8 = vadd.f32 %v2146_v43, %v4557_v1 }
 0x2d6   : > { %v4663_v3 = vadd.f32 %v2552_v42, %v2425_v40  ;;  %2941 = vmatmul.f32.gmra.mxu3 %v4271_v12  ;;  %v4947_v40 = vld [vmem:[#allocation42_spill] sm:$0xff] }
 0x2d7   : > { %v3054_v7 = vmul.f32 %v2226_v21, %v4936_v14  ;;  %2648 = vmatmul.f32.gmra.mxu0 %v4937_v39  ;;  %2749 = vmatmul.f32.gmra.mxu1 %v4938_v59  ;;  %v4948_v14 = vld [vmem:[#allocation43_spill] sm:$0xff] }
 0x2d9   : > { %3219 = vst [vmem:[%s4197_s5 + $0x70] sm:$0xff] %v3054_v7  ;;  %2858 = vmatmul.f32.gmra.mxu2 %v4271_v12  ;;  %v2556_v22 = vpop.f32.mrf.mxu3 }
 0x2dc   : > { %v2150_v0 = vpop.f32.mrf.mxu0  ;;  %v2229_v36 = vpop.f32.mrf.mxu1 }
 0x2dd   : > { %v2230_v61 = vadd.f32 %v2229_v36, %v2147_v8  ;;  %v2433_v28 = vpop.f32.mrf.mxu2 }
 0x2de   : > { %v4672_v2 = vadd.f32 %v2556_v22, %v2433_v28  ;;  %2945 = vmatmul.f32.gmra.mxu3 %v4308_v27 }
 0x2df   : > { %v3055_v13 = vmul.f32 %v2230_v61, %v4460_v41  ;;  %2653 = vmatmul.f32.gmra.mxu0 %v4939_v54  ;;  %2755 = vmatmul.f32.gmra.mxu1 %v4940_v24 }
 0x2e1   : > { %3220 = vst [vmem:[%s4197_s5 + $0x78] sm:$0xff] %v3055_v13  ;;  %2862 = vmatmul.f32.gmra.mxu2 %v4308_v27  ;;  %v2560_v12 = vpop.f32.mrf.mxu3  ;;  %v4943_v27 = vld [vmem:[#allocation38_spill] sm:$0xff] }
 0x2e4   : > { %v2154_v19 = vpop.f32.mrf.mxu0  ;;  %v2233_v1 = vpop.f32.mrf.mxu1 }
 0x2e5   : > { %v2441_v50 = vpop.f32.mrf.mxu2 }
 0x2e6   : > { %v4680_v23 = vadd.f32 %v2560_v12, %v2441_v50  ;;  %2949 = vmatmul.f32.gmra.mxu3 %v4332_v37 }
 0x2e7   : > { %2658 = vmatmul.f32.gmra.mxu0 %v4941_v25  ;;  %2761 = vmatmul.f32.gmra.mxu1 %v4942_v49 }
 0x2e9   : > { %2866 = vmatmul.f32.gmra.mxu2 %v4332_v37  ;;  %v2564_v41 = vpop.f32.mrf.mxu3  ;;  %v4945_v37 = vld [vmem:[#allocation40_spill] sm:$0xff] }
 0x2ec   : > { %v2158_v6 = vpop.f32.mrf.mxu0  ;;  %v2237_v38 = vpop.f32.mrf.mxu1 }
 0x2ed   : > { %v2449_v51 = vpop.f32.mrf.mxu2 }
 0x2ee   : > { %v4686_v32 = vadd.f32 %v2564_v41, %v2449_v51  ;;  %2953 = vmatmul.f32.gmra.mxu3 %v4356_v56 }
 0x2ef   : > { %2663 = vmatmul.f32.gmra.mxu0 %v4943_v27  ;;  %2767 = vmatmul.f32.gmra.mxu1 %v4944_v11  ;;  %v4952_v27 = vld [vmem:[#allocation21_spill] sm:$0xff] }
 0x2f1   : > { %2870 = vmatmul.f32.gmra.mxu2 %v4356_v56  ;;  %v2568_v30 = vpop.f32.mrf.mxu3 }
 0x2f4   : > { %v2162_v18 = vpop.f32.mrf.mxu0  ;;  %v2241_v62 = vpop.f32.mrf.mxu1 }
 0x2f5   : > { %v2457_v15 = vpop.f32.mrf.mxu2 }
 0x2f6   : > { %v4692_v16 = vadd.f32 %v2568_v30, %v2457_v15  ;;  %2957 = vmatmul.f32.gmra.mxu3 %v4377_v26  ;;  %v4954_v30 = vld [vmem:[#allocation7_spill] sm:$0xff] }
 0x2f7   : > { %2668 = vmatmul.f32.gmra.mxu0 %v4945_v37  ;;  %2773 = vmatmul.f32.gmra.mxu1 %v4946_v31 }
 0x2f9   : > { %2874 = vmatmul.f32.gmra.mxu2 %v4377_v26  ;;  %v2572_v42 = vpop.f32.mrf.mxu3 }
 0x2fc   : > { %v2166_v4 = vpop.f32.mrf.mxu0  ;;  %v2245_v43 = vpop.f32.mrf.mxu1 }
 0x2fd   : > { %v2167_v5 = vadd.f32 %v2166_v4, %v4579_v29  ;;  %v2465_v56 = vpop.f32.mrf.mxu2  ;;  %v4949_v29 = vld [vmem:[#allocation45_spill] sm:$0xff]  ;;  %v4955_v43 = vld [vmem:[#allocation22_spill] sm:$0xff] }
 0x2fe   : > { %v4699_v21 = vadd.f32 %v2572_v42, %v2465_v56  ;;  %2961 = vmatmul.f32.gmra.mxu3 %v4400_v10 }
 0x2ff   : > { %2779 = vmatmul.f32.gmra.mxu1 %v4947_v40  ;;  %2673 = vmatmul.f32.gmra.mxu0 %v4948_v14  ;;  %v4957_v14 = vld [vmem:[#allocation9_spill] sm:$0xff] }
 0x301   : > { %2878 = vmatmul.f32.gmra.mxu2 %v4400_v10  ;;  %v2576_v7 = vpop.f32.mrf.mxu3 }
 0x304   : > { %v2170_v39 = vpop.f32.mrf.mxu0  ;;  %v2249_v59 = vpop.f32.mrf.mxu1 }
 0x305   : > { %v2171_v26 = vadd.f32 %v2170_v39, %v4585_v53  ;;  %v4706_v22 = vadd.f32 %v2249_v59, %v2167_v5  ;;  %v2473_v8 = vpop.f32.mrf.mxu2  ;;  %v4950_v53 = vld [vmem:[#allocation47_spill] sm:$0xff]  ;;  %v4956_v5 = vld [vmem:[#allocation8_spill] sm:$0xff] }
 0x306   : > { %2965 = vmatmul.f32.gmra.mxu3 %v4423_v48  ;;  %v746_v56 = vadd.f32 %v4956_v5, %v4955_v43 }
 0x307   : > { %2785 = vmatmul.f32.gmra.mxu1 %v4949_v29  ;;  %2678 = vmatmul.f32.gmra.mxu0 %v4434_v34 }
 0x308   : > { %v829_v7 = vadd.f32 %v4957_v14, %v746_v56 }
 0x309   : > { %2882 = vmatmul.f32.gmra.mxu2 %v4423_v48  ;;  %v2580_v0 = vpop.f32.mrf.mxu3 }
 0x30c   : > { %v2174_v36 = vpop.f32.mrf.mxu0  ;;  %v2253_v61 = vpop.f32.mrf.mxu1 }
 0x30d   : > { %v2175_v10 = vadd.f32 %v2174_v36, %v4591_v57  ;;  %v4713_v28 = vadd.f32 %v2253_v61, %v2171_v26  ;;  %v2481_v13 = vpop.f32.mrf.mxu2  ;;  %v4951_v57 = vld [vmem:[#allocation48_spill] sm:$0xff]  ;;  %v4958_v61 = vld [vmem:[#allocation23_spill] sm:$0xff] }
 0x30e   : > { %2969 = vmatmul.f32.gmra.mxu3 %v4446_v20 }
 0x30f   : > { %2791 = vmatmul.f32.gmra.mxu1 %v4950_v53  ;;  %2683 = vmatmul.f32.gmra.mxu0 %v4457_v58 }
 0x311   : > { %2886 = vmatmul.f32.gmra.mxu2 %v4446_v20  ;;  %v2584_v54 = vpop.f32.mrf.mxu3 }
 0x312   : > { %v4960_v54 = vld [vmem:[#allocation11_spill] sm:$0xff] }
 0x314   : > { %v2178_v34 = vpop.f32.mrf.mxu0  ;;  %v2257_v24 = vpop.f32.mrf.mxu1 }
 0x315   : > { %v2179_v48 = vadd.f32 %v2178_v34, %v4597_v35  ;;  %v4720_v12 = vadd.f32 %v2257_v24, %v2175_v10  ;;  %v2489_v19 = vpop.f32.mrf.mxu2  ;;  %v4959_v10 = vld [vmem:[#allocation10_spill] sm:$0xff] }
 0x316   : > { %2973 = vmatmul.f32.gmra.mxu3 %v4469_v60  ;;  %v750_v13 = vadd.f32 %v4959_v10, %v4958_v61 }
 0x317   : > { %2797 = vmatmul.f32.gmra.mxu1 %v4951_v57  ;;  %2688 = vmatmul.f32.gmra.mxu0 %v4477_v9  ;;  %v4953_v9 = vld [vmem:[#allocation6_spill] sm:$0xff] }
 0x318   : > { %v742_v11 = vadd.f32 %v4953_v9, %v4952_v27  ;;  %v833_v34 = vadd.f32 %v4960_v54, %v750_v13 }
 0x319   : > { %2890 = vmatmul.f32.gmra.mxu2 %v4469_v60  ;;  %v2588_v1 = vpop.f32.mrf.mxu3 }
 0x31a   : > { %v825_v18 = vadd.f32 %v4954_v30, %v742_v11 }
 0x31c   : > { %v2614_v58 = vpop.f32.mrf.mxu0  ;;  %v2261_v50 = vpop.f32.mrf.mxu1 }
 0x31d   : > { %v4726_v20 = vadd.f32 %v2261_v50, %v2179_v48  ;;  %v2497_v25 = vpop.f32.mrf.mxu2  ;;  %v2615_v49 = vadd.f32 %v2614_v58, %v4604_v52 }
 0x31e   : > { %v4961_v25 = vld [vmem:[#allocation24_spill] sm:$0xff] }
 0x31f   : > { %2803 = vmatmul.f32.gmra.mxu1 %v4486_v47 }
 0x321   : > { %v2914_v35 = vpop.f32.mrf.mxu3 }
 0x324   : > { %v2619_v41 = vpop.f32.mrf.mxu0  ;;  %v2714_v6 = vpop.f32.mrf.mxu1 }
 0x325   : > { %v2715_v38 = vadd.f32 %v2714_v6, %v2615_v49  ;;  %v2831_v51 = vpop.f32.mrf.mxu2  ;;  %v2620_v37 = vadd.f32 %v2619_v41, %v4615_v46  ;;  %v4963_v6 = vld [vmem:[#allocation14_spill] sm:$0xff] }
 0x327   : > { %v2832_v60 = vadd.f32 %v2831_v51, %v2715_v38 }
 0x329   : > { %v2915_v62 = vadd.f32 %v2914_v35, %v2832_v60  ;;  %v2918_v15 = vpop.f32.mrf.mxu3  ;;  %v4962_v35 = vld [vmem:[#allocation12_spill] sm:$0xff] }
 0x32a   : > { %v754_v49 = vadd.f32 %v4962_v35, %v4961_v25 }
 0x32b   : > { %v3035_v47 = vmul.f32 %v2915_v62, %v825_v18 }
 0x32c   : > { %v2624_v31 = vpop.f32.mrf.mxu0  ;;  %v2720_v42 = vpop.f32.mrf.mxu1  ;;  %v837_v38 = vadd.f32 %v4963_v6, %v754_v49 }
 0x32d   : > { %3213 = vst [vmem:[%s4197_s5 + $0x40] sm:$0xff] %v3035_v47  ;;  %v2721_v52 = vadd.f32 %v2720_v42, %v2620_v37  ;;  %v2835_v4 = vpop.f32.mrf.mxu2  ;;  %v2625_v26 = vadd.f32 %v2624_v31, %v4626_v45  ;;  %v4964_v31 = vld [vmem:[#allocation49_spill] sm:$0xff] }
 0x32f   : > { %v2836_v40 = vadd.f32 %v2835_v4, %v2721_v52 }
 0x331   : > { %v2919_v39 = vadd.f32 %v2918_v15, %v2836_v40  ;;  %v2922_v59 = vpop.f32.mrf.mxu3 }
 0x333   : > { %v3036_v8 = vmul.f32 %v2919_v39, %v829_v7  ;;  %v4965_v7 = vld [vmem:[#allocation50_spill] sm:$0xff] }
 0x334   : > { %v2629_v46 = vpop.f32.mrf.mxu0  ;;  %v2726_v29 = vpop.f32.mrf.mxu1 }
 0x335   : > { %3214 = vst [vmem:[%s4197_s5 + $0x48] sm:$0xff] %v3036_v8  ;;  %v2727_v0 = vadd.f32 %v2726_v29, %v2625_v26  ;;  %v2839_v36 = vpop.f32.mrf.mxu2  ;;  %v2630_v19 = vadd.f32 %v2629_v46, %v4637_v63 }
 0x337   : > { %v2840_v53 = vadd.f32 %v2839_v36, %v2727_v0 }
 0x339   : > { %v2923_v24 = vadd.f32 %v2922_v59, %v2840_v53  ;;  %v2926_v48 = vpop.f32.mrf.mxu3 }
 0x33b   : > { %v3037_v57 = vmul.f32 %v2923_v24, %v833_v34 }
 0x33c   : > { %v2634_v45 = vpop.f32.mrf.mxu0  ;;  %v2732_v1 = vpop.f32.mrf.mxu1 }
 0x33d   : > { %3215 = vst [vmem:[%s4197_s5 + $0x50] sm:$0xff] %v3037_v57  ;;  %v2733_v58 = vadd.f32 %v2732_v1, %v2630_v19  ;;  %v2843_v50 = vpop.f32.mrf.mxu2  ;;  %v2635_v9 = vadd.f32 %v2634_v45, %v4645_v44 }
 0x33f   : > { %v2844_v41 = vadd.f32 %v2843_v50, %v2733_v58 }
 0x341   : > { %v2927_v51 = vadd.f32 %v2926_v48, %v2844_v41  ;;  %v2930_v27 = vpop.f32.mrf.mxu3 }
 0x343   : > { %v3038_v11 = vmul.f32 %v2927_v51, %v837_v38 }
 0x344   : > { %v2639_v63 = vpop.f32.mrf.mxu0  ;;  %v2738_v60 = vpop.f32.mrf.mxu1 }
 0x345   : > { %3216 = vst [vmem:[%s4197_s5 + $0x58] sm:$0xff] %v3038_v11  ;;  %v2739_v30 = vadd.f32 %v2738_v60, %v2635_v9  ;;  %v2847_v18 = vpop.f32.mrf.mxu2  ;;  %v2640_v47 = vadd.f32 %v2639_v63, %v4654_v55 }
 0x347   : > { %v2848_v62 = vadd.f32 %v2847_v18, %v2739_v30 }
 0x349   : > { %v2931_v15 = vadd.f32 %v2930_v27, %v2848_v62  ;;  %v2934_v37 = vpop.f32.mrf.mxu3 }
 0x34b   : > { %v3069_v42 = vmul.f32 %v2931_v15, %v4964_v31 }
 0x34c   : > { %v2644_v52 = vpop.f32.mrf.mxu0  ;;  %v2744_v4 = vpop.f32.mrf.mxu1 }
 0x34d   : > { %3221 = vst [vmem:[%s4197_s5 + $0x80] sm:$0xff] %v3069_v42  ;;  %v2745_v43 = vadd.f32 %v2744_v4, %v2640_v47  ;;  %v2851_v5 = vpop.f32.mrf.mxu2  ;;  %v2645_v14 = vadd.f32 %v2644_v52, %v4663_v3 }
 0x34f   : > { %v2852_v44 = vadd.f32 %v2851_v5, %v2745_v43 }
 0x351   : > { %v2935_v56 = vadd.f32 %v2934_v37, %v2852_v44  ;;  %v2938_v40 = vpop.f32.mrf.mxu3 }
 0x353   : > { %v3070_v39 = vmul.f32 %v2935_v56, %v4965_v7 }
 0x354   : > { %v2649_v59 = vpop.f32.mrf.mxu0  ;;  %v2750_v26 = vpop.f32.mrf.mxu1 }
 0x355   : > { %3222 = vst [vmem:[%s4197_s5 + $0x88] sm:$0xff] %v3070_v39  ;;  %v2751_v8 = vadd.f32 %v2750_v26, %v2645_v14  ;;  %v2855_v55 = vpop.f32.mrf.mxu2  ;;  %v2650_v36 = vadd.f32 %v2649_v59, %v4672_v2 }
 0x357   : > { %v2856_v46 = vadd.f32 %v2855_v55, %v2751_v8 }
 0x359   : > { %v2939_v29 = vadd.f32 %v2938_v40, %v2856_v46  ;;  %v2942_v0 = vpop.f32.mrf.mxu3 }
 0x35b   : > { %v3071_v61 = vmul.f32 %v2939_v29, %v4502_v17 }
 0x35c   : > { %v2654_v10 = vpop.f32.mrf.mxu0  ;;  %v2756_v13 = vpop.f32.mrf.mxu1 }
 0x35d   : > { %3223 = vst [vmem:[%s4197_s5 + $0x90] sm:$0xff] %v3071_v61  ;;  %v2757_v53 = vadd.f32 %v2756_v13, %v2650_v36  ;;  %v2859_v3 = vpop.f32.mrf.mxu2  ;;  %v2655_v48 = vadd.f32 %v2654_v10, %v4680_v23 }
 0x35f   : > { %v2860_v54 = vadd.f32 %v2859_v3, %v2757_v53 }
 0x361   : > { %v2943_v34 = vadd.f32 %v2942_v0, %v2860_v54  ;;  %v2946_v24 = vpop.f32.mrf.mxu3 }
 0x363   : > { %v3072_v19 = vmul.f32 %v2943_v34, %v4509_v33 }
 0x364   : > { %v2659_v57 = vpop.f32.mrf.mxu0  ;;  %v2762_v45 = vpop.f32.mrf.mxu1 }
 0x365   : > { %3224 = vst [vmem:[%s4197_s5 + $0x98] sm:$0xff] %v3072_v19  ;;  %v2763_v1 = vadd.f32 %v2762_v45, %v2655_v48  ;;  %v2863_v2 = vpop.f32.mrf.mxu2  ;;  %v2660_v25 = vadd.f32 %v2659_v57, %v4686_v32 }
 0x367   : > { %v2864_v58 = vadd.f32 %v2863_v2, %v2763_v1 }
 0x369   : > { %v2947_v17 = vadd.f32 %v2946_v24, %v2864_v58  ;;  %v2950_v50 = vpop.f32.mrf.mxu3 }
 0x36b   : > { %v3086_v35 = vmul.f32 %v2947_v17, %v4706_v22 }
 0x36c   : > { %v2664_v49 = vpop.f32.mrf.mxu0  ;;  %v2768_v41 = vpop.f32.mrf.mxu1 }
 0x36d   : > { %3225 = vst [vmem:[%s4197_s5 + $0xa0] sm:$0xff] %v3086_v35  ;;  %v2769_v23 = vadd.f32 %v2768_v41, %v2660_v25  ;;  %v2867_v6 = vpop.f32.mrf.mxu2  ;;  %v2665_v27 = vadd.f32 %v2664_v49, %v4692_v16 }
 0x36f   : > { %v2868_v33 = vadd.f32 %v2867_v6, %v2769_v23 }
 0x371   : > { %v2951_v38 = vadd.f32 %v2950_v50, %v2868_v33  ;;  %v2954_v51 = vpop.f32.mrf.mxu3 }
 0x373   : > { %v3087_v9 = vmul.f32 %v2951_v38, %v4713_v28 }
 0x374   : > { %v2669_v11 = vpop.f32.mrf.mxu0  ;;  %v2774_v63 = vpop.f32.mrf.mxu1 }
 0x375   : > { %3226 = vst [vmem:[%s4197_s5 + $0xa8] sm:$0xff] %v3087_v9  ;;  %v2775_v32 = vadd.f32 %v2774_v63, %v2665_v27  ;;  %v2871_v22 = vpop.f32.mrf.mxu2  ;;  %v2670_v62 = vadd.f32 %v2669_v11, %v4699_v21 }
 0x377   : > { %v2872_v60 = vadd.f32 %v2871_v22, %v2775_v32 }
 0x379   : > { %v2955_v30 = vadd.f32 %v2954_v51, %v2872_v60  ;;  %v2958_v18 = vpop.f32.mrf.mxu3 }
 0x37b   : > { %v3088_v15 = vmul.f32 %v2955_v30, %v4720_v12 }
 0x37c   : > { %v2780_v37 = vpop.f32.mrf.mxu1  ;;  %v2674_v16 = vpop.f32.mrf.mxu0 }
 0x37d   : > { %3227 = vst [vmem:[%s4197_s5 + $0xb0] sm:$0xff] %v3088_v15  ;;  %v2781_v28 = vadd.f32 %v2780_v37, %v2670_v62  ;;  %v2875_v47 = vpop.f32.mrf.mxu2 }
 0x37f   : > { %v2876_v31 = vadd.f32 %v2875_v47, %v2781_v28 }
 0x381   : > { %v2959_v42 = vadd.f32 %v2958_v18, %v2876_v31  ;;  %v2962_v52 = vpop.f32.mrf.mxu3 }
 0x383   : > { %v3089_v21 = vmul.f32 %v2959_v42, %v4726_v20 }
 0x384   : > { %v2786_v12 = vpop.f32.mrf.mxu1  ;;  %v2679_v4 = vpop.f32.mrf.mxu0 }
 0x385   : > { %3228 = vst [vmem:[%s4197_s5 + $0xb8] sm:$0xff] %v3089_v21  ;;  %v2879_v43 = vpop.f32.mrf.mxu2 }
 0x386   : > { %3308 = shalt.err (!%p3305_p3)
}
 0x387   : > { %s3347_s28 = smov 128   ;;  %s3348_s5 = smov 256  }
 0x388   : > { %s3349_s7 = smov 8  }
 0x389   : > { %3233 = dma.vmem_to_hbm [thread:$0]  (%p3403_p5), %s3108_s23, 3072, %s3110_s24, %s3096_s13, %s3347_s28, %s3348_s5, %s3349_s7   ;;  %v2966_v20 = vpop.f32.mrf.mxu3 }
 0x38c   : > { %v2792_v5 = vpop.f32.mrf.mxu1  ;;  %v2684_v44 = vpop.f32.mrf.mxu0 }
 0x38d   : > { %v2883_v56 = vpop.f32.mrf.mxu2 }
 0x391   : > { %v2970_v40 = vpop.f32.mrf.mxu3 }
 0x394   : > { %v2798_v14 = vpop.f32.mrf.mxu1  ;;  %v2689_v7 = vpop.f32.mrf.mxu0 }
 0x395   : > { %v2887_v39 = vpop.f32.mrf.mxu2 }
 0x399   : > { %v2974_v59 = vpop.f32.mrf.mxu3 }
 0x39c   : > { %v2804_v26 = vpop.f32.mrf.mxu1 }
 0x39d   : > { %v2891_v8 = vpop.f32.mrf.mxu2 }
 0x39e PF: > { %p3239_p4 = scmp.ge.s32.totalorder %s3343_s12, 2  ;;  %s3124_s8 = sand.u32 1, %s3331_s9  }
 0x39f   : > { %s3125_s19 = scalar_lea.sflag [#allocation4], %s3124_s8 }
 0x3a0   : > { %p3236_p7 = pnand %p3239_p4, %p3407_p6 }
 0x3a2   : > { %p3237_p5 = pneg %p3236_p7 }
 0x3a4   : > { %3326 = dma.done.wait (%p3237_p5), %s3125_s19, 3072  }
 0x3a5   : > { %3328 = vsyncadd (%p3237_p5), %s3125_s19, 4294964224  ;;  %p12_p8 = scmp.ge.s32.totalorder %s3390_s15, 4   ;;  %s4966_s9 = smov %s3335_s10 }
 0x3a6   : > { %s4967_s10 = smov %s3339_s11  ;;  %s4968_s11 = smov %s3401_s18 }
 0x3a7   : > { %s4969_s12 = smov %s3390_s15  ;;  %14 = sbr.rel (!%p12_p8) target bundleno = 3 (0x3), region = 71 }
 0x3ac   :  { %3131 = vsyncpa [#allocation4], 1 }
 0x3ad   :  { %3133 = vsyncpa [#allocation4 + $0x1], 1 }

</bundles_post_ra>
